<compile_context>
chip_gen: v7x
topology: tpu7x:2x2x1
jax: 0.10.0
libtpu: 0.0.40
codegen_flags: <defaults>
</compile_context>

<pallas_src>
import numpy as np
import jax
import jax.numpy as jnp
from jax.experimental import pallas as pl
from jax.experimental.pallas import tpu as pltpu

# ---------------- configuration (small shapes consistent with the module) ----
B = 4          # batch
T = 8          # sequence length
H = 32         # hidden_size
EN = 16        # embedding_sizeN
ET = 16        # embedding_sizeT (== embedding_sizeT_dyn, identity emb_transform)
VOCAB_N = 10   # vocab_sizeN
VOCAB_T = 12   # vocab_sizeT
STATIC_IDS = list(range(6))            # static_x_ids
V_DYN = VOCAB_T - len(STATIC_IDS)      # vocab_size_dyn
DROPOUT = 0.0

GW = 4 * H + 4 * ET        # fused gate width: [main LSTM 4H | dyn LSTM 4E] = 192
LREC = H + 2 * ET          # fused recurrent LHS width: [h | h_tensor | h_dyn] = 64
NINIT = 2 * H + 2 * ET     # packed inits: [h0 | c0 | dyn_h0 | dyn_c0] = 96

# ---------------- static / dynamic id dense maps (glue, numpy) ---------------
_static2dense = np.zeros((VOCAB_T,), np.int32)
_dynamic2dense = np.zeros((VOCAB_T,), np.int32)
_dyn_ids = sorted(set(range(VOCAB_T)) - set(STATIC_IDS))
for _i, _s in enumerate(sorted(STATIC_IDS)):
    _static2dense[_s] = _i
for _i, _d in enumerate(_dyn_ids):
    _dynamic2dense[_d] = _i
STATIC_IDS_ARR = jnp.asarray(sorted(STATIC_IDS), jnp.int32)
STATIC2DENSE = jnp.asarray(_static2dense)
DYNAMIC2DENSE = jnp.asarray(_dynamic2dense)


# ---------------- deterministic parameter init --------------------------------
def _uniform(key, shape, scale=0.1):
    return jax.random.uniform(key, shape, jnp.float32, -scale, scale)


def init_encoder_params(key):
    ks = jax.random.split(key, 14)
    p = {}
    p["embN"] = _uniform(ks[0], (VOCAB_N, EN))                 # nn.Embedding(vocab_sizeN, EN)
    p["embT"] = _uniform(ks[1], (len(STATIC_IDS), ET))         # nn.Embedding(vocab_size_static, ET)
    # main LSTMCell: input = cat([embN, h_tensor]) of size EN+ET, hidden H
    w_ih = _uniform(ks[2], (4 * H, EN + ET))
    w_hh = _uniform(ks[3], (4 * H, H))
    b_ih = _uniform(ks[4], (4 * H,))
    b_hh = _uniform(ks[5], (4 * H,))
    p["w_x_n"] = jnp.asarray(w_ih[:, :EN].T)                   # (EN, 4H)
    p["w_x_t"] = jnp.asarray(w_ih[:, EN:].T)                   # (ET, 4H)
    p["w_hh"] = jnp.asarray(w_hh.T)                            # (H, 4H)
    p["b"] = (b_ih + b_hh)[None, :]                            # (1, 4H)
    # dynamic LSTMCell: input = cat([embN, h_prev]) of size EN+H, hidden ET
    wd_ih = _uniform(ks[6], (4 * ET, EN + H))
    wd_hh = _uniform(ks[7], (4 * ET, ET))
    bd_ih = _uniform(ks[8], (4 * ET,))
    bd_hh = _uniform(ks[9], (4 * ET,))
    p["wd_x_n"] = jnp.asarray(wd_ih[:, :EN].T)                 # (EN, 4E)
    p["wd_x_h"] = jnp.asarray(wd_ih[:, EN:].T)                 # (H, 4E)
    p["wd_hh"] = jnp.asarray(wd_hh.T)                          # (E, 4E)
    p["bd"] = (bd_ih + bd_hh)[None, :]                         # (1, 4E)
    p["h0"] = _uniform(ks[10], (1, H))                         # hid_init
    p["c0"] = _uniform(ks[11], (1, H))                         # cell_init
    p["dyn_init_h"] = jax.random.uniform(ks[12], (1, ET), jnp.float32, -0.05, 0.05)
    p["dyn_init_c"] = jax.random.uniform(ks[13], (1, ET), jnp.float32, -0.05, 0.05)
    return p


def init_transform_params(key):
    k1, k2 = jax.random.split(key)
    w = _uniform(k1, (H, 2 * H))                               # nn.Linear(2H, H)
    b = _uniform(k2, (H,))
    return {"w_fw": jnp.asarray(w[:, :H].T),                   # (H, H)
            "w_bw": jnp.asarray(w[:, H:].T),                   # (H, H)
            "b": b[None, :]}                                   # (1, H)


def pack_direction(p):
    """Fused/packed weight layout consumed by the kernel."""
    # input weight: [w_x_n | wd_x_n]  (EN, 4H+4E)
    w_in = jnp.concatenate([p["w_x_n"], p["wd_x_n"]], axis=1)
    # recurrent weight, rows = [h_prev | h_tensor | h_dyn_prev]:
    #   h_prev     -> [w_hh   | wd_x_h]
    #   h_tensor   -> [w_x_t  | 0     ]
    #   h_dyn_prev -> [0      | wd_hh ]
    w_rec = jnp.concatenate([
        jnp.concatenate([p["w_hh"], p["wd_x_h"]], axis=1),
        jnp.concatenate([p["w_x_t"], jnp.zeros((ET, 4 * ET), jnp.float32)], axis=1),
        jnp.concatenate([jnp.zeros((ET, 4 * H), jnp.float32), p["wd_hh"]], axis=1),
    ], axis=0)                                                  # (H+2E, 4H+4E)
    b_cat = jnp.concatenate([p["b"], p["bd"]], axis=1)          # (1, 4H+4E)
    init_vec = jnp.concatenate(
        [p["h0"], p["c0"], p["dyn_init_h"], p["dyn_init_c"]], axis=1)  # (1, 2H+2E)
    return w_in, w_rec, b_cat, init_vec


# ---------------- glue: embedding lookups + static/dynamic classification -----
def precompute(p, n_ids, t_ids):
    """n_ids, t_ids: (B, T) int32 -> time-major (T, B, *) tensors."""
    n_emb = p["embN"][n_ids]                                                    # (B,T,EN)
    is_static = (t_ids[..., None] == STATIC_IDS_ARR[None, None, :]).any(-1)     # (B,T)
    stat_emb = jnp.where(is_static[..., None], p["embT"][STATIC2DENSE[t_ids]], 0.0)
    onehot = (jax.nn.one_hot(DYNAMIC2DENSE[t_ids], V_DYN, dtype=jnp.float32)
              * (~is_static)[..., None].astype(jnp.float32))                    # (B,T,V_DYN)
    return (jnp.transpose(n_emb, (1, 0, 2)),
            jnp.transpose(stat_emb, (1, 0, 2)),
            jnp.transpose(onehot, (1, 0, 2)))


# ---------------- Pallas kernel: both directions, whole sequence --------------
def _bidir_dyn_rnn_kernel(n_ref, stat_ref, oh_ref, w_in_ref, w_rec_ref,
                          b_ref, init_ref, out_ref, gx_s):
    # ---- hoisted, loop-invariant work ----------------------------------------
    # Input-side gate pre-activations for every timestep at once:
    #   (T*B, EN) @ (EN, 4H+4E) + bias  ->  (T*B, 4H+4E)   [one MXU matmul]
    gx_s[...] = (jnp.dot(n_ref[0], w_in_ref[0],
                         preferred_element_type=jnp.float32) + b_ref[0])

    w_rec = w_rec_ref[0]                              # (H+2E, 4H+4E)
    init = init_ref[0]                                # (1, 2H+2E)
    h = jnp.broadcast_to(init[:, 0:H], (B, H))
    c = jnp.broadcast_to(init[:, H:2 * H], (B, H))
    dih = jnp.broadcast_to(init[:, 2 * H:2 * H + ET], (B, ET))
    dic = jnp.broadcast_to(init[:, 2 * H + ET:2 * H + 2 * ET], (B, ET))

    dynh = jnp.zeros((B, V_DYN, ET), jnp.float32)     # per-(batch, dyn token) h table
    dync = jnp.zeros((B, V_DYN, ET), jnp.float32)     # per-(batch, dyn token) c table
    seen = jnp.zeros((B, V_DYN), jnp.float32)         # "slot already allocated" mask

    # ---- fully static, unrolled recurrence (T is tiny) ------------------------
    for s in range(T):
        gx = gx_s[pl.ds(s * B, B), :]                 # (B, 4H+4E) precomputed input gates
        stat_emb = stat_ref[0, s]                     # (B, ET)   zero where dynamic
        oh = oh_ref[0, s]                             # (B, V_DYN) zero where static

        is_dyn = jnp.sum(oh, axis=1, keepdims=True)             # (B,1) is_dynamic
        found = jnp.sum(oh * seen, axis=1, keepdims=True)       # (B,1) is_dynamic_update
        is_new = is_dyn - found                                 # (B,1) is_dynamic_new

        m3 = oh[:, :, None]                                     # (B, V_DYN, 1)
        h_sel = jnp.sum(dynh * m3, axis=1)                      # de_h_tensor[inds_update]
        c_sel = jnp.sum(dync * m3, axis=1)                      # de_c_tensor[inds_update]

        # h_tensor: static emb | stored dyn h (emb_transform == identity) | dyn init
        h_tensor = stat_emb + found * h_sel + is_new * dih
        h_dyn_prev = found * h_sel + is_new * dih
        c_dyn_prev = found * c_sel + is_new * dic

        # ---- ONE fused recurrent matmul for both LSTM cells ----
        lhs = jnp.concatenate([h, h_tensor, h_dyn_prev], axis=1)      # (B, H+2E)
        gates = gx + jnp.dot(lhs, w_rec, preferred_element_type=jnp.float32)

        # main LSTMCell (gates[:, :4H]) on state (h, c)
        i_g = jax.nn.sigmoid(gates[:, 0:H])
        f_g = jax.nn.sigmoid(gates[:, H:2 * H])
        g_g = jnp.tanh(gates[:, 2 * H:3 * H])
        o_g = jax.nn.sigmoid(gates[:, 3 * H:4 * H])
        c = f_g * c + i_g * g_g
        h = o_g * jnp.tanh(c)

        # dynamic LSTMCell (gates[:, 4H:]) on state (h_dyn_prev, c_dyn_prev)
        d0 = 4 * H
        id_g = jax.nn.sigmoid(gates[:, d0:d0 + ET])
        fd_g = jax.nn.sigmoid(gates[:, d0 + ET:d0 + 2 * ET])
        gd_g = jnp.tanh(gates[:, d0 + 2 * ET:d0 + 3 * ET])
        od_g = jax.nn.sigmoid(gates[:, d0 + 3 * ET:d0 + 4 * ET])
        c_dyn = fd_g * c_dyn_prev + id_g * gd_g
        h_dyn = od_g * jnp.tanh(c_dyn)

        # scatter updated dynamic state back into the dense per-(batch, token) tables
        dynh = dynh * (1.0 - m3) + m3 * h_dyn[:, None, :]
        dync = dync * (1.0 - m3) + m3 * c_dyn[:, None, :]
        seen = jnp.maximum(seen, oh)

        # Lane-dense output slab (B, T*H): write column block s*H into the VMEM
        # output buffer; the single HBM writeback happens once per direction.
        out_ref[0, :, pl.ds(s * H, H)] = h


def run_bidir_encoder_pallas(n_all, stat_all, oh_all, w_in_all, w_rec_all,
                             b_all, init_all):
    spec3 = lambda r, c: pl.BlockSpec((1, r, c), lambda d: (d, 0, 0))
    spec4 = lambda a, r, c: pl.BlockSpec((1, a, r, c), lambda d: (d, 0, 0, 0))
    return pl.pallas_call(
        _bidir_dyn_rnn_kernel,
        out_shape=jax.ShapeDtypeStruct((2, B, T * H), jnp.float32),
        grid=(2,),                               # direction axis: fw / bw
        in_specs=[spec3(T * B, EN),              # embeddingN, 2D (feeds hoisted matmul)
                  spec4(T, B, ET),               # static embedding per step
                  spec4(T, B, V_DYN),            # dynamic one-hot per step
                  spec3(EN, GW),                 # fused input weight  [w_x_n | wd_x_n]
                  spec3(LREC, GW),               # fused recurrent weight
                  spec3(1, GW),                  # fused bias [b | bd]
                  spec3(1, NINIT)],              # packed inits [h0|c0|dyn_h0|dyn_c0]
        out_specs=pl.BlockSpec((1, B, T * H), lambda d: (d, 0, 0)),
        scratch_shapes=[pltpu.VMEM((T * B, GW), jnp.float32)],   # hoisted input gates
        compiler_params=pltpu.CompilerParams(
            dimension_semantics=("parallel",)),  # fw/bw on separate cores on v7x
    )(n_all, stat_all, oh_all, w_in_all, w_rec_all, b_all, init_all)


# ---------------- bidirectional forward (Pallas) -------------------------------
def bidirectional_forward_pallas(p_fw, p_bw, p_tr, n_ids, t_ids):
    # bw direction consumes time-reversed token ids (flipping the tiny (B,T)
    # int arrays before the embedding gather keeps all in-kernel indexing static).
    pre_fw = precompute(p_fw, n_ids, t_ids)
    pre_bw = precompute(p_bw, jnp.flip(n_ids, 1), jnp.flip(t_ids, 1))
    n_all = jnp.stack([pre_fw[0].reshape(T * B, EN),
                       pre_bw[0].reshape(T * B, EN)])            # (2, T*B, EN)
    stat_all = jnp.stack([pre_fw[1], pre_bw[1]])                 # (2, T, B, ET)
    oh_all = jnp.stack([pre_fw[2], pre_bw[2]])                   # (2, T, B, V_DYN)
    pk_fw, pk_bw = pack_direction(p_fw), pack_direction(p_bw)
    packed = [jnp.stack([a, b]) for a, b in zip(pk_fw, pk_bw)]

    hs = run_bidir_encoder_pallas(n_all, stat_all, oh_all, *packed)  # (2, B, T*H)
    hs = hs.reshape(2, B, T, H)
    fw_h = hs[0]
    bw_h = jnp.flip(hs[1], axis=1)                               # un-reverse bw time
    # 2H -> H projection as one tiny fused dot in plain JAX (a dedicated
    # pallas_call for a (B*T,2H)x(2H,H) matmul would be pure launch overhead).
    return fw_h @ p_tr["w_fw"] + bw_h @ p_tr["w_bw"] + p_tr["b"]


# ---------------- pure-JAX reference (same semantics, for verification) --------
def _encoder_reference(p, n_emb_t, stat_t, onehot_t):
    T_, B_, _ = n_emb_t.shape
    H_ = p["w_hh"].shape[0]
    E_ = p["dyn_init_h"].shape[1]
    VD_ = onehot_t.shape[2]
    h = jnp.broadcast_to(p["h0"], (B_, H_))
    c = jnp.broadcast_to(p["c0"], (B_, H_))
    dynh = jnp.zeros((B_, VD_, E_), jnp.float32)
    dync = jnp.zeros((B_, VD_, E_), jnp.float32)
    seen = jnp.zeros((B_, VD_), jnp.float32)
    outs = []
    for t in range(T_):
        n_emb, stat_emb, oh = n_emb_t[t], stat_t[t], onehot_t[t]
        is_dyn = jnp.sum(oh, 1, keepdims=True)
        found = jnp.sum(oh * seen, 1, keepdims=True)
        is_new = is_dyn - found
        m3 = oh[:, :, None]
        h_sel = jnp.sum(dynh * m3, 1)
        c_sel = jnp.sum(dync * m3, 1)
        init_h = jnp.broadcast_to(p["dyn_init_h"], (B_, E_))
        init_c = jnp.broadcast_to(p["dyn_init_c"], (B_, E_))
        h_tensor = stat_emb + found * h_sel + is_new * init_h
        hdp = found * h_sel + is_new * init_h
        cdp = found * c_sel + is_new * init_c
        gates = n_emb @ p["w_x_n"] + h_tensor @ p["w_x_t"] + h @ p["w_hh"] + p["b"]
        c_new = (jax.nn.sigmoid(gates[:, H_:2 * H_]) * c
                 + jax.nn.sigmoid(gates[:, :H_]) * jnp.tanh(gates[:, 2 * H_:3 * H_]))
        h_new = jax.nn.sigmoid(gates[:, 3 * H_:]) * jnp.tanh(c_new)
        gd = n_emb @ p["wd_x_n"] + h @ p["wd_x_h"] + hdp @ p["wd_hh"] + p["bd"]
        c_dn = (jax.nn.sigmoid(gd[:, E_:2 * E_]) * cdp
                + jax.nn.sigmoid(gd[:, :E_]) * jnp.tanh(gd[:, 2 * E_:3 * E_]))
        h_dn = jax.nn.sigmoid(gd[:, 3 * E_:]) * jnp.tanh(c_dn)
        dynh = dynh * (1 - m3) + m3 * h_dn[:, None, :]
        dync = dync * (1 - m3) + m3 * c_dn[:, None, :]
        seen = jnp.maximum(seen, oh)
        h, c = h_new, c_new
        outs.append(h_new)
    return jnp.stack(outs, 0)


def bidirectional_reference(p_fw, p_bw, p_tr, n_ids, t_ids):
    out_fw = _encoder_reference(p_fw, *precompute(p_fw, n_ids, t_ids))
    out_bw = jnp.flip(_encoder_reference(
        p_bw, *precompute(p_bw, jnp.flip(n_ids, 1), jnp.flip(t_ids, 1))), 0)
    fw = jnp.transpose(out_fw, (1, 0, 2))
    bw = jnp.transpose(out_bw, (1, 0, 2))
    return fw @ p_tr["w_fw"] + bw @ p_tr["w_bw"] + p_tr["b"]


# ---------------- main ----------------------------------------------------------
if __name__ == "__main__":
    key = jax.random.PRNGKey(0)
    k_fw, k_bw, k_tr, k_n, k_t = jax.random.split(key, 5)
    p_fw = init_encoder_params(k_fw)
    p_bw = init_encoder_params(k_bw)
    p_tr = init_transform_params(k_tr)

    n_ids = jax.random.randint(k_n, (B, T), 0, VOCAB_N, dtype=jnp.int32)
    t_ids = jax.random.randint(k_t, (B, T), 0, VOCAB_T, dtype=jnp.int32)

    forward = jax.jit(bidirectional_forward_pallas)
    out = jax.block_until_ready(forward(p_fw, p_bw, p_tr, n_ids, t_ids))
    assert out.shape == (B, T, H)

    ref = jax.block_until_ready(bidirectional_reference(p_fw, p_bw, p_tr, n_ids, t_ids))
    np.testing.assert_allclose(np.asarray(out), np.asarray(ref), atol=5e-3, rtol=5e-3)

    print("KERNEL_OK")
</pallas_src>

<mosaic_0001>
module attributes {stable_mosaic.version = 11 : i64} {
  func.func @_bidir_dyn_rnn_kernel(%arg0: i32, %arg1: memref<1x32x16xf32, #tpu.memory_space<vmem>>, %arg2: memref<1x8x4x16xf32, #tpu.memory_space<vmem>>, %arg3: memref<1x8x4x6xf32, #tpu.memory_space<vmem>>, %arg4: memref<1x16x192xf32, #tpu.memory_space<vmem>>, %arg5: memref<1x64x192xf32, #tpu.memory_space<vmem>>, %arg6: memref<1x1x192xf32, #tpu.memory_space<vmem>>, %arg7: memref<1x1x96xf32, #tpu.memory_space<vmem>>, %arg8: memref<1x4x256xf32, #tpu.memory_space<vmem>>, %arg9: memref<32x192xf32, #tpu.memory_space<vmem>>) attributes {dimension_semantics = [#tpu.dimension_semantics<parallel>], iteration_bounds = array<i64: 2>, scalar_prefetch = 0 : i64, scratch_operands = 1 : i64, tpu.core_type = #tpu.core_type<tc>, window_params = [{transform_indices = @transform_0, window_bounds = array<i64: 1, 32, 16>}, {transform_indices = @transform_1, window_bounds = array<i64: 1, 8, 4, 16>}, {transform_indices = @transform_2, window_bounds = array<i64: 1, 8, 4, 6>}, {transform_indices = @transform_3, window_bounds = array<i64: 1, 16, 192>}, {transform_indices = @transform_4, window_bounds = array<i64: 1, 64, 192>}, {transform_indices = @transform_5, window_bounds = array<i64: 1, 1, 192>}, {transform_indices = @transform_6, window_bounds = array<i64: 1, 1, 96>}, {transform_indices = @transform_7, window_bounds = array<i64: 1, 4, 256>}]} {
    %c0 = arith.constant 0 : index
    %c0_0 = arith.constant 0 : index
    %c0_1 = arith.constant 0 : index
    %0 = vector.load %arg1[%c0, %c0_0, %c0_1] : memref<1x32x16xf32, #tpu.memory_space<vmem>>, vector<1x32x16xf32>
    %1 = vector.shape_cast %0 : vector<1x32x16xf32> to vector<32x16xf32>
    %c0_2 = arith.constant 0 : index
    %c0_3 = arith.constant 0 : index
    %c0_4 = arith.constant 0 : index
    %2 = vector.load %arg4[%c0_2, %c0_3, %c0_4] : memref<1x16x192xf32, #tpu.memory_space<vmem>>, vector<1x16x192xf32>
    %3 = vector.shape_cast %2 : vector<1x16x192xf32> to vector<16x192xf32>
    %cst = arith.constant dense<0.000000e+00> : vector<32x192xf32>
    %4 = tpu.matmul %1, %3, %cst {dimension_numbers = #tpu.dot_dimension_numbers<[1], [0], [0], [1], [0, 0, 1, 1], [], []>} : vector<32x16xf32>, vector<16x192xf32>, vector<32x192xf32> -> vector<32x192xf32>
    %c0_5 = arith.constant 0 : index
    %c0_6 = arith.constant 0 : index
    %c0_7 = arith.constant 0 : index
    %5 = vector.load %arg6[%c0_5, %c0_6, %c0_7] : memref<1x1x192xf32, #tpu.memory_space<vmem>>, vector<1x1x192xf32>
    %6 = vector.shape_cast %5 : vector<1x1x192xf32> to vector<1x192xf32>
    %7 = vector.broadcast %6 : vector<1x192xf32> to vector<32x192xf32>
    %8 = arith.addf %4, %7 : vector<32x192xf32>
    %c0_8 = arith.constant 0 : index
    %c0_9 = arith.constant 0 : index
    %9 = vector.load %arg9[%c0_8, %c0_9] : memref<32x192xf32, #tpu.memory_space<vmem>>, vector<32x192xf32>
    tpu.vector_store %arg9[%c0_8, %c0_9], %8 {strides = array<i32>} : memref<32x192xf32, #tpu.memory_space<vmem>>, vector<32x192xf32>,
    %c0_10 = arith.constant 0 : index
    %c0_11 = arith.constant 0 : index
    %c0_12 = arith.constant 0 : index
    %10 = vector.load %arg5[%c0_10, %c0_11, %c0_12] : memref<1x64x192xf32, #tpu.memory_space<vmem>>, vector<1x64x192xf32>
    %11 = vector.shape_cast %10 : vector<1x64x192xf32> to vector<64x192xf32>
    %c0_13 = arith.constant 0 : index
    %c0_14 = arith.constant 0 : index
    %c0_15 = arith.constant 0 : index
    %12 = vector.load %arg7[%c0_13, %c0_14, %c0_15] : memref<1x1x96xf32, #tpu.memory_space<vmem>>, vector<1x1x96xf32>
    %13 = vector.shape_cast %12 : vector<1x1x96xf32> to vector<1x96xf32>
    %14 = vector.extract_strided_slice %13 {offsets = [0, 0], sizes = [1, 32], strides = [1, 1]} : vector<1x96xf32> to vector<1x32xf32>
    %15 = vector.shape_cast %14 : vector<1x32xf32> to vector<1x32xf32>
    %16 = vector.broadcast %15 : vector<1x32xf32> to vector<4x32xf32>
    %17 = vector.extract_strided_slice %13 {offsets = [0, 32], sizes = [1, 32], strides = [1, 1]} : vector<1x96xf32> to vector<1x32xf32>
    %18 = vector.shape_cast %17 : vector<1x32xf32> to vector<1x32xf32>
    %19 = vector.broadcast %18 : vector<1x32xf32> to vector<4x32xf32>
    %20 = vector.extract_strided_slice %13 {offsets = [0, 64], sizes = [1, 16], strides = [1, 1]} : vector<1x96xf32> to vector<1x16xf32>
    %21 = vector.shape_cast %20 : vector<1x16xf32> to vector<1x16xf32>
    %22 = vector.broadcast %21 : vector<1x16xf32> to vector<4x16xf32>
    %23 = vector.extract_strided_slice %13 {offsets = [0, 80], sizes = [1, 16], strides = [1, 1]} : vector<1x96xf32> to vector<1x16xf32>
    %24 = vector.shape_cast %23 : vector<1x16xf32> to vector<1x16xf32>
    %25 = vector.broadcast %24 : vector<1x16xf32> to vector<4x16xf32>
    %cst_16 = arith.constant 0.000000e+00 : f32
    %26 = vector.broadcast %cst_16 : f32 to vector<4x6x16xf32>
    %cst_17 = arith.constant 0.000000e+00 : f32
    %27 = vector.broadcast %cst_17 : f32 to vector<4x6x16xf32>
    %cst_18 = arith.constant 0.000000e+00 : f32
    %28 = vector.broadcast %cst_18 : f32 to vector<4x6xf32>
    %c0_19 = arith.constant 0 : index
    %c0_20 = arith.constant 0 : index
    %29 = vector.load %arg9[%c0_19, %c0_20] : memref<32x192xf32, #tpu.memory_space<vmem>>, vector<4x192xf32>
    %c0_21 = arith.constant 0 : index
    %c0_22 = arith.constant 0 : index
    %c0_23 = arith.constant 0 : index
    %c0_24 = arith.constant 0 : index
    %30 = vector.load %arg2[%c0_21, %c0_22, %c0_23, %c0_24] : memref<1x8x4x16xf32, #tpu.memory_space<vmem>>, vector<1x1x4x16xf32>
    %31 = vector.shape_cast %30 : vector<1x1x4x16xf32> to vector<4x16xf32>
    %c0_25 = arith.constant 0 : index
    %c0_26 = arith.constant 0 : index
    %c0_27 = arith.constant 0 : index
    %c0_28 = arith.constant 0 : index
    %32 = vector.load %arg3[%c0_25, %c0_26, %c0_27, %c0_28] : memref<1x8x4x6xf32, #tpu.memory_space<vmem>>, vector<1x1x4x6xf32>
    %33 = vector.shape_cast %32 : vector<1x1x4x6xf32> to vector<4x6xf32>
    %cst_29 = arith.constant dense<0.000000e+00> : vector<4xf32>
    %34 = vector.multi_reduction <add>, %33, %cst_29 [1] : vector<4x6xf32> to vector<4xf32>
    %35 = vector.shape_cast %34 : vector<4xf32> to vector<4x1xf32>
    %36 = arith.mulf %33, %28 : vector<4x6xf32>
    %cst_30 = arith.constant dense<0.000000e+00> : vector<4xf32>
    %37 = vector.multi_reduction <add>, %36, %cst_30 [1] : vector<4x6xf32> to vector<4xf32>
    %38 = vector.shape_cast %37 : vector<4xf32> to vector<4x1xf32>
    %39 = arith.subf %35, %38 : vector<4x1xf32>
    %40 = vector.shape_cast %33 : vector<4x6xf32> to vector<4x6x1xf32>
    %41 = vector.broadcast %40 : vector<4x6x1xf32> to vector<4x6x16xf32>
    %42 = arith.mulf %26, %41 : vector<4x6x16xf32>
    %cst_31 = arith.constant dense<0.000000e+00> : vector<4x16xf32>
    %43 = vector.multi_reduction <add>, %42, %cst_31 [1] : vector<4x6x16xf32> to vector<4x16xf32>
    %44 = vector.broadcast %40 : vector<4x6x1xf32> to vector<4x6x16xf32>
    %45 = arith.mulf %27, %44 : vector<4x6x16xf32>
    %cst_32 = arith.constant dense<0.000000e+00> : vector<4x16xf32>
    %46 = vector.multi_reduction <add>, %45, %cst_32 [1] : vector<4x6x16xf32> to vector<4x16xf32>
    %47 = vector.broadcast %38 : vector<4x1xf32> to vector<4x16xf32>
    %48 = arith.mulf %47, %43 : vector<4x16xf32>
    %49 = arith.addf %31, %48 : vector<4x16xf32>
    %50 = vector.broadcast %39 : vector<4x1xf32> to vector<4x16xf32>
    %51 = arith.mulf %50, %22 : vector<4x16xf32>
    %52 = arith.addf %49, %51 : vector<4x16xf32>
    %53 = vector.broadcast %38 : vector<4x1xf32> to vector<4x16xf32>
    %54 = arith.mulf %53, %43 : vector<4x16xf32>
    %55 = vector.broadcast %39 : vector<4x1xf32> to vector<4x16xf32>
    %56 = arith.mulf %55, %22 : vector<4x16xf32>
    %57 = arith.addf %54, %56 : vector<4x16xf32>
    %58 = vector.broadcast %38 : vector<4x1xf32> to vector<4x16xf32>
    %59 = arith.mulf %58, %46 : vector<4x16xf32>
    %60 = vector.broadcast %39 : vector<4x1xf32> to vector<4x16xf32>
    %61 = arith.mulf %60, %25 : vector<4x16xf32>
    %62 = arith.addf %59, %61 : vector<4x16xf32>
    %63 = tpu.concatenate %16, %52, %57 in 1 : vector<4x32xf32>, vector<4x16xf32>, vector<4x16xf32> -> vector<4x64xf32>
    %cst_33 = arith.constant dense<0.000000e+00> : vector<4x192xf32>
    %64 = tpu.matmul %63, %11, %cst_33 {dimension_numbers = #tpu.dot_dimension_numbers<[1], [0], [0], [1], [0, 0, 1, 1], [], []>} : vector<4x64xf32>, vector<64x192xf32>, vector<4x192xf32> -> vector<4x192xf32>
    %65 = arith.addf %29, %64 : vector<4x192xf32>
    %66 = vector.extract_strided_slice %65 {offsets = [0, 0], sizes = [4, 32], strides = [1, 1]} : vector<4x192xf32> to vector<4x32xf32>
    %67 = arith.negf %66 : vector<4x32xf32>
    %68 = math.exp %67 : vector<4x32xf32>
    %cst_34 = arith.constant 1.000000e+00 : f32
    %69 = vector.broadcast %cst_34 : f32 to vector<4x32xf32>
    %70 = arith.addf %69, %68 : vector<4x32xf32>
    %71 = arith.divf %69, %70 : vector<4x32xf32>
    %72 = vector.extract_strided_slice %65 {offsets = [0, 32], sizes = [4, 32], strides = [1, 1]} : vector<4x192xf32> to vector<4x32xf32>
    %73 = arith.negf %72 : vector<4x32xf32>
    %74 = math.exp %73 : vector<4x32xf32>
    %cst_35 = arith.constant 1.000000e+00 : f32
    %75 = vector.broadcast %cst_35 : f32 to vector<4x32xf32>
    %76 = arith.addf %75, %74 : vector<4x32xf32>
    %77 = arith.divf %75, %76 : vector<4x32xf32>
    %78 = vector.extract_strided_slice %65 {offsets = [0, 64], sizes = [4, 32], strides = [1, 1]} : vector<4x192xf32> to vector<4x32xf32>
    %79 = math.tanh %78 : vector<4x32xf32>
    %80 = vector.extract_strided_slice %65 {offsets = [0, 96], sizes = [4, 32], strides = [1, 1]} : vector<4x192xf32> to vector<4x32xf32>
    %81 = arith.negf %80 : vector<4x32xf32>
    %82 = math.exp %81 : vector<4x32xf32>
    %cst_36 = arith.constant 1.000000e+00 : f32
    %83 = vector.broadcast %cst_36 : f32 to vector<4x32xf32>
    %84 = arith.addf %83, %82 : vector<4x32xf32>
    %85 = arith.divf %83, %84 : vector<4x32xf32>
    %86 = arith.mulf %77, %19 : vector<4x32xf32>
    %87 = arith.mulf %71, %79 : vector<4x32xf32>
    %88 = arith.addf %86, %87 : vector<4x32xf32>
    %89 = math.tanh %88 : vector<4x32xf32>
    %90 = arith.mulf %85, %89 : vector<4x32xf32>
    %91 = vector.extract_strided_slice %65 {offsets = [0, 128], sizes = [4, 16], strides = [1, 1]} : vector<4x192xf32> to vector<4x16xf32>
    %92 = arith.negf %91 : vector<4x16xf32>
    %93 = math.exp %92 : vector<4x16xf32>
    %cst_37 = arith.constant 1.000000e+00 : f32
    %94 = vector.broadcast %cst_37 : f32 to vector<4x16xf32>
    %95 = arith.addf %94, %93 : vector<4x16xf32>
    %96 = arith.divf %94, %95 : vector<4x16xf32>
    %97 = vector.extract_strided_slice %65 {offsets = [0, 144], sizes = [4, 16], strides = [1, 1]} : vector<4x192xf32> to vector<4x16xf32>
    %98 = arith.negf %97 : vector<4x16xf32>
    %99 = math.exp %98 : vector<4x16xf32>
    %cst_38 = arith.constant 1.000000e+00 : f32
    %100 = vector.broadcast %cst_38 : f32 to vector<4x16xf32>
    %101 = arith.addf %100, %99 : vector<4x16xf32>
    %102 = arith.divf %100, %101 : vector<4x16xf32>
    %103 = vector.extract_strided_slice %65 {offsets = [0, 160], sizes = [4, 16], strides = [1, 1]} : vector<4x192xf32> to vector<4x16xf32>
    %104 = math.tanh %103 : vector<4x16xf32>
    %105 = vector.extract_strided_slice %65 {offsets = [0, 176], sizes = [4, 16], strides = [1, 1]} : vector<4x192xf32> to vector<4x16xf32>
    %106 = arith.negf %105 : vector<4x16xf32>
    %107 = math.exp %106 : vector<4x16xf32>
    %cst_39 = arith.constant 1.000000e+00 : f32
    %108 = vector.broadcast %cst_39 : f32 to vector<4x16xf32>
    %109 = arith.addf %108, %107 : vector<4x16xf32>
    %110 = arith.divf %108, %109 : vector<4x16xf32>
    %111 = arith.mulf %102, %62 : vector<4x16xf32>
    %112 = arith.mulf %96, %104 : vector<4x16xf32>
    %113 = arith.addf %111, %112 : vector<4x16xf32>
    %114 = math.tanh %113 : vector<4x16xf32>
    %115 = arith.mulf %110, %114 : vector<4x16xf32>
    %cst_40 = arith.constant 1.000000e+00 : f32
    %116 = vector.broadcast %cst_40 : f32 to vector<4x6x1xf32>
    %117 = arith.subf %116, %40 : vector<4x6x1xf32>
    %118 = vector.broadcast %117 : vector<4x6x1xf32> to vector<4x6x16xf32>
    %119 = arith.mulf %26, %118 : vector<4x6x16xf32>
    %120 = vector.shape_cast %115 : vector<4x16xf32> to vector<4x1x16xf32>
    %121 = vector.broadcast %40 : vector<4x6x1xf32> to vector<4x6x16xf32>
    %122 = vector.broadcast %120 : vector<4x1x16xf32> to vector<4x6x16xf32>
    %123 = arith.mulf %121, %122 : vector<4x6x16xf32>
    %124 = arith.addf %119, %123 : vector<4x6x16xf32>
    %cst_41 = arith.constant 1.000000e+00 : f32
    %125 = vector.broadcast %cst_41 : f32 to vector<4x6x1xf32>
    %126 = arith.subf %125, %40 : vector<4x6x1xf32>
    %127 = vector.broadcast %126 : vector<4x6x1xf32> to vector<4x6x16xf32>
    %128 = arith.mulf %27, %127 : vector<4x6x16xf32>
    %129 = vector.shape_cast %113 : vector<4x16xf32> to vector<4x1x16xf32>
    %130 = vector.broadcast %40 : vector<4x6x1xf32> to vector<4x6x16xf32>
    %131 = vector.broadcast %129 : vector<4x1x16xf32> to vector<4x6x16xf32>
    %132 = arith.mulf %130, %131 : vector<4x6x16xf32>
    %133 = arith.addf %128, %132 : vector<4x6x16xf32>
    %134 = arith.maximumf %28, %33 : vector<4x6xf32>
    %c0_42 = arith.constant 0 : index
    %c0_43 = arith.constant 0 : index
    %c0_44 = arith.constant 0 : index
    %135 = vector.load %arg8[%c0_42, %c0_43, %c0_44] : memref<1x4x256xf32, #tpu.memory_space<vmem>>, vector<1x4x32xf32>
    %136 = vector.shape_cast %135 : vector<1x4x32xf32> to vector<4x32xf32>
    %137 = vector.shape_cast %90 : vector<4x32xf32> to vector<1x4x32xf32>
    tpu.vector_store %arg8[%c0_42, %c0_43, %c0_44], %137 {strides = array<i32>} : memref<1x4x256xf32, #tpu.memory_space<vmem>>, vector<1x4x32xf32>,
    %c4 = arith.constant 4 : index
    %c0_45 = arith.constant 0 : index
    %138 = vector.load %arg9[%c4, %c0_45] : memref<32x192xf32, #tpu.memory_space<vmem>>, vector<4x192xf32>
    %c0_46 = arith.constant 0 : index
    %c1 = arith.constant 1 : index
    %c0_47 = arith.constant 0 : index
    %c0_48 = arith.constant 0 : index
    %139 = vector.load %arg2[%c0_46, %c1, %c0_47, %c0_48] : memref<1x8x4x16xf32, #tpu.memory_space<vmem>>, vector<1x1x4x16xf32>
    %140 = vector.shape_cast %139 : vector<1x1x4x16xf32> to vector<4x16xf32>
    %c0_49 = arith.constant 0 : index
    %c1_50 = arith.constant 1 : index
    %c0_51 = arith.constant 0 : index
    %c0_52 = arith.constant 0 : index
    %141 = vector.load %arg3[%c0_49, %c1_50, %c0_51, %c0_52] : memref<1x8x4x6xf32, #tpu.memory_space<vmem>>, vector<1x1x4x6xf32>
    %142 = vector.shape_cast %141 : vector<1x1x4x6xf32> to vector<4x6xf32>
    %cst_53 = arith.constant dense<0.000000e+00> : vector<4xf32>
    %143 = vector.multi_reduction <add>, %142, %cst_53 [1] : vector<4x6xf32> to vector<4xf32>
    %144 = vector.shape_cast %143 : vector<4xf32> to vector<4x1xf32>
    %145 = arith.mulf %142, %134 : vector<4x6xf32>
    %cst_54 = arith.constant dense<0.000000e+00> : vector<4xf32>
    %146 = vector.multi_reduction <add>, %145, %cst_54 [1] : vector<4x6xf32> to vector<4xf32>
    %147 = vector.shape_cast %146 : vector<4xf32> to vector<4x1xf32>
    %148 = arith.subf %144, %147 : vector<4x1xf32>
    %149 = vector.shape_cast %142 : vector<4x6xf32> to vector<4x6x1xf32>
    %150 = vector.broadcast %149 : vector<4x6x1xf32> to vector<4x6x16xf32>
    %151 = arith.mulf %124, %150 : vector<4x6x16xf32>
    %cst_55 = arith.constant dense<0.000000e+00> : vector<4x16xf32>
    %152 = vector.multi_reduction <add>, %151, %cst_55 [1] : vector<4x6x16xf32> to vector<4x16xf32>
    %153 = vector.broadcast %149 : vector<4x6x1xf32> to vector<4x6x16xf32>
    %154 = arith.mulf %133, %153 : vector<4x6x16xf32>
    %cst_56 = arith.constant dense<0.000000e+00> : vector<4x16xf32>
    %155 = vector.multi_reduction <add>, %154, %cst_56 [1] : vector<4x6x16xf32> to vector<4x16xf32>
    %156 = vector.broadcast %147 : vector<4x1xf32> to vector<4x16xf32>
    %157 = arith.mulf %156, %152 : vector<4x16xf32>
    %158 = arith.addf %140, %157 : vector<4x16xf32>
    %159 = vector.broadcast %148 : vector<4x1xf32> to vector<4x16xf32>
    %160 = arith.mulf %159, %22 : vector<4x16xf32>
    %161 = arith.addf %158, %160 : vector<4x16xf32>
    %162 = vector.broadcast %147 : vector<4x1xf32> to vector<4x16xf32>
    %163 = arith.mulf %162, %152 : vector<4x16xf32>
    %164 = vector.broadcast %148 : vector<4x1xf32> to vector<4x16xf32>
    %165 = arith.mulf %164, %22 : vector<4x16xf32>
    %166 = arith.addf %163, %165 : vector<4x16xf32>
    %167 = vector.broadcast %147 : vector<4x1xf32> to vector<4x16xf32>
    %168 = arith.mulf %167, %155 : vector<4x16xf32>
    %169 = vector.broadcast %148 : vector<4x1xf32> to vector<4x16xf32>
    %170 = arith.mulf %169, %25 : vector<4x16xf32>
    %171 = arith.addf %168, %170 : vector<4x16xf32>
    %172 = tpu.concatenate %90, %161, %166 in 1 : vector<4x32xf32>, vector<4x16xf32>, vector<4x16xf32> -> vector<4x64xf32>
    %cst_57 = arith.constant dense<0.000000e+00> : vector<4x192xf32>
    %173 = tpu.matmul %172, %11, %cst_57 {dimension_numbers = #tpu.dot_dimension_numbers<[1], [0], [0], [1], [0, 0, 1, 1], [], []>} : vector<4x64xf32>, vector<64x192xf32>, vector<4x192xf32> -> vector<4x192xf32>
    %174 = arith.addf %138, %173 : vector<4x192xf32>
    %175 = vector.extract_strided_slice %174 {offsets = [0, 0], sizes = [4, 32], strides = [1, 1]} : vector<4x192xf32> to vector<4x32xf32>
    %176 = arith.negf %175 : vector<4x32xf32>
    %177 = math.exp %176 : vector<4x32xf32>
    %cst_58 = arith.constant 1.000000e+00 : f32
    %178 = vector.broadcast %cst_58 : f32 to vector<4x32xf32>
    %179 = arith.addf %178, %177 : vector<4x32xf32>
    %180 = arith.divf %178, %179 : vector<4x32xf32>
    %181 = vector.extract_strided_slice %174 {offsets = [0, 32], sizes = [4, 32], strides = [1, 1]} : vector<4x192xf32> to vector<4x32xf32>
    %182 = arith.negf %181 : vector<4x32xf32>
    %183 = math.exp %182 : vector<4x32xf32>
    %cst_59 = arith.constant 1.000000e+00 : f32
    %184 = vector.broadcast %cst_59 : f32 to vector<4x32xf32>
    %185 = arith.addf %184, %183 : vector<4x32xf32>
    %186 = arith.divf %184, %185 : vector<4x32xf32>
    %187 = vector.extract_strided_slice %174 {offsets = [0, 64], sizes = [4, 32], strides = [1, 1]} : vector<4x192xf32> to vector<4x32xf32>
    %188 = math.tanh %187 : vector<4x32xf32>
    %189 = vector.extract_strided_slice %174 {offsets = [0, 96], sizes = [4, 32], strides = [1, 1]} : vector<4x192xf32> to vector<4x32xf32>
    %190 = arith.negf %189 : vector<4x32xf32>
    %191 = math.exp %190 : vector<4x32xf32>
    %cst_60 = arith.constant 1.000000e+00 : f32
    %192 = vector.broadcast %cst_60 : f32 to vector<4x32xf32>
    %193 = arith.addf %192, %191 : vector<4x32xf32>
    %194 = arith.divf %192, %193 : vector<4x32xf32>
    %195 = arith.mulf %186, %88 : vector<4x32xf32>
    %196 = arith.mulf %180, %188 : vector<4x32xf32>
    %197 = arith.addf %195, %196 : vector<4x32xf32>
    %198 = math.tanh %197 : vector<4x32xf32>
    %199 = arith.mulf %194, %198 : vector<4x32xf32>
    %200 = vector.extract_strided_slice %174 {offsets = [0, 128], sizes = [4, 16], strides = [1, 1]} : vector<4x192xf32> to vector<4x16xf32>
    %201 = arith.negf %200 : vector<4x16xf32>
    %202 = math.exp %201 : vector<4x16xf32>
    %cst_61 = arith.constant 1.000000e+00 : f32
    %203 = vector.broadcast %cst_61 : f32 to vector<4x16xf32>
    %204 = arith.addf %203, %202 : vector<4x16xf32>
    %205 = arith.divf %203, %204 : vector<4x16xf32>
    %206 = vector.extract_strided_slice %174 {offsets = [0, 144], sizes = [4, 16], strides = [1, 1]} : vector<4x192xf32> to vector<4x16xf32>
    %207 = arith.negf %206 : vector<4x16xf32>
    %208 = math.exp %207 : vector<4x16xf32>
    %cst_62 = arith.constant 1.000000e+00 : f32
    %209 = vector.broadcast %cst_62 : f32 to vector<4x16xf32>
    %210 = arith.addf %209, %208 : vector<4x16xf32>
    %211 = arith.divf %209, %210 : vector<4x16xf32>
    %212 = vector.extract_strided_slice %174 {offsets = [0, 160], sizes = [4, 16], strides = [1, 1]} : vector<4x192xf32> to vector<4x16xf32>
    %213 = math.tanh %212 : vector<4x16xf32>
    %214 = vector.extract_strided_slice %174 {offsets = [0, 176], sizes = [4, 16], strides = [1, 1]} : vector<4x192xf32> to vector<4x16xf32>
    %215 = arith.negf %214 : vector<4x16xf32>
    %216 = math.exp %215 : vector<4x16xf32>
    %cst_63 = arith.constant 1.000000e+00 : f32
    %217 = vector.broadcast %cst_63 : f32 to vector<4x16xf32>
    %218 = arith.addf %217, %216 : vector<4x16xf32>
    %219 = arith.divf %217, %218 : vector<4x16xf32>
    %220 = arith.mulf %211, %171 : vector<4x16xf32>
    %221 = arith.mulf %205, %213 : vector<4x16xf32>
    %222 = arith.addf %220, %221 : vector<4x16xf32>
    %223 = math.tanh %222 : vector<4x16xf32>
    %224 = arith.mulf %219, %223 : vector<4x16xf32>
    %cst_64 = arith.constant 1.000000e+00 : f32
    %225 = vector.broadcast %cst_64 : f32 to vector<4x6x1xf32>
    %226 = arith.subf %225, %149 : vector<4x6x1xf32>
    %227 = vector.broadcast %226 : vector<4x6x1xf32> to vector<4x6x16xf32>
    %228 = arith.mulf %124, %227 : vector<4x6x16xf32>
    %229 = vector.shape_cast %224 : vector<4x16xf32> to vector<4x1x16xf32>
    %230 = vector.broadcast %149 : vector<4x6x1xf32> to vector<4x6x16xf32>
    %231 = vector.broadcast %229 : vector<4x1x16xf32> to vector<4x6x16xf32>
    %232 = arith.mulf %230, %231 : vector<4x6x16xf32>
    %233 = arith.addf %228, %232 : vector<4x6x16xf32>
    %cst_65 = arith.constant 1.000000e+00 : f32
    %234 = vector.broadcast %cst_65 : f32 to vector<4x6x1xf32>
    %235 = arith.subf %234, %149 : vector<4x6x1xf32>
    %236 = vector.broadcast %235 : vector<4x6x1xf32> to vector<4x6x16xf32>
    %237 = arith.mulf %133, %236 : vector<4x6x16xf32>
    %238 = vector.shape_cast %222 : vector<4x16xf32> to vector<4x1x16xf32>
    %239 = vector.broadcast %149 : vector<4x6x1xf32> to vector<4x6x16xf32>
    %240 = vector.broadcast %238 : vector<4x1x16xf32> to vector<4x6x16xf32>
    %241 = arith.mulf %239, %240 : vector<4x6x16xf32>
    %242 = arith.addf %237, %241 : vector<4x6x16xf32>
    %243 = arith.maximumf %134, %142 : vector<4x6xf32>
    %c0_66 = arith.constant 0 : index
    %c0_67 = arith.constant 0 : index
    %c32 = arith.constant 32 : index
    %244 = vector.load %arg8[%c0_66, %c0_67, %c32] : memref<1x4x256xf32, #tpu.memory_space<vmem>>, vector<1x4x32xf32>
    %245 = vector.shape_cast %244 : vector<1x4x32xf32> to vector<4x32xf32>
    %246 = vector.shape_cast %199 : vector<4x32xf32> to vector<1x4x32xf32>
    tpu.vector_store %arg8[%c0_66, %c0_67, %c32], %246 {strides = array<i32>} : memref<1x4x256xf32, #tpu.memory_space<vmem>>, vector<1x4x32xf32>,
    %c8 = arith.constant 8 : index
    %c0_68 = arith.constant 0 : index
    %247 = vector.load %arg9[%c8, %c0_68] : memref<32x192xf32, #tpu.memory_space<vmem>>, vector<4x192xf32>
    %c0_69 = arith.constant 0 : index
    %c2 = arith.constant 2 : index
    %c0_70 = arith.constant 0 : index
    %c0_71 = arith.constant 0 : index
    %248 = vector.load %arg2[%c0_69, %c2, %c0_70, %c0_71] : memref<1x8x4x16xf32, #tpu.memory_space<vmem>>, vector<1x1x4x16xf32>
    %249 = vector.shape_cast %248 : vector<1x1x4x16xf32> to vector<4x16xf32>
    %c0_72 = arith.constant 0 : index
    %c2_73 = arith.constant 2 : index
    %c0_74 = arith.constant 0 : index
    %c0_75 = arith.constant 0 : index
    %250 = vector.load %arg3[%c0_72, %c2_73, %c0_74, %c0_75] : memref<1x8x4x6xf32, #tpu.memory_space<vmem>>, vector<1x1x4x6xf32>
    %251 = vector.shape_cast %250 : vector<1x1x4x6xf32> to vector<4x6xf32>
    %cst_76 = arith.constant dense<0.000000e+00> : vector<4xf32>
    %252 = vector.multi_reduction <add>, %251, %cst_76 [1] : vector<4x6xf32> to vector<4xf32>
    %253 = vector.shape_cast %252 : vector<4xf32> to vector<4x1xf32>
    %254 = arith.mulf %251, %243 : vector<4x6xf32>
    %cst_77 = arith.constant dense<0.000000e+00> : vector<4xf32>
    %255 = vector.multi_reduction <add>, %254, %cst_77 [1] : vector<4x6xf32> to vector<4xf32>
    %256 = vector.shape_cast %255 : vector<4xf32> to vector<4x1xf32>
    %257 = arith.subf %253, %256 : vector<4x1xf32>
    %258 = vector.shape_cast %251 : vector<4x6xf32> to vector<4x6x1xf32>
    %259 = vector.broadcast %258 : vector<4x6x1xf32> to vector<4x6x16xf32>
    %260 = arith.mulf %233, %259 : vector<4x6x16xf32>
    %cst_78 = arith.constant dense<0.000000e+00> : vector<4x16xf32>
    %261 = vector.multi_reduction <add>, %260, %cst_78 [1] : vector<4x6x16xf32> to vector<4x16xf32>
    %262 = vector.broadcast %258 : vector<4x6x1xf32> to vector<4x6x16xf32>
    %263 = arith.mulf %242, %262 : vector<4x6x16xf32>
    %cst_79 = arith.constant dense<0.000000e+00> : vector<4x16xf32>
    %264 = vector.multi_reduction <add>, %263, %cst_79 [1] : vector<4x6x16xf32> to vector<4x16xf32>
    %265 = vector.broadcast %256 : vector<4x1xf32> to vector<4x16xf32>
    %266 = arith.mulf %265, %261 : vector<4x16xf32>
    %267 = arith.addf %249, %266 : vector<4x16xf32>
    %268 = vector.broadcast %257 : vector<4x1xf32> to vector<4x16xf32>
    %269 = arith.mulf %268, %22 : vector<4x16xf32>
    %270 = arith.addf %267, %269 : vector<4x16xf32>
    %271 = vector.broadcast %256 : vector<4x1xf32> to vector<4x16xf32>
    %272 = arith.mulf %271, %261 : vector<4x16xf32>
    %273 = vector.broadcast %257 : vector<4x1xf32> to vector<4x16xf32>
    %274 = arith.mulf %273, %22 : vector<4x16xf32>
    %275 = arith.addf %272, %274 : vector<4x16xf32>
    %276 = vector.broadcast %256 : vector<4x1xf32> to vector<4x16xf32>
    %277 = arith.mulf %276, %264 : vector<4x16xf32>
    %278 = vector.broadcast %257 : vector<4x1xf32> to vector<4x16xf32>
    %279 = arith.mulf %278, %25 : vector<4x16xf32>
    %280 = arith.addf %277, %279 : vector<4x16xf32>
    %281 = tpu.concatenate %199, %270, %275 in 1 : vector<4x32xf32>, vector<4x16xf32>, vector<4x16xf32> -> vector<4x64xf32>
    %cst_80 = arith.constant dense<0.000000e+00> : vector<4x192xf32>
    %282 = tpu.matmul %281, %11, %cst_80 {dimension_numbers = #tpu.dot_dimension_numbers<[1], [0], [0], [1], [0, 0, 1, 1], [], []>} : vector<4x64xf32>, vector<64x192xf32>, vector<4x192xf32> -> vector<4x192xf32>
    %283 = arith.addf %247, %282 : vector<4x192xf32>
    %284 = vector.extract_strided_slice %283 {offsets = [0, 0], sizes = [4, 32], strides = [1, 1]} : vector<4x192xf32> to vector<4x32xf32>
    %285 = arith.negf %284 : vector<4x32xf32>
    %286 = math.exp %285 : vector<4x32xf32>
    %cst_81 = arith.constant 1.000000e+00 : f32
    %287 = vector.broadcast %cst_81 : f32 to vector<4x32xf32>
    %288 = arith.addf %287, %286 : vector<4x32xf32>
    %289 = arith.divf %287, %288 : vector<4x32xf32>
    %290 = vector.extract_strided_slice %283 {offsets = [0, 32], sizes = [4, 32], strides = [1, 1]} : vector<4x192xf32> to vector<4x32xf32>
    %291 = arith.negf %290 : vector<4x32xf32>
    %292 = math.exp %291 : vector<4x32xf32>
    %cst_82 = arith.constant 1.000000e+00 : f32
    %293 = vector.broadcast %cst_82 : f32 to vector<4x32xf32>
    %294 = arith.addf %293, %292 : vector<4x32xf32>
    %295 = arith.divf %293, %294 : vector<4x32xf32>
    %296 = vector.extract_strided_slice %283 {offsets = [0, 64], sizes = [4, 32], strides = [1, 1]} : vector<4x192xf32> to vector<4x32xf32>
    %297 = math.tanh %296 : vector<4x32xf32>
    %298 = vector.extract_strided_slice %283 {offsets = [0, 96], sizes = [4, 32], strides = [1, 1]} : vector<4x192xf32> to vector<4x32xf32>
    %299 = arith.negf %298 : vector<4x32xf32>
    %300 = math.exp %299 : vector<4x32xf32>
    %cst_83 = arith.constant 1.000000e+00 : f32
    %301 = vector.broadcast %cst_83 : f32 to vector<4x32xf32>
    %302 = arith.addf %301, %300 : vector<4x32xf32>
    %303 = arith.divf %301, %302 : vector<4x32xf32>
    %304 = arith.mulf %295, %197 : vector<4x32xf32>
    %305 = arith.mulf %289, %297 : vector<4x32xf32>
    %306 = arith.addf %304, %305 : vector<4x32xf32>
    %307 = math.tanh %306 : vector<4x32xf32>
    %308 = arith.mulf %303, %307 : vector<4x32xf32>
    %309 = vector.extract_strided_slice %283 {offsets = [0, 128], sizes = [4, 16], strides = [1, 1]} : vector<4x192xf32> to vector<4x16xf32>
    %310 = arith.negf %309 : vector<4x16xf32>
    %311 = math.exp %310 : vector<4x16xf32>
    %cst_84 = arith.constant 1.000000e+00 : f32
    %312 = vector.broadcast %cst_84 : f32 to vector<4x16xf32>
    %313 = arith.addf %312, %311 : vector<4x16xf32>
    %314 = arith.divf %312, %313 : vector<4x16xf32>
    %315 = vector.extract_strided_slice %283 {offsets = [0, 144], sizes = [4, 16], strides = [1, 1]} : vector<4x192xf32> to vector<4x16xf32>
    %316 = arith.negf %315 : vector<4x16xf32>
    %317 = math.exp %316 : vector<4x16xf32>
    %cst_85 = arith.constant 1.000000e+00 : f32
    %318 = vector.broadcast %cst_85 : f32 to vector<4x16xf32>
    %319 = arith.addf %318, %317 : vector<4x16xf32>
    %320 = arith.divf %318, %319 : vector<4x16xf32>
    %321 = vector.extract_strided_slice %283 {offsets = [0, 160], sizes = [4, 16], strides = [1, 1]} : vector<4x192xf32> to vector<4x16xf32>
    %322 = math.tanh %321 : vector<4x16xf32>
    %323 = vector.extract_strided_slice %283 {offsets = [0, 176], sizes = [4, 16], strides = [1, 1]} : vector<4x192xf32> to vector<4x16xf32>
    %324 = arith.negf %323 : vector<4x16xf32>
    %325 = math.exp %324 : vector<4x16xf32>
    %cst_86 = arith.constant 1.000000e+00 : f32
    %326 = vector.broadcast %cst_86 : f32 to vector<4x16xf32>
    %327 = arith.addf %326, %325 : vector<4x16xf32>
    %328 = arith.divf %326, %327 : vector<4x16xf32>
    %329 = arith.mulf %320, %280 : vector<4x16xf32>
    %330 = arith.mulf %314, %322 : vector<4x16xf32>
    %331 = arith.addf %329, %330 : vector<4x16xf32>
    %332 = math.tanh %331 : vector<4x16xf32>
    %333 = arith.mulf %328, %332 : vector<4x16xf32>
    %cst_87 = arith.constant 1.000000e+00 : f32
    %334 = vector.broadcast %cst_87 : f32 to vector<4x6x1xf32>
    %335 = arith.subf %334, %258 : vector<4x6x1xf32>
    %336 = vector.broadcast %335 : vector<4x6x1xf32> to vector<4x6x16xf32>
    %337 = arith.mulf %233, %336 : vector<4x6x16xf32>
    %338 = vector.shape_cast %333 : vector<4x16xf32> to vector<4x1x16xf32>
    %339 = vector.broadcast %258 : vector<4x6x1xf32> to vector<4x6x16xf32>
    %340 = vector.broadcast %338 : vector<4x1x16xf32> to vector<4x6x16xf32>
    %341 = arith.mulf %339, %340 : vector<4x6x16xf32>
    %342 = arith.addf %337, %341 : vector<4x6x16xf32>
    %cst_88 = arith.constant 1.000000e+00 : f32
    %343 = vector.broadcast %cst_88 : f32 to vector<4x6x1xf32>
    %344 = arith.subf %343, %258 : vector<4x6x1xf32>
    %345 = vector.broadcast %344 : vector<4x6x1xf32> to vector<4x6x16xf32>
    %346 = arith.mulf %242, %345 : vector<4x6x16xf32>
    %347 = vector.shape_cast %331 : vector<4x16xf32> to vector<4x1x16xf32>
    %348 = vector.broadcast %258 : vector<4x6x1xf32> to vector<4x6x16xf32>
    %349 = vector.broadcast %347 : vector<4x1x16xf32> to vector<4x6x16xf32>
    %350 = arith.mulf %348, %349 : vector<4x6x16xf32>
    %351 = arith.addf %346, %350 : vector<4x6x16xf32>
    %352 = arith.maximumf %243, %251 : vector<4x6xf32>
    %c0_89 = arith.constant 0 : index
    %c0_90 = arith.constant 0 : index
    %c64 = arith.constant 64 : index
    %353 = vector.load %arg8[%c0_89, %c0_90, %c64] : memref<1x4x256xf32, #tpu.memory_space<vmem>>, vector<1x4x32xf32>
    %354 = vector.shape_cast %353 : vector<1x4x32xf32> to vector<4x32xf32>
    %355 = vector.shape_cast %308 : vector<4x32xf32> to vector<1x4x32xf32>
    tpu.vector_store %arg8[%c0_89, %c0_90, %c64], %355 {strides = array<i32>} : memref<1x4x256xf32, #tpu.memory_space<vmem>>, vector<1x4x32xf32>,
    %c12 = arith.constant 12 : index
    %c0_91 = arith.constant 0 : index
    %356 = vector.load %arg9[%c12, %c0_91] : memref<32x192xf32, #tpu.memory_space<vmem>>, vector<4x192xf32>
    %c0_92 = arith.constant 0 : index
    %c3 = arith.constant 3 : index
    %c0_93 = arith.constant 0 : index
    %c0_94 = arith.constant 0 : index
    %357 = vector.load %arg2[%c0_92, %c3, %c0_93, %c0_94] : memref<1x8x4x16xf32, #tpu.memory_space<vmem>>, vector<1x1x4x16xf32>
    %358 = vector.shape_cast %357 : vector<1x1x4x16xf32> to vector<4x16xf32>
    %c0_95 = arith.constant 0 : index
    %c3_96 = arith.constant 3 : index
    %c0_97 = arith.constant 0 : index
    %c0_98 = arith.constant 0 : index
    %359 = vector.load %arg3[%c0_95, %c3_96, %c0_97, %c0_98] : memref<1x8x4x6xf32, #tpu.memory_space<vmem>>, vector<1x1x4x6xf32>
    %360 = vector.shape_cast %359 : vector<1x1x4x6xf32> to vector<4x6xf32>
    %cst_99 = arith.constant dense<0.000000e+00> : vector<4xf32>
    %361 = vector.multi_reduction <add>, %360, %cst_99 [1] : vector<4x6xf32> to vector<4xf32>
    %362 = vector.shape_cast %361 : vector<4xf32> to vector<4x1xf32>
    %363 = arith.mulf %360, %352 : vector<4x6xf32>
    %cst_100 = arith.constant dense<0.000000e+00> : vector<4xf32>
    %364 = vector.multi_reduction <add>, %363, %cst_100 [1] : vector<4x6xf32> to vector<4xf32>
    %365 = vector.shape_cast %364 : vector<4xf32> to vector<4x1xf32>
    %366 = arith.subf %362, %365 : vector<4x1xf32>
    %367 = vector.shape_cast %360 : vector<4x6xf32> to vector<4x6x1xf32>
    %368 = vector.broadcast %367 : vector<4x6x1xf32> to vector<4x6x16xf32>
    %369 = arith.mulf %342, %368 : vector<4x6x16xf32>
    %cst_101 = arith.constant dense<0.000000e+00> : vector<4x16xf32>
    %370 = vector.multi_reduction <add>, %369, %cst_101 [1] : vector<4x6x16xf32> to vector<4x16xf32>
    %371 = vector.broadcast %367 : vector<4x6x1xf32> to vector<4x6x16xf32>
    %372 = arith.mulf %351, %371 : vector<4x6x16xf32>
    %cst_102 = arith.constant dense<0.000000e+00> : vector<4x16xf32>
    %373 = vector.multi_reduction <add>, %372, %cst_102 [1] : vector<4x6x16xf32> to vector<4x16xf32>
    %374 = vector.broadcast %365 : vector<4x1xf32> to vector<4x16xf32>
    %375 = arith.mulf %374, %370 : vector<4x16xf32>
    %376 = arith.addf %358, %375 : vector<4x16xf32>
    %377 = vector.broadcast %366 : vector<4x1xf32> to vector<4x16xf32>
    %378 = arith.mulf %377, %22 : vector<4x16xf32>
    %379 = arith.addf %376, %378 : vector<4x16xf32>
    %380 = vector.broadcast %365 : vector<4x1xf32> to vector<4x16xf32>
    %381 = arith.mulf %380, %370 : vector<4x16xf32>
    %382 = vector.broadcast %366 : vector<4x1xf32> to vector<4x16xf32>
    %383 = arith.mulf %382, %22 : vector<4x16xf32>
    %384 = arith.addf %381, %383 : vector<4x16xf32>
    %385 = vector.broadcast %365 : vector<4x1xf32> to vector<4x16xf32>
    %386 = arith.mulf %385, %373 : vector<4x16xf32>
    %387 = vector.broadcast %366 : vector<4x1xf32> to vector<4x16xf32>
    %388 = arith.mulf %387, %25 : vector<4x16xf32>
    %389 = arith.addf %386, %388 : vector<4x16xf32>
    %390 = tpu.concatenate %308, %379, %384 in 1 : vector<4x32xf32>, vector<4x16xf32>, vector<4x16xf32> -> vector<4x64xf32>
    %cst_103 = arith.constant dense<0.000000e+00> : vector<4x192xf32>
    %391 = tpu.matmul %390, %11, %cst_103 {dimension_numbers = #tpu.dot_dimension_numbers<[1], [0], [0], [1], [0, 0, 1, 1], [], []>} : vector<4x64xf32>, vector<64x192xf32>, vector<4x192xf32> -> vector<4x192xf32>
    %392 = arith.addf %356, %391 : vector<4x192xf32>
    %393 = vector.extract_strided_slice %392 {offsets = [0, 0], sizes = [4, 32], strides = [1, 1]} : vector<4x192xf32> to vector<4x32xf32>
    %394 = arith.negf %393 : vector<4x32xf32>
    %395 = math.exp %394 : vector<4x32xf32>
    %cst_104 = arith.constant 1.000000e+00 : f32
    %396 = vector.broadcast %cst_104 : f32 to vector<4x32xf32>
    %397 = arith.addf %396, %395 : vector<4x32xf32>
    %398 = arith.divf %396, %397 : vector<4x32xf32>
    %399 = vector.extract_strided_slice %392 {offsets = [0, 32], sizes = [4, 32], strides = [1, 1]} : vector<4x192xf32> to vector<4x32xf32>
    %400 = arith.negf %399 : vector<4x32xf32>
    %401 = math.exp %400 : vector<4x32xf32>
    %cst_105 = arith.constant 1.000000e+00 : f32
    %402 = vector.broadcast %cst_105 : f32 to vector<4x32xf32>
    %403 = arith.addf %402, %401 : vector<4x32xf32>
    %404 = arith.divf %402, %403 : vector<4x32xf32>
    %405 = vector.extract_strided_slice %392 {offsets = [0, 64], sizes = [4, 32], strides = [1, 1]} : vector<4x192xf32> to vector<4x32xf32>
    %406 = math.tanh %405 : vector<4x32xf32>
    %407 = vector.extract_strided_slice %392 {offsets = [0, 96], sizes = [4, 32], strides = [1, 1]} : vector<4x192xf32> to vector<4x32xf32>
    %408 = arith.negf %407 : vector<4x32xf32>
    %409 = math.exp %408 : vector<4x32xf32>
    %cst_106 = arith.constant 1.000000e+00 : f32
    %410 = vector.broadcast %cst_106 : f32 to vector<4x32xf32>
    %411 = arith.addf %410, %409 : vector<4x32xf32>
    %412 = arith.divf %410, %411 : vector<4x32xf32>
    %413 = arith.mulf %404, %306 : vector<4x32xf32>
    %414 = arith.mulf %398, %406 : vector<4x32xf32>
    %415 = arith.addf %413, %414 : vector<4x32xf32>
    %416 = math.tanh %415 : vector<4x32xf32>
    %417 = arith.mulf %412, %416 : vector<4x32xf32>
    %418 = vector.extract_strided_slice %392 {offsets = [0, 128], sizes = [4, 16], strides = [1, 1]} : vector<4x192xf32> to vector<4x16xf32>
    %419 = arith.negf %418 : vector<4x16xf32>
    %420 = math.exp %419 : vector<4x16xf32>
    %cst_107 = arith.constant 1.000000e+00 : f32
    %421 = vector.broadcast %cst_107 : f32 to vector<4x16xf32>
    %422 = arith.addf %421, %420 : vector<4x16xf32>
    %423 = arith.divf %421, %422 : vector<4x16xf32>
    %424 = vector.extract_strided_slice %392 {offsets = [0, 144], sizes = [4, 16], strides = [1, 1]} : vector<4x192xf32> to vector<4x16xf32>
    %425 = arith.negf %424 : vector<4x16xf32>
    %426 = math.exp %425 : vector<4x16xf32>
    %cst_108 = arith.constant 1.000000e+00 : f32
    %427 = vector.broadcast %cst_108 : f32 to vector<4x16xf32>
    %428 = arith.addf %427, %426 : vector<4x16xf32>
    %429 = arith.divf %427, %428 : vector<4x16xf32>
    %430 = vector.extract_strided_slice %392 {offsets = [0, 160], sizes = [4, 16], strides = [1, 1]} : vector<4x192xf32> to vector<4x16xf32>
    %431 = math.tanh %430 : vector<4x16xf32>
    %432 = vector.extract_strided_slice %392 {offsets = [0, 176], sizes = [4, 16], strides = [1, 1]} : vector<4x192xf32> to vector<4x16xf32>
    %433 = arith.negf %432 : vector<4x16xf32>
    %434 = math.exp %433 : vector<4x16xf32>
    %cst_109 = arith.constant 1.000000e+00 : f32
    %435 = vector.broadcast %cst_109 : f32 to vector<4x16xf32>
    %436 = arith.addf %435, %434 : vector<4x16xf32>
    %437 = arith.divf %435, %436 : vector<4x16xf32>
    %438 = arith.mulf %429, %389 : vector<4x16xf32>
    %439 = arith.mulf %423, %431 : vector<4x16xf32>
    %440 = arith.addf %438, %439 : vector<4x16xf32>
    %441 = math.tanh %440 : vector<4x16xf32>
    %442 = arith.mulf %437, %441 : vector<4x16xf32>
    %cst_110 = arith.constant 1.000000e+00 : f32
    %443 = vector.broadcast %cst_110 : f32 to vector<4x6x1xf32>
    %444 = arith.subf %443, %367 : vector<4x6x1xf32>
    %445 = vector.broadcast %444 : vector<4x6x1xf32> to vector<4x6x16xf32>
    %446 = arith.mulf %342, %445 : vector<4x6x16xf32>
    %447 = vector.shape_cast %442 : vector<4x16xf32> to vector<4x1x16xf32>
    %448 = vector.broadcast %367 : vector<4x6x1xf32> to vector<4x6x16xf32>
    %449 = vector.broadcast %447 : vector<4x1x16xf32> to vector<4x6x16xf32>
    %450 = arith.mulf %448, %449 : vector<4x6x16xf32>
    %451 = arith.addf %446, %450 : vector<4x6x16xf32>
    %cst_111 = arith.constant 1.000000e+00 : f32
    %452 = vector.broadcast %cst_111 : f32 to vector<4x6x1xf32>
    %453 = arith.subf %452, %367 : vector<4x6x1xf32>
    %454 = vector.broadcast %453 : vector<4x6x1xf32> to vector<4x6x16xf32>
    %455 = arith.mulf %351, %454 : vector<4x6x16xf32>
    %456 = vector.shape_cast %440 : vector<4x16xf32> to vector<4x1x16xf32>
    %457 = vector.broadcast %367 : vector<4x6x1xf32> to vector<4x6x16xf32>
    %458 = vector.broadcast %456 : vector<4x1x16xf32> to vector<4x6x16xf32>
    %459 = arith.mulf %457, %458 : vector<4x6x16xf32>
    %460 = arith.addf %455, %459 : vector<4x6x16xf32>
    %461 = arith.maximumf %352, %360 : vector<4x6xf32>
    %c0_112 = arith.constant 0 : index
    %c0_113 = arith.constant 0 : index
    %c96 = arith.constant 96 : index
    %462 = vector.load %arg8[%c0_112, %c0_113, %c96] : memref<1x4x256xf32, #tpu.memory_space<vmem>>, vector<1x4x32xf32>
    %463 = vector.shape_cast %462 : vector<1x4x32xf32> to vector<4x32xf32>
    %464 = vector.shape_cast %417 : vector<4x32xf32> to vector<1x4x32xf32>
    tpu.vector_store %arg8[%c0_112, %c0_113, %c96], %464 {strides = array<i32>} : memref<1x4x256xf32, #tpu.memory_space<vmem>>, vector<1x4x32xf32>,
    %c16 = arith.constant 16 : index
    %c0_114 = arith.constant 0 : index
    %465 = vector.load %arg9[%c16, %c0_114] : memref<32x192xf32, #tpu.memory_space<vmem>>, vector<4x192xf32>
    %c0_115 = arith.constant 0 : index
    %c4_116 = arith.constant 4 : index
    %c0_117 = arith.constant 0 : index
    %c0_118 = arith.constant 0 : index
    %466 = vector.load %arg2[%c0_115, %c4_116, %c0_117, %c0_118] : memref<1x8x4x16xf32, #tpu.memory_space<vmem>>, vector<1x1x4x16xf32>
    %467 = vector.shape_cast %466 : vector<1x1x4x16xf32> to vector<4x16xf32>
    %c0_119 = arith.constant 0 : index
    %c4_120 = arith.constant 4 : index
    %c0_121 = arith.constant 0 : index
    %c0_122 = arith.constant 0 : index
    %468 = vector.load %arg3[%c0_119, %c4_120, %c0_121, %c0_122] : memref<1x8x4x6xf32, #tpu.memory_space<vmem>>, vector<1x1x4x6xf32>
    %469 = vector.shape_cast %468 : vector<1x1x4x6xf32> to vector<4x6xf32>
    %cst_123 = arith.constant dense<0.000000e+00> : vector<4xf32>
    %470 = vector.multi_reduction <add>, %469, %cst_123 [1] : vector<4x6xf32> to vector<4xf32>
    %471 = vector.shape_cast %470 : vector<4xf32> to vector<4x1xf32>
    %472 = arith.mulf %469, %461 : vector<4x6xf32>
    %cst_124 = arith.constant dense<0.000000e+00> : vector<4xf32>
    %473 = vector.multi_reduction <add>, %472, %cst_124 [1] : vector<4x6xf32> to vector<4xf32>
    %474 = vector.shape_cast %473 : vector<4xf32> to vector<4x1xf32>
    %475 = arith.subf %471, %474 : vector<4x1xf32>
    %476 = vector.shape_cast %469 : vector<4x6xf32> to vector<4x6x1xf32>
    %477 = vector.broadcast %476 : vector<4x6x1xf32> to vector<4x6x16xf32>
    %478 = arith.mulf %451, %477 : vector<4x6x16xf32>
    %cst_125 = arith.constant dense<0.000000e+00> : vector<4x16xf32>
    %479 = vector.multi_reduction <add>, %478, %cst_125 [1] : vector<4x6x16xf32> to vector<4x16xf32>
    %480 = vector.broadcast %476 : vector<4x6x1xf32> to vector<4x6x16xf32>
    %481 = arith.mulf %460, %480 : vector<4x6x16xf32>
    %cst_126 = arith.constant dense<0.000000e+00> : vector<4x16xf32>
    %482 = vector.multi_reduction <add>, %481, %cst_126 [1] : vector<4x6x16xf32> to vector<4x16xf32>
    %483 = vector.broadcast %474 : vector<4x1xf32> to vector<4x16xf32>
    %484 = arith.mulf %483, %479 : vector<4x16xf32>
    %485 = arith.addf %467, %484 : vector<4x16xf32>
    %486 = vector.broadcast %475 : vector<4x1xf32> to vector<4x16xf32>
    %487 = arith.mulf %486, %22 : vector<4x16xf32>
    %488 = arith.addf %485, %487 : vector<4x16xf32>
    %489 = vector.broadcast %474 : vector<4x1xf32> to vector<4x16xf32>
    %490 = arith.mulf %489, %479 : vector<4x16xf32>
    %491 = vector.broadcast %475 : vector<4x1xf32> to vector<4x16xf32>
    %492 = arith.mulf %491, %22 : vector<4x16xf32>
    %493 = arith.addf %490, %492 : vector<4x16xf32>
    %494 = vector.broadcast %474 : vector<4x1xf32> to vector<4x16xf32>
    %495 = arith.mulf %494, %482 : vector<4x16xf32>
    %496 = vector.broadcast %475 : vector<4x1xf32> to vector<4x16xf32>
    %497 = arith.mulf %496, %25 : vector<4x16xf32>
    %498 = arith.addf %495, %497 : vector<4x16xf32>
    %499 = tpu.concatenate %417, %488, %493 in 1 : vector<4x32xf32>, vector<4x16xf32>, vector<4x16xf32> -> vector<4x64xf32>
    %cst_127 = arith.constant dense<0.000000e+00> : vector<4x192xf32>
    %500 = tpu.matmul %499, %11, %cst_127 {dimension_numbers = #tpu.dot_dimension_numbers<[1], [0], [0], [1], [0, 0, 1, 1], [], []>} : vector<4x64xf32>, vector<64x192xf32>, vector<4x192xf32> -> vector<4x192xf32>
    %501 = arith.addf %465, %500 : vector<4x192xf32>
    %502 = vector.extract_strided_slice %501 {offsets = [0, 0], sizes = [4, 32], strides = [1, 1]} : vector<4x192xf32> to vector<4x32xf32>
    %503 = arith.negf %502 : vector<4x32xf32>
    %504 = math.exp %503 : vector<4x32xf32>
    %cst_128 = arith.constant 1.000000e+00 : f32
    %505 = vector.broadcast %cst_128 : f32 to vector<4x32xf32>
    %506 = arith.addf %505, %504 : vector<4x32xf32>
    %507 = arith.divf %505, %506 : vector<4x32xf32>
    %508 = vector.extract_strided_slice %501 {offsets = [0, 32], sizes = [4, 32], strides = [1, 1]} : vector<4x192xf32> to vector<4x32xf32>
    %509 = arith.negf %508 : vector<4x32xf32>
    %510 = math.exp %509 : vector<4x32xf32>
    %cst_129 = arith.constant 1.000000e+00 : f32
    %511 = vector.broadcast %cst_129 : f32 to vector<4x32xf32>
    %512 = arith.addf %511, %510 : vector<4x32xf32>
    %513 = arith.divf %511, %512 : vector<4x32xf32>
    %514 = vector.extract_strided_slice %501 {offsets = [0, 64], sizes = [4, 32], strides = [1, 1]} : vector<4x192xf32> to vector<4x32xf32>
    %515 = math.tanh %514 : vector<4x32xf32>
    %516 = vector.extract_strided_slice %501 {offsets = [0, 96], sizes = [4, 32], strides = [1, 1]} : vector<4x192xf32> to vector<4x32xf32>
    %517 = arith.negf %516 : vector<4x32xf32>
    %518 = math.exp %517 : vector<4x32xf32>
    %cst_130 = arith.constant 1.000000e+00 : f32
    %519 = vector.broadcast %cst_130 : f32 to vector<4x32xf32>
    %520 = arith.addf %519, %518 : vector<4x32xf32>
    %521 = arith.divf %519, %520 : vector<4x32xf32>
    %522 = arith.mulf %513, %415 : vector<4x32xf32>
    %523 = arith.mulf %507, %515 : vector<4x32xf32>
    %524 = arith.addf %522, %523 : vector<4x32xf32>
    %525 = math.tanh %524 : vector<4x32xf32>
    %526 = arith.mulf %521, %525 : vector<4x32xf32>
    %527 = vector.extract_strided_slice %501 {offsets = [0, 128], sizes = [4, 16], strides = [1, 1]} : vector<4x192xf32> to vector<4x16xf32>
    %528 = arith.negf %527 : vector<4x16xf32>
    %529 = math.exp %528 : vector<4x16xf32>
    %cst_131 = arith.constant 1.000000e+00 : f32
    %530 = vector.broadcast %cst_131 : f32 to vector<4x16xf32>
    %531 = arith.addf %530, %529 : vector<4x16xf32>
    %532 = arith.divf %530, %531 : vector<4x16xf32>
    %533 = vector.extract_strided_slice %501 {offsets = [0, 144], sizes = [4, 16], strides = [1, 1]} : vector<4x192xf32> to vector<4x16xf32>
    %534 = arith.negf %533 : vector<4x16xf32>
    %535 = math.exp %534 : vector<4x16xf32>
    %cst_132 = arith.constant 1.000000e+00 : f32
    %536 = vector.broadcast %cst_132 : f32 to vector<4x16xf32>
    %537 = arith.addf %536, %535 : vector<4x16xf32>
    %538 = arith.divf %536, %537 : vector<4x16xf32>
    %539 = vector.extract_strided_slice %501 {offsets = [0, 160], sizes = [4, 16], strides = [1, 1]} : vector<4x192xf32> to vector<4x16xf32>
    %540 = math.tanh %539 : vector<4x16xf32>
    %541 = vector.extract_strided_slice %501 {offsets = [0, 176], sizes = [4, 16], strides = [1, 1]} : vector<4x192xf32> to vector<4x16xf32>
    %542 = arith.negf %541 : vector<4x16xf32>
    %543 = math.exp %542 : vector<4x16xf32>
    %cst_133 = arith.constant 1.000000e+00 : f32
    %544 = vector.broadcast %cst_133 : f32 to vector<4x16xf32>
    %545 = arith.addf %544, %543 : vector<4x16xf32>
    %546 = arith.divf %544, %545 : vector<4x16xf32>
    %547 = arith.mulf %538, %498 : vector<4x16xf32>
    %548 = arith.mulf %532, %540 : vector<4x16xf32>
    %549 = arith.addf %547, %548 : vector<4x16xf32>
    %550 = math.tanh %549 : vector<4x16xf32>
    %551 = arith.mulf %546, %550 : vector<4x16xf32>
    %cst_134 = arith.constant 1.000000e+00 : f32
    %552 = vector.broadcast %cst_134 : f32 to vector<4x6x1xf32>
    %553 = arith.subf %552, %476 : vector<4x6x1xf32>
    %554 = vector.broadcast %553 : vector<4x6x1xf32> to vector<4x6x16xf32>
    %555 = arith.mulf %451, %554 : vector<4x6x16xf32>
    %556 = vector.shape_cast %551 : vector<4x16xf32> to vector<4x1x16xf32>
    %557 = vector.broadcast %476 : vector<4x6x1xf32> to vector<4x6x16xf32>
    %558 = vector.broadcast %556 : vector<4x1x16xf32> to vector<4x6x16xf32>
    %559 = arith.mulf %557, %558 : vector<4x6x16xf32>
    %560 = arith.addf %555, %559 : vector<4x6x16xf32>
    %cst_135 = arith.constant 1.000000e+00 : f32
    %561 = vector.broadcast %cst_135 : f32 to vector<4x6x1xf32>
    %562 = arith.subf %561, %476 : vector<4x6x1xf32>
    %563 = vector.broadcast %562 : vector<4x6x1xf32> to vector<4x6x16xf32>
    %564 = arith.mulf %460, %563 : vector<4x6x16xf32>
    %565 = vector.shape_cast %549 : vector<4x16xf32> to vector<4x1x16xf32>
    %566 = vector.broadcast %476 : vector<4x6x1xf32> to vector<4x6x16xf32>
    %567 = vector.broadcast %565 : vector<4x1x16xf32> to vector<4x6x16xf32>
    %568 = arith.mulf %566, %567 : vector<4x6x16xf32>
    %569 = arith.addf %564, %568 : vector<4x6x16xf32>
    %570 = arith.maximumf %461, %469 : vector<4x6xf32>
    %c0_136 = arith.constant 0 : index
    %c0_137 = arith.constant 0 : index
    %c128 = arith.constant 128 : index
    %571 = vector.load %arg8[%c0_136, %c0_137, %c128] : memref<1x4x256xf32, #tpu.memory_space<vmem>>, vector<1x4x32xf32>
    %572 = vector.shape_cast %571 : vector<1x4x32xf32> to vector<4x32xf32>
    %573 = vector.shape_cast %526 : vector<4x32xf32> to vector<1x4x32xf32>
    tpu.vector_store %arg8[%c0_136, %c0_137, %c128], %573 {strides = array<i32>} : memref<1x4x256xf32, #tpu.memory_space<vmem>>, vector<1x4x32xf32>,
    %c20 = arith.constant 20 : index
    %c0_138 = arith.constant 0 : index
    %574 = vector.load %arg9[%c20, %c0_138] : memref<32x192xf32, #tpu.memory_space<vmem>>, vector<4x192xf32>
    %c0_139 = arith.constant 0 : index
    %c5 = arith.constant 5 : index
    %c0_140 = arith.constant 0 : index
    %c0_141 = arith.constant 0 : index
    %575 = vector.load %arg2[%c0_139, %c5, %c0_140, %c0_141] : memref<1x8x4x16xf32, #tpu.memory_space<vmem>>, vector<1x1x4x16xf32>
    %576 = vector.shape_cast %575 : vector<1x1x4x16xf32> to vector<4x16xf32>
    %c0_142 = arith.constant 0 : index
    %c5_143 = arith.constant 5 : index
    %c0_144 = arith.constant 0 : index
    %c0_145 = arith.constant 0 : index
    %577 = vector.load %arg3[%c0_142, %c5_143, %c0_144, %c0_145] : memref<1x8x4x6xf32, #tpu.memory_space<vmem>>, vector<1x1x4x6xf32>
    %578 = vector.shape_cast %577 : vector<1x1x4x6xf32> to vector<4x6xf32>
    %cst_146 = arith.constant dense<0.000000e+00> : vector<4xf32>
    %579 = vector.multi_reduction <add>, %578, %cst_146 [1] : vector<4x6xf32> to vector<4xf32>
    %580 = vector.shape_cast %579 : vector<4xf32> to vector<4x1xf32>
    %581 = arith.mulf %578, %570 : vector<4x6xf32>
    %cst_147 = arith.constant dense<0.000000e+00> : vector<4xf32>
    %582 = vector.multi_reduction <add>, %581, %cst_147 [1] : vector<4x6xf32> to vector<4xf32>
    %583 = vector.shape_cast %582 : vector<4xf32> to vector<4x1xf32>
    %584 = arith.subf %580, %583 : vector<4x1xf32>
    %585 = vector.shape_cast %578 : vector<4x6xf32> to vector<4x6x1xf32>
    %586 = vector.broadcast %585 : vector<4x6x1xf32> to vector<4x6x16xf32>
    %587 = arith.mulf %560, %586 : vector<4x6x16xf32>
    %cst_148 = arith.constant dense<0.000000e+00> : vector<4x16xf32>
    %588 = vector.multi_reduction <add>, %587, %cst_148 [1] : vector<4x6x16xf32> to vector<4x16xf32>
    %589 = vector.broadcast %585 : vector<4x6x1xf32> to vector<4x6x16xf32>
    %590 = arith.mulf %569, %589 : vector<4x6x16xf32>
    %cst_149 = arith.constant dense<0.000000e+00> : vector<4x16xf32>
    %591 = vector.multi_reduction <add>, %590, %cst_149 [1] : vector<4x6x16xf32> to vector<4x16xf32>
    %592 = vector.broadcast %583 : vector<4x1xf32> to vector<4x16xf32>
    %593 = arith.mulf %592, %588 : vector<4x16xf32>
    %594 = arith.addf %576, %593 : vector<4x16xf32>
    %595 = vector.broadcast %584 : vector<4x1xf32> to vector<4x16xf32>
    %596 = arith.mulf %595, %22 : vector<4x16xf32>
    %597 = arith.addf %594, %596 : vector<4x16xf32>
    %598 = vector.broadcast %583 : vector<4x1xf32> to vector<4x16xf32>
    %599 = arith.mulf %598, %588 : vector<4x16xf32>
    %600 = vector.broadcast %584 : vector<4x1xf32> to vector<4x16xf32>
    %601 = arith.mulf %600, %22 : vector<4x16xf32>
    %602 = arith.addf %599, %601 : vector<4x16xf32>
    %603 = vector.broadcast %583 : vector<4x1xf32> to vector<4x16xf32>
    %604 = arith.mulf %603, %591 : vector<4x16xf32>
    %605 = vector.broadcast %584 : vector<4x1xf32> to vector<4x16xf32>
    %606 = arith.mulf %605, %25 : vector<4x16xf32>
    %607 = arith.addf %604, %606 : vector<4x16xf32>
    %608 = tpu.concatenate %526, %597, %602 in 1 : vector<4x32xf32>, vector<4x16xf32>, vector<4x16xf32> -> vector<4x64xf32>
    %cst_150 = arith.constant dense<0.000000e+00> : vector<4x192xf32>
    %609 = tpu.matmul %608, %11, %cst_150 {dimension_numbers = #tpu.dot_dimension_numbers<[1], [0], [0], [1], [0, 0, 1, 1], [], []>} : vector<4x64xf32>, vector<64x192xf32>, vector<4x192xf32> -> vector<4x192xf32>
    %610 = arith.addf %574, %609 : vector<4x192xf32>
    %611 = vector.extract_strided_slice %610 {offsets = [0, 0], sizes = [4, 32], strides = [1, 1]} : vector<4x192xf32> to vector<4x32xf32>
    %612 = arith.negf %611 : vector<4x32xf32>
    %613 = math.exp %612 : vector<4x32xf32>
    %cst_151 = arith.constant 1.000000e+00 : f32
    %614 = vector.broadcast %cst_151 : f32 to vector<4x32xf32>
    %615 = arith.addf %614, %613 : vector<4x32xf32>
    %616 = arith.divf %614, %615 : vector<4x32xf32>
    %617 = vector.extract_strided_slice %610 {offsets = [0, 32], sizes = [4, 32], strides = [1, 1]} : vector<4x192xf32> to vector<4x32xf32>
    %618 = arith.negf %617 : vector<4x32xf32>
    %619 = math.exp %618 : vector<4x32xf32>
    %cst_152 = arith.constant 1.000000e+00 : f32
    %620 = vector.broadcast %cst_152 : f32 to vector<4x32xf32>
    %621 = arith.addf %620, %619 : vector<4x32xf32>
    %622 = arith.divf %620, %621 : vector<4x32xf32>
    %623 = vector.extract_strided_slice %610 {offsets = [0, 64], sizes = [4, 32], strides = [1, 1]} : vector<4x192xf32> to vector<4x32xf32>
    %624 = math.tanh %623 : vector<4x32xf32>
    %625 = vector.extract_strided_slice %610 {offsets = [0, 96], sizes = [4, 32], strides = [1, 1]} : vector<4x192xf32> to vector<4x32xf32>
    %626 = arith.negf %625 : vector<4x32xf32>
    %627 = math.exp %626 : vector<4x32xf32>
    %cst_153 = arith.constant 1.000000e+00 : f32
    %628 = vector.broadcast %cst_153 : f32 to vector<4x32xf32>
    %629 = arith.addf %628, %627 : vector<4x32xf32>
    %630 = arith.divf %628, %629 : vector<4x32xf32>
    %631 = arith.mulf %622, %524 : vector<4x32xf32>
    %632 = arith.mulf %616, %624 : vector<4x32xf32>
    %633 = arith.addf %631, %632 : vector<4x32xf32>
    %634 = math.tanh %633 : vector<4x32xf32>
    %635 = arith.mulf %630, %634 : vector<4x32xf32>
    %636 = vector.extract_strided_slice %610 {offsets = [0, 128], sizes = [4, 16], strides = [1, 1]} : vector<4x192xf32> to vector<4x16xf32>
    %637 = arith.negf %636 : vector<4x16xf32>
    %638 = math.exp %637 : vector<4x16xf32>
    %cst_154 = arith.constant 1.000000e+00 : f32
    %639 = vector.broadcast %cst_154 : f32 to vector<4x16xf32>
    %640 = arith.addf %639, %638 : vector<4x16xf32>
    %641 = arith.divf %639, %640 : vector<4x16xf32>
    %642 = vector.extract_strided_slice %610 {offsets = [0, 144], sizes = [4, 16], strides = [1, 1]} : vector<4x192xf32> to vector<4x16xf32>
    %643 = arith.negf %642 : vector<4x16xf32>
    %644 = math.exp %643 : vector<4x16xf32>
    %cst_155 = arith.constant 1.000000e+00 : f32
    %645 = vector.broadcast %cst_155 : f32 to vector<4x16xf32>
    %646 = arith.addf %645, %644 : vector<4x16xf32>
    %647 = arith.divf %645, %646 : vector<4x16xf32>
    %648 = vector.extract_strided_slice %610 {offsets = [0, 160], sizes = [4, 16], strides = [1, 1]} : vector<4x192xf32> to vector<4x16xf32>
    %649 = math.tanh %648 : vector<4x16xf32>
    %650 = vector.extract_strided_slice %610 {offsets = [0, 176], sizes = [4, 16], strides = [1, 1]} : vector<4x192xf32> to vector<4x16xf32>
    %651 = arith.negf %650 : vector<4x16xf32>
    %652 = math.exp %651 : vector<4x16xf32>
    %cst_156 = arith.constant 1.000000e+00 : f32
    %653 = vector.broadcast %cst_156 : f32 to vector<4x16xf32>
    %654 = arith.addf %653, %652 : vector<4x16xf32>
    %655 = arith.divf %653, %654 : vector<4x16xf32>
    %656 = arith.mulf %647, %607 : vector<4x16xf32>
    %657 = arith.mulf %641, %649 : vector<4x16xf32>
    %658 = arith.addf %656, %657 : vector<4x16xf32>
    %659 = math.tanh %658 : vector<4x16xf32>
    %660 = arith.mulf %655, %659 : vector<4x16xf32>
    %cst_157 = arith.constant 1.000000e+00 : f32
    %661 = vector.broadcast %cst_157 : f32 to vector<4x6x1xf32>
    %662 = arith.subf %661, %585 : vector<4x6x1xf32>
    %663 = vector.broadcast %662 : vector<4x6x1xf32> to vector<4x6x16xf32>
    %664 = arith.mulf %560, %663 : vector<4x6x16xf32>
    %665 = vector.shape_cast %660 : vector<4x16xf32> to vector<4x1x16xf32>
    %666 = vector.broadcast %585 : vector<4x6x1xf32> to vector<4x6x16xf32>
    %667 = vector.broadcast %665 : vector<4x1x16xf32> to vector<4x6x16xf32>
    %668 = arith.mulf %666, %667 : vector<4x6x16xf32>
    %669 = arith.addf %664, %668 : vector<4x6x16xf32>
    %cst_158 = arith.constant 1.000000e+00 : f32
    %670 = vector.broadcast %cst_158 : f32 to vector<4x6x1xf32>
    %671 = arith.subf %670, %585 : vector<4x6x1xf32>
    %672 = vector.broadcast %671 : vector<4x6x1xf32> to vector<4x6x16xf32>
    %673 = arith.mulf %569, %672 : vector<4x6x16xf32>
    %674 = vector.shape_cast %658 : vector<4x16xf32> to vector<4x1x16xf32>
    %675 = vector.broadcast %585 : vector<4x6x1xf32> to vector<4x6x16xf32>
    %676 = vector.broadcast %674 : vector<4x1x16xf32> to vector<4x6x16xf32>
    %677 = arith.mulf %675, %676 : vector<4x6x16xf32>
    %678 = arith.addf %673, %677 : vector<4x6x16xf32>
    %679 = arith.maximumf %570, %578 : vector<4x6xf32>
    %c0_159 = arith.constant 0 : index
    %c0_160 = arith.constant 0 : index
    %c160 = arith.constant 160 : index
    %680 = vector.load %arg8[%c0_159, %c0_160, %c160] : memref<1x4x256xf32, #tpu.memory_space<vmem>>, vector<1x4x32xf32>
    %681 = vector.shape_cast %680 : vector<1x4x32xf32> to vector<4x32xf32>
    %682 = vector.shape_cast %635 : vector<4x32xf32> to vector<1x4x32xf32>
    tpu.vector_store %arg8[%c0_159, %c0_160, %c160], %682 {strides = array<i32>} : memref<1x4x256xf32, #tpu.memory_space<vmem>>, vector<1x4x32xf32>,
    %c24 = arith.constant 24 : index
    %c0_161 = arith.constant 0 : index
    %683 = vector.load %arg9[%c24, %c0_161] : memref<32x192xf32, #tpu.memory_space<vmem>>, vector<4x192xf32>
    %c0_162 = arith.constant 0 : index
    %c6 = arith.constant 6 : index
    %c0_163 = arith.constant 0 : index
    %c0_164 = arith.constant 0 : index
    %684 = vector.load %arg2[%c0_162, %c6, %c0_163, %c0_164] : memref<1x8x4x16xf32, #tpu.memory_space<vmem>>, vector<1x1x4x16xf32>
    %685 = vector.shape_cast %684 : vector<1x1x4x16xf32> to vector<4x16xf32>
    %c0_165 = arith.constant 0 : index
    %c6_166 = arith.constant 6 : index
    %c0_167 = arith.constant 0 : index
    %c0_168 = arith.constant 0 : index
    %686 = vector.load %arg3[%c0_165, %c6_166, %c0_167, %c0_168] : memref<1x8x4x6xf32, #tpu.memory_space<vmem>>, vector<1x1x4x6xf32>
    %687 = vector.shape_cast %686 : vector<1x1x4x6xf32> to vector<4x6xf32>
    %cst_169 = arith.constant dense<0.000000e+00> : vector<4xf32>
    %688 = vector.multi_reduction <add>, %687, %cst_169 [1] : vector<4x6xf32> to vector<4xf32>
    %689 = vector.shape_cast %688 : vector<4xf32> to vector<4x1xf32>
    %690 = arith.mulf %687, %679 : vector<4x6xf32>
    %cst_170 = arith.constant dense<0.000000e+00> : vector<4xf32>
    %691 = vector.multi_reduction <add>, %690, %cst_170 [1] : vector<4x6xf32> to vector<4xf32>
    %692 = vector.shape_cast %691 : vector<4xf32> to vector<4x1xf32>
    %693 = arith.subf %689, %692 : vector<4x1xf32>
    %694 = vector.shape_cast %687 : vector<4x6xf32> to vector<4x6x1xf32>
    %695 = vector.broadcast %694 : vector<4x6x1xf32> to vector<4x6x16xf32>
    %696 = arith.mulf %669, %695 : vector<4x6x16xf32>
    %cst_171 = arith.constant dense<0.000000e+00> : vector<4x16xf32>
    %697 = vector.multi_reduction <add>, %696, %cst_171 [1] : vector<4x6x16xf32> to vector<4x16xf32>
    %698 = vector.broadcast %694 : vector<4x6x1xf32> to vector<4x6x16xf32>
    %699 = arith.mulf %678, %698 : vector<4x6x16xf32>
    %cst_172 = arith.constant dense<0.000000e+00> : vector<4x16xf32>
    %700 = vector.multi_reduction <add>, %699, %cst_172 [1] : vector<4x6x16xf32> to vector<4x16xf32>
    %701 = vector.broadcast %692 : vector<4x1xf32> to vector<4x16xf32>
    %702 = arith.mulf %701, %697 : vector<4x16xf32>
    %703 = arith.addf %685, %702 : vector<4x16xf32>
    %704 = vector.broadcast %693 : vector<4x1xf32> to vector<4x16xf32>
    %705 = arith.mulf %704, %22 : vector<4x16xf32>
    %706 = arith.addf %703, %705 : vector<4x16xf32>
    %707 = vector.broadcast %692 : vector<4x1xf32> to vector<4x16xf32>
    %708 = arith.mulf %707, %697 : vector<4x16xf32>
    %709 = vector.broadcast %693 : vector<4x1xf32> to vector<4x16xf32>
    %710 = arith.mulf %709, %22 : vector<4x16xf32>
    %711 = arith.addf %708, %710 : vector<4x16xf32>
    %712 = vector.broadcast %692 : vector<4x1xf32> to vector<4x16xf32>
    %713 = arith.mulf %712, %700 : vector<4x16xf32>
    %714 = vector.broadcast %693 : vector<4x1xf32> to vector<4x16xf32>
    %715 = arith.mulf %714, %25 : vector<4x16xf32>
    %716 = arith.addf %713, %715 : vector<4x16xf32>
    %717 = tpu.concatenate %635, %706, %711 in 1 : vector<4x32xf32>, vector<4x16xf32>, vector<4x16xf32> -> vector<4x64xf32>
    %cst_173 = arith.constant dense<0.000000e+00> : vector<4x192xf32>
    %718 = tpu.matmul %717, %11, %cst_173 {dimension_numbers = #tpu.dot_dimension_numbers<[1], [0], [0], [1], [0, 0, 1, 1], [], []>} : vector<4x64xf32>, vector<64x192xf32>, vector<4x192xf32> -> vector<4x192xf32>
    %719 = arith.addf %683, %718 : vector<4x192xf32>
    %720 = vector.extract_strided_slice %719 {offsets = [0, 0], sizes = [4, 32], strides = [1, 1]} : vector<4x192xf32> to vector<4x32xf32>
    %721 = arith.negf %720 : vector<4x32xf32>
    %722 = math.exp %721 : vector<4x32xf32>
    %cst_174 = arith.constant 1.000000e+00 : f32
    %723 = vector.broadcast %cst_174 : f32 to vector<4x32xf32>
    %724 = arith.addf %723, %722 : vector<4x32xf32>
    %725 = arith.divf %723, %724 : vector<4x32xf32>
    %726 = vector.extract_strided_slice %719 {offsets = [0, 32], sizes = [4, 32], strides = [1, 1]} : vector<4x192xf32> to vector<4x32xf32>
    %727 = arith.negf %726 : vector<4x32xf32>
    %728 = math.exp %727 : vector<4x32xf32>
    %cst_175 = arith.constant 1.000000e+00 : f32
    %729 = vector.broadcast %cst_175 : f32 to vector<4x32xf32>
    %730 = arith.addf %729, %728 : vector<4x32xf32>
    %731 = arith.divf %729, %730 : vector<4x32xf32>
    %732 = vector.extract_strided_slice %719 {offsets = [0, 64], sizes = [4, 32], strides = [1, 1]} : vector<4x192xf32> to vector<4x32xf32>
    %733 = math.tanh %732 : vector<4x32xf32>
    %734 = vector.extract_strided_slice %719 {offsets = [0, 96], sizes = [4, 32], strides = [1, 1]} : vector<4x192xf32> to vector<4x32xf32>
    %735 = arith.negf %734 : vector<4x32xf32>
    %736 = math.exp %735 : vector<4x32xf32>
    %cst_176 = arith.constant 1.000000e+00 : f32
    %737 = vector.broadcast %cst_176 : f32 to vector<4x32xf32>
    %738 = arith.addf %737, %736 : vector<4x32xf32>
    %739 = arith.divf %737, %738 : vector<4x32xf32>
    %740 = arith.mulf %731, %633 : vector<4x32xf32>
    %741 = arith.mulf %725, %733 : vector<4x32xf32>
    %742 = arith.addf %740, %741 : vector<4x32xf32>
    %743 = math.tanh %742 : vector<4x32xf32>
    %744 = arith.mulf %739, %743 : vector<4x32xf32>
    %745 = vector.extract_strided_slice %719 {offsets = [0, 128], sizes = [4, 16], strides = [1, 1]} : vector<4x192xf32> to vector<4x16xf32>
    %746 = arith.negf %745 : vector<4x16xf32>
    %747 = math.exp %746 : vector<4x16xf32>
    %cst_177 = arith.constant 1.000000e+00 : f32
    %748 = vector.broadcast %cst_177 : f32 to vector<4x16xf32>
    %749 = arith.addf %748, %747 : vector<4x16xf32>
    %750 = arith.divf %748, %749 : vector<4x16xf32>
    %751 = vector.extract_strided_slice %719 {offsets = [0, 144], sizes = [4, 16], strides = [1, 1]} : vector<4x192xf32> to vector<4x16xf32>
    %752 = arith.negf %751 : vector<4x16xf32>
    %753 = math.exp %752 : vector<4x16xf32>
    %cst_178 = arith.constant 1.000000e+00 : f32
    %754 = vector.broadcast %cst_178 : f32 to vector<4x16xf32>
    %755 = arith.addf %754, %753 : vector<4x16xf32>
    %756 = arith.divf %754, %755 : vector<4x16xf32>
    %757 = vector.extract_strided_slice %719 {offsets = [0, 160], sizes = [4, 16], strides = [1, 1]} : vector<4x192xf32> to vector<4x16xf32>
    %758 = math.tanh %757 : vector<4x16xf32>
    %759 = vector.extract_strided_slice %719 {offsets = [0, 176], sizes = [4, 16], strides = [1, 1]} : vector<4x192xf32> to vector<4x16xf32>
    %760 = arith.negf %759 : vector<4x16xf32>
    %761 = math.exp %760 : vector<4x16xf32>
    %cst_179 = arith.constant 1.000000e+00 : f32
    %762 = vector.broadcast %cst_179 : f32 to vector<4x16xf32>
    %763 = arith.addf %762, %761 : vector<4x16xf32>
    %764 = arith.divf %762, %763 : vector<4x16xf32>
    %765 = arith.mulf %756, %716 : vector<4x16xf32>
    %766 = arith.mulf %750, %758 : vector<4x16xf32>
    %767 = arith.addf %765, %766 : vector<4x16xf32>
    %768 = math.tanh %767 : vector<4x16xf32>
    %769 = arith.mulf %764, %768 : vector<4x16xf32>
    %cst_180 = arith.constant 1.000000e+00 : f32
    %770 = vector.broadcast %cst_180 : f32 to vector<4x6x1xf32>
    %771 = arith.subf %770, %694 : vector<4x6x1xf32>
    %772 = vector.broadcast %771 : vector<4x6x1xf32> to vector<4x6x16xf32>
    %773 = arith.mulf %669, %772 : vector<4x6x16xf32>
    %774 = vector.shape_cast %769 : vector<4x16xf32> to vector<4x1x16xf32>
    %775 = vector.broadcast %694 : vector<4x6x1xf32> to vector<4x6x16xf32>
    %776 = vector.broadcast %774 : vector<4x1x16xf32> to vector<4x6x16xf32>
    %777 = arith.mulf %775, %776 : vector<4x6x16xf32>
    %778 = arith.addf %773, %777 : vector<4x6x16xf32>
    %779 = arith.maximumf %679, %687 : vector<4x6xf32>
    %c0_181 = arith.constant 0 : index
    %c0_182 = arith.constant 0 : index
    %c192 = arith.constant 192 : index
    %780 = vector.load %arg8[%c0_181, %c0_182, %c192] : memref<1x4x256xf32, #tpu.memory_space<vmem>>, vector<1x4x32xf32>
    %781 = vector.shape_cast %780 : vector<1x4x32xf32> to vector<4x32xf32>
    %782 = vector.shape_cast %744 : vector<4x32xf32> to vector<1x4x32xf32>
    tpu.vector_store %arg8[%c0_181, %c0_182, %c192], %782 {strides = array<i32>} : memref<1x4x256xf32, #tpu.memory_space<vmem>>, vector<1x4x32xf32>,
    %c28 = arith.constant 28 : index
    %c0_183 = arith.constant 0 : index
    %783 = vector.load %arg9[%c28, %c0_183] : memref<32x192xf32, #tpu.memory_space<vmem>>, vector<4x192xf32>
    %c0_184 = arith.constant 0 : index
    %c7 = arith.constant 7 : index
    %c0_185 = arith.constant 0 : index
    %c0_186 = arith.constant 0 : index
    %784 = vector.load %arg2[%c0_184, %c7, %c0_185, %c0_186] : memref<1x8x4x16xf32, #tpu.memory_space<vmem>>, vector<1x1x4x16xf32>
    %785 = vector.shape_cast %784 : vector<1x1x4x16xf32> to vector<4x16xf32>
    %c0_187 = arith.constant 0 : index
    %c7_188 = arith.constant 7 : index
    %c0_189 = arith.constant 0 : index
    %c0_190 = arith.constant 0 : index
    %786 = vector.load %arg3[%c0_187, %c7_188, %c0_189, %c0_190] : memref<1x8x4x6xf32, #tpu.memory_space<vmem>>, vector<1x1x4x6xf32>
    %787 = vector.shape_cast %786 : vector<1x1x4x6xf32> to vector<4x6xf32>
    %cst_191 = arith.constant dense<0.000000e+00> : vector<4xf32>
    %788 = vector.multi_reduction <add>, %787, %cst_191 [1] : vector<4x6xf32> to vector<4xf32>
    %789 = vector.shape_cast %788 : vector<4xf32> to vector<4x1xf32>
    %790 = arith.mulf %787, %779 : vector<4x6xf32>
    %cst_192 = arith.constant dense<0.000000e+00> : vector<4xf32>
    %791 = vector.multi_reduction <add>, %790, %cst_192 [1] : vector<4x6xf32> to vector<4xf32>
    %792 = vector.shape_cast %791 : vector<4xf32> to vector<4x1xf32>
    %793 = arith.subf %789, %792 : vector<4x1xf32>
    %794 = vector.shape_cast %787 : vector<4x6xf32> to vector<4x6x1xf32>
    %795 = vector.broadcast %794 : vector<4x6x1xf32> to vector<4x6x16xf32>
    %796 = arith.mulf %778, %795 : vector<4x6x16xf32>
    %cst_193 = arith.constant dense<0.000000e+00> : vector<4x16xf32>
    %797 = vector.multi_reduction <add>, %796, %cst_193 [1] : vector<4x6x16xf32> to vector<4x16xf32>
    %798 = vector.broadcast %792 : vector<4x1xf32> to vector<4x16xf32>
    %799 = arith.mulf %798, %797 : vector<4x16xf32>
    %800 = arith.addf %785, %799 : vector<4x16xf32>
    %801 = vector.broadcast %793 : vector<4x1xf32> to vector<4x16xf32>
    %802 = arith.mulf %801, %22 : vector<4x16xf32>
    %803 = arith.addf %800, %802 : vector<4x16xf32>
    %804 = vector.broadcast %792 : vector<4x1xf32> to vector<4x16xf32>
    %805 = arith.mulf %804, %797 : vector<4x16xf32>
    %806 = vector.broadcast %793 : vector<4x1xf32> to vector<4x16xf32>
    %807 = arith.mulf %806, %22 : vector<4x16xf32>
    %808 = arith.addf %805, %807 : vector<4x16xf32>
    %809 = tpu.concatenate %744, %803, %808 in 1 : vector<4x32xf32>, vector<4x16xf32>, vector<4x16xf32> -> vector<4x64xf32>
    %cst_194 = arith.constant dense<0.000000e+00> : vector<4x192xf32>
    %810 = tpu.matmul %809, %11, %cst_194 {dimension_numbers = #tpu.dot_dimension_numbers<[1], [0], [0], [1], [0, 0, 1, 1], [], []>} : vector<4x64xf32>, vector<64x192xf32>, vector<4x192xf32> -> vector<4x192xf32>
    %811 = arith.addf %783, %810 : vector<4x192xf32>
    %812 = vector.extract_strided_slice %811 {offsets = [0, 0], sizes = [4, 32], strides = [1, 1]} : vector<4x192xf32> to vector<4x32xf32>
    %813 = arith.negf %812 : vector<4x32xf32>
    %814 = math.exp %813 : vector<4x32xf32>
    %cst_195 = arith.constant 1.000000e+00 : f32
    %815 = vector.broadcast %cst_195 : f32 to vector<4x32xf32>
    %816 = arith.addf %815, %814 : vector<4x32xf32>
    %817 = arith.divf %815, %816 : vector<4x32xf32>
    %818 = vector.extract_strided_slice %811 {offsets = [0, 32], sizes = [4, 32], strides = [1, 1]} : vector<4x192xf32> to vector<4x32xf32>
    %819 = arith.negf %818 : vector<4x32xf32>
    %820 = math.exp %819 : vector<4x32xf32>
    %cst_196 = arith.constant 1.000000e+00 : f32
    %821 = vector.broadcast %cst_196 : f32 to vector<4x32xf32>
    %822 = arith.addf %821, %820 : vector<4x32xf32>
    %823 = arith.divf %821, %822 : vector<4x32xf32>
    %824 = vector.extract_strided_slice %811 {offsets = [0, 64], sizes = [4, 32], strides = [1, 1]} : vector<4x192xf32> to vector<4x32xf32>
    %825 = math.tanh %824 : vector<4x32xf32>
    %826 = vector.extract_strided_slice %811 {offsets = [0, 96], sizes = [4, 32], strides = [1, 1]} : vector<4x192xf32> to vector<4x32xf32>
    %827 = arith.negf %826 : vector<4x32xf32>
    %828 = math.exp %827 : vector<4x32xf32>
    %cst_197 = arith.constant 1.000000e+00 : f32
    %829 = vector.broadcast %cst_197 : f32 to vector<4x32xf32>
    %830 = arith.addf %829, %828 : vector<4x32xf32>
    %831 = arith.divf %829, %830 : vector<4x32xf32>
    %832 = arith.mulf %823, %742 : vector<4x32xf32>
    %833 = arith.mulf %817, %825 : vector<4x32xf32>
    %834 = arith.addf %832, %833 : vector<4x32xf32>
    %835 = math.tanh %834 : vector<4x32xf32>
    %836 = arith.mulf %831, %835 : vector<4x32xf32>
    %c0_198 = arith.constant 0 : index
    %c0_199 = arith.constant 0 : index
    %c224 = arith.constant 224 : index
    %837 = vector.load %arg8[%c0_198, %c0_199, %c224] : memref<1x4x256xf32, #tpu.memory_space<vmem>>, vector<1x4x32xf32>
    %838 = vector.shape_cast %837 : vector<1x4x32xf32> to vector<4x32xf32>
    %839 = vector.shape_cast %836 : vector<4x32xf32> to vector<1x4x32xf32>
    tpu.vector_store %arg8[%c0_198, %c0_199, %c224], %839 {strides = array<i32>} : memref<1x4x256xf32, #tpu.memory_space<vmem>>, vector<1x4x32xf32>,
    return
  }
  func.func @transform_0(%arg0: i32) -> (i32, i32, i32) {
    %c0_i32 = arith.constant 0 : i32
    %c0_i32_0 = arith.constant 0 : i32
    %c0_i32_1 = arith.constant 0 : i32
    return %arg0, %c0_i32, %c0_i32_0 : i32, i32, i32
  }
  func.func @transform_1(%arg0: i32) -> (i32, i32, i32, i32) {
    %c0_i32 = arith.constant 0 : i32
    %c0_i32_0 = arith.constant 0 : i32
    %c0_i32_1 = arith.constant 0 : i32
    %c0_i32_2 = arith.constant 0 : i32
    return %arg0, %c0_i32, %c0_i32_0, %c0_i32_1 : i32, i32, i32, i32
  }
  func.func @transform_2(%arg0: i32) -> (i32, i32, i32, i32) {
    %c0_i32 = arith.constant 0 : i32
    %c0_i32_0 = arith.constant 0 : i32
    %c0_i32_1 = arith.constant 0 : i32
    %c0_i32_2 = arith.constant 0 : i32
    return %arg0, %c0_i32, %c0_i32_0, %c0_i32_1 : i32, i32, i32, i32
  }
  func.func @transform_3(%arg0: i32) -> (i32, i32, i32) {
    %c0_i32 = arith.constant 0 : i32
    %c0_i32_0 = arith.constant 0 : i32
    %c0_i32_1 = arith.constant 0 : i32
    return %arg0, %c0_i32, %c0_i32_0 : i32, i32, i32
  }
  func.func @transform_4(%arg0: i32) -> (i32, i32, i32) {
    %c0_i32 = arith.constant 0 : i32
    %c0_i32_0 = arith.constant 0 : i32
    %c0_i32_1 = arith.constant 0 : i32
    return %arg0, %c0_i32, %c0_i32_0 : i32, i32, i32
  }
  func.func @transform_5(%arg0: i32) -> (i32, i32, i32) {
    %c0_i32 = arith.constant 0 : i32
    %c0_i32_0 = arith.constant 0 : i32
    %c0_i32_1 = arith.constant 0 : i32
    return %arg0, %c0_i32, %c0_i32_0 : i32, i32, i32
  }
  func.func @transform_6(%arg0: i32) -> (i32, i32, i32) {
    %c0_i32 = arith.constant 0 : i32
    %c0_i32_0 = arith.constant 0 : i32
    %c0_i32_1 = arith.constant 0 : i32
    return %arg0, %c0_i32, %c0_i32_0 : i32, i32, i32
  }
  func.func @transform_7(%arg0: i32) -> (i32, i32, i32) {
    %c0_i32 = arith.constant 0 : i32
    %c0_i32_0 = arith.constant 0 : i32
    %c0_i32_1 = arith.constant 0 : i32
    return %arg0, %c0_i32, %c0_i32_0 : i32, i32, i32
  }
}

</mosaic_0001>

<bundles_post_ra>
// kernel: squeeze.2
= control target key start
LH: loop header
LB: loop body
LE: loop exit
PB: predicated region body
PF: predicated region fallthrough
CT: control target
= control target key end

     0   :  { %vm34_vm0 = vcmask 261120   ;;  %s108_s8 = smov 32   ;;  %s109_s9 = smov 64   ;;  %s129_s0 = inlined_call_operand.vmem [shape: bf16[1,4,256], index: 0, kind: input, shape index: {}]   ;;  %s130_s1 = inlined_call_operand.vmem [shape: bf16[4,8,32], index: 1, kind: output, shape index: {}]  }
   0x1   :  { %v89_v0 = vld [vmem:[%s129_s0] sm:$0xf]   ;;  %s107_s0 = smov 96  }
   0x2   :  { %v16_v1 = vunpack.c.l.bf16 %v89_v0 }
   0x4   :  { %19 = vst [vmem:[#allocation1] ss:$8 sps:$4 sm:$0xff] %v16_v1  }
   0xb   :  { %v41_v2 = vld.sshfl [vmem:[#allocation1] sm:$0xff pattern:$0xb3a29180]  }
   0xc   :  { %v33_v3 = vld [vmem:[#allocation1] sm:$0xf]   ;;  %42 = vrot.lane.b32.xlu0 %v41_v2, %s107_s0  ;;  %54 = vrot.lane.b32.xlu1 %v41_v2, %s108_s8  ;;  %v37_v4 = vld [vmem:[#allocation1 + $0x8] sm:$0xf]  }
   0xd   :  { %35 = vst.msk [vmem:[#allocation0] ss:$8 sm:$0xf] %vm34_vm0, %v33_v3   ;;  %40 = vst.msk [vmem:[#allocation0 + $0x4] ss:$8 sm:$0xf] %vm34_vm0, %v37_v4  }
  0x10   :  { %48 = vrot.lane.b32.xlu0 %v41_v2, %s109_s9 }
  0x7e   :  { %v43_v5 = vpop.permute.xlu0 %42   ;;  %v55_v6 = vpop.permute.xlu1 %54  }
  0x7f   :  { %46 = vst.msk [vmem:[#allocation0 + $0x1] ss:$4 sm:$0xff] %vm34_vm0, %v43_v5   ;;  %58 = vst.msk [vmem:[#allocation0 + $0x3] ss:$4 sm:$0xff] %vm34_vm0, %v55_v6  }
  0x82   :  { %v49_v7 = vpop.permute.xlu0 %48  }
  0x83   :  { %52 = vst.msk [vmem:[#allocation0 + $0x2] ss:$4 sm:$0xff] %vm34_vm0, %v49_v7  }
  0x8a   :  { %v63_v8 = vld [vmem:[#allocation0] sm:$0xff]  ;;  %v68_v9 = vld [vmem:[#allocation0 + $0x8] sm:$0xff]  ;;  %v74_v10 = vld [vmem:[#allocation0 + $0x10] sm:$0xff] }
  0x8b   :  { %v96_v11 = vpack.c.bf16 %v68_v9, %v63_v8  ;;  %v81_v12 = vld [vmem:[#allocation0 + $0x18] sm:$0xff] }
  0x8c   :  { %v101_v13 = vpack.c.bf16 %v81_v12, %v74_v10 }
  0x8d   :  { %97 = vst [vmem:[%s130_s1] sm:$0xff] %v96_v11  }
  0x8e   :  { %103 = vst [vmem:[%s130_s1 + $0x8] sm:$0xff] %v101_v13  }

// kernel: bidirectional_forward_pallas.1
= control target key start
LH: loop header
LB: loop body
LE: loop exit
PB: predicated region body
PF: predicated region fallthrough
CT: control target
= control target key end

     0   :  { %s4063_s24 = smov 0   ;;  %s5369_s0 = inlined_call_operand.vmem [shape: f32[2,32,16], index: 0, kind: input, shape index: {}]   ;;  %s5370_s1 = inlined_call_operand.vmem [shape: f32[2,8,4,16], index: 1, kind: input, shape index: {}]   ;;  %s5371_s2 = inlined_call_operand.vmem [shape: f32[2,8,4,6], index: 2, kind: input, shape index: {}]   ;;  %s5372_s3 = inlined_call_operand.vmem [shape: f32[2,16,192], index: 3, kind: input, shape index: {}]   ;;  %s5373_s4 = inlined_call_operand.vmem [shape: f32[2,64,192], index: 4, kind: input, shape index: {}]   ;;  %s5374_s5 = inlined_call_operand.vmem [shape: f32[2,1,192], index: 5, kind: input, shape index: {}]   ;;  %s5375_s6 = inlined_call_operand.vmem [shape: f32[2,1,96], index: 6, kind: input, shape index: {}]   ;;  %s5376_s7 = inlined_call_operand.vmem [shape: f32[2,4,256], index: 7, kind: output, shape index: {}]  }
   0x1 LB: > { %s3667_s25 = sadd.s32 4294967295, %s4012_s24   ;;  %p3671_p0 = scmp.ge.s32.totalorder %s4012_s24, 1  ;;  %s4012_s24 = sphi %s4063_s24, %s17_s24  }
   0x2   : > { %p294_p1 = scmp.lt.s32.totalorder %s4012_s24, 3 }
   0x4   : > { %p295_p2 = pnand %p3671_p0, %p294_p1 }
   0x5   : > { %p353_p3 = scmp.lt.s32.totalorder (!%p295_p2), %s3667_s25, 1  ;;  %v400_v0 = vlaneseq (!%p295_p2)  ;;  %vm548_vm0 = vcmask (!%p295_p2), 44032   ;;  %v5378_v26 = vmov (!%p295_p2), 0.0   ;;  %s4015_s20 = smov (!%p295_p2), 64   ;;  %vm410_vm1 = vcmask (!%p295_p2), 130048  }
   0x6   : > { %298 = sbr.rel (%p295_p2) target bundleno = 7253 (0x1c55), region = 48  ;;  %487 = vmatprep.mubr.f32.mxu0 (!%p295_p2), %v5378_v26  ;;  %721 = vmatprep.mubr.f32.mxu1 (!%p295_p2), %v5378_v26  ;;  %vm589_vm2 = vcmask (!%p295_p2), 1045504   ;;  %vm622_vm3 = vcmask (!%p295_p2), 1041409   ;;  %vm624_vm4 = vcmask (!%p295_p2), 1042434   ;;  %vm626_vm5 = vcmask (!%p295_p2), 1043459   ;;  %s4016_s27 = smov (!%p295_p2), 32  }
   0x7   : > { %v4073_v1 = vshrl.u32 (!%p295_p2), %v400_v0, 7  ;;  %s4017_s28 = smov (!%p295_p2), 48   ;;  %vm650_vm6 = vcmask (!%p295_p2), 261120   ;;  %vm652_vm7 = vcmask (!%p295_p2), 392192   ;;  %vm513_vm8 = vcmask (!%p295_p2), 523264   ;;  %s4018_s11 = smov (!%p295_p2), 16  }
   0x8   : > { %s4019_s12 = smov (!%p295_p2), 96   ;;  %vm949_vm9 = vcmask (!%p295_p2), 521600   ;;  %vm901_vm10 = vcmask (!%p295_p2), 257024   ;;  %vm982_vm11 = vcmask (!%p295_p2), 259200   ;;  %vm1319_vm12 = vcmask (!%p295_p2), 519424  }
   0x9   : > { %v4079_v2 = vsub.s32 (!%p295_p2), 0, %v4073_v1  ;;  %v4088_v3 = vsub.s32 (!%p295_p2), 1, %v4073_v1  ;;  %v4102_v10 = vsub.s32 (!%p295_p2), 3, %v4073_v1  ;;  %v4107_v12 = vsub.s32 (!%p295_p2), 2, %v4073_v1 }
   0xa   : > { %vm1731_vm13 = vcmask (!%p295_p2), 781824   ;;  %vm2148_vm14 = vcmask (!%p295_p2), 1044224  }
   0xd   : > { %s5385_s25 = smov (!%p353_p3, %s3667_s25), 1 }
   0xe   : > { %s4076_s26 = sshll.u32 %s5385_s25, 5  ;;  %s3733_s30 = sshll.u32 %s5385_s25, 7 }
   0xf   : > { %s4085_s29 = scalar_lea.vmem %s5371_s2, %s4076_s26  ;;  %s4116_s10 = scalar_lea.vmem %s5375_s6, %s5385_s25 }
  0x10   : > { %v4091_v4 = vld [vmem:[%s4085_s29] sm:$0xf]  ;;  %s4121_s13 = scalar_lea.vmem %s5373_s4, %s3733_s30  ;;  %s372_s16 = scalar_lea.vmem %s5372_s3, %s4076_s26 }
  0x11   : > { %v549_v5 = vsel %vm548_vm0, %v4091_v4, 0.0  ;;  %v552_v6 = vmul.f32 0.0, %v4091_v4  ;;  %v560_v7 = vrot.slane %v4091_v4, %v4079_v2  ;;  %v567_v9 = vrot.slane %v4091_v4, %v4088_v3  ;;  %v4126_v16 = vld [vmem:[%s4116_s10] ss:$0 sm:$0xff]  ;;  %v522_v18 = vld [vmem:[%s4121_s13 + $0x8] sm:$0xff]  ;;  %v524_v19 = vld [vmem:[%s4121_s13 + $0x18] sm:$0xff]  ;;  %s4151_s19 = scalar_lea.vmem %s5369_s0, %s4076_s26  ;;  %s4216_s23 = scalar_lea.vmem %s5370_s1, %s4076_s26 }
  0x12   : > { %550 = vadd.xlane.f32.xlu0 %v549_v5  ;;  %v581_v11 = vrot.slane %v4091_v4, %v4102_v10  ;;  %v574_v13 = vrot.slane %v4091_v4, %v4107_v12  ;;  %v521_v20 = vld [vmem:[%s4121_s13] sm:$0xff]  ;;  %v4139_v22 = vpack.c.bf16 %v524_v19, %v522_v18  ;;  %v395_v23 = vld [vmem:[%s372_s16 + $0x8] sm:$0xff]  ;;  %v397_v24 = vld [vmem:[%s372_s16 + $0x18] sm:$0xff]  ;;  %s3682_s26 = sshll.u32 %s5385_s25, 1  ;;  %s3734_s14 = sshll.u32 %s5385_s25, 3 }
  0x13   : > { %v553_v8 = vsel %vm548_vm0, %v552_v6, 0.0  ;;  %562 = vbcast.lane.b32.xlu1 %v560_v7, 256  ;;  %v523_v25 = vld [vmem:[%s4121_s13 + $0x10] sm:$0xff]  ;;  %v3735_v27 = vpack.c.bf16 %v397_v24, %v395_v23  ;;  %v394_v29 = vld [vmem:[%s372_s16] sm:$0xff]  ;;  %v526_v31 = vld [vmem:[%s4121_s13 + $0x28] sm:$0xff]  ;;  %s381_s9 = scalar_lea.vmem %s5374_s5, %s3682_s26  ;;  %s4385_s17 = scalar_lea.vmem %s5376_s7, %s3734_s14 }
  0x14   : > { %v4144_v28 = vpack.c.bf16 %v523_v25, %v521_v20  ;;  %v396_v30 = vld [vmem:[%s372_s16 + $0x10] sm:$0xff]  ;;  %3740 = vmatprep.subr.bf16.mxu1 %v4139_v22  ;;  %v528_v33 = vld [vmem:[%s4121_s13 + $0x38] sm:$0xff]  ;;  %v525_v34 = vld [vmem:[%s4121_s13 + $0x20] sm:$0xff]  ;;  %s4022_s25 = smov 112  }
  0x15   : > { %v3737_v32 = vpack.c.bf16 %v396_v30, %v394_v29  ;;  %3736 = vmatprep.subr.bf16.mxu0 %v3735_v27  ;;  %v4159_v35 = vpack.c.bf16 %v528_v33, %v526_v31  ;;  %v527_v36 = vld [vmem:[%s4121_s13 + $0x30] sm:$0xff]  ;;  %v530_v37 = vld [vmem:[%s4121_s13 + $0x48] sm:$0xff]  ;;  %v532_v38 = vld [vmem:[%s4121_s13 + $0x58] sm:$0xff] }
  0x16   : > { %554 = vadd.xlane.f32.xlu0 %v553_v8  ;;  %3742 = vmatpush1.bf16.msra.mxu1 %v4144_v28  ;;  %v390_v39 = vld [vmem:[%s4151_s19] sm:$0xff]  ;;  %v4165_v40 = vpack.c.bf16 %v527_v36, %v525_v34  ;;  %v4167_v41 = vpack.c.bf16 %v532_v38, %v530_v37  ;;  %v531_v43 = vld [vmem:[%s4121_s13 + $0x50] sm:$0xff]  ;;  %v534_v30 = vld [vmem:[%s4121_s13 + $0x68] sm:$0xff] }
  0x17   : > { %569 = vbcast.lane.b32.xlu1 %v567_v9, 256  ;;  %3738 = vmatpush1.bf16.msra.mxu0 %v3737_v32  ;;  %v529_v42 = vld [vmem:[%s4121_s13 + $0x40] sm:$0xff]  ;;  %v536_v31 = vld [vmem:[%s4121_s13 + $0x78] sm:$0xff]  ;;  %v535_v36 = vld [vmem:[%s4121_s13 + $0x70] sm:$0xff] }
  0x18   : > { %3744 = vmatprep.subr.bf16.mxu1 %v4159_v35  ;;  %3756 = vmatprep.subr.bf16.mxu0 %v4139_v22  ;;  %v4175_v44 = vpack.c.bf16 %v531_v43, %v529_v42  ;;  %v4201_v33 = vpack.c.bf16 %v536_v31, %v534_v30  ;;  %v533_v34 = vld [vmem:[%s4121_s13 + $0x60] sm:$0xff]  ;;  %s4021_s13 = smov 80  }
  0x19   : > { %v4205_v37 = vpack.c.bf16 %v535_v36, %v533_v34  ;;  %v546_v42 = vld [vmem:[%s4216_s23] sm:$0xf] }
  0x1a   : > { %3685 = vmatmul.mubr.msk.f32.vlgmr.msra.gmra.mrb[0].mxu0 %vm410_vm1, %v390_v39  ;;  %3746 = vmatpush1.bf16.msra.mxu1 %v4165_v40 }
  0x1b   : > { %583 = vbcast.lane.b32.xlu1 %v581_v11, 256  ;;  %3748 = vmatprep.subr.bf16.mxu1 %v4167_v41 }
  0x1c   : > { %3758 = vmatpush1.bf16.msra.mxu0 %v4144_v28  ;;  %493 = vmatprep.mubr.f32.mxu0 %v5378_v26 }
  0x1d   : > { %3760 = vmatprep.subr.bf16.mxu0 %v4159_v35 }
  0x1e   : > { %3750 = vmatpush1.bf16.msra.mxu1 %v4175_v44 }
  0x1f   : > { %3752 = vmatprep.subr.bf16.mxu1 %v4201_v33 }
  0x20   : > { %3762 = vmatpush1.bf16.msra.mxu0 %v4165_v40 }
  0x21   : > { %3764 = vmatprep.subr.bf16.mxu0 %v4167_v41 }
  0x22   : > { %3754 = vmatpush1.bf16.msra.mxu1 %v4205_v37 }
  0x23   : > { %3772 = vmatprep.subr.bf16.mxu1 %v4139_v22 }
  0x24   : > { %3766 = vmatpush1.bf16.msra.mxu0 %v4175_v44 }
  0x25   : > { %3768 = vmatprep.subr.bf16.mxu0 %v4201_v33 }
  0x28   : > { %3770 = vmatpush1.bf16.msra.mxu0 %v4205_v37 }
  0x29   : > { %3788 = vmatprep.subr.bf16.mxu0 %v4139_v22 }
  0x2c   : > { %576 = vbcast.lane.b32.xlu0 %v574_v13, 256 }
  0x85   : > { %v4185_v45 = vpop.permute.xlu1 %562 }
  0x86   : > { %v585_v47 = vmul.f32 0.0, %v4185_v45 }
  0x88   : > { %v590_v52 = vsel %vm589_vm2, %v585_v47, 0.0 }
  0x89   : > { %v4187_v46 = vpop.permute.xlu1 %569  ;;  %v591_v55 = vrot.slane %v590_v52, 4 }
  0x8a   : > { %v586_v48 = vmul.f32 0.0, %v4187_v46 }
  0x8b   : > { %v592_v60 = vadd.f32 %v591_v55, %v590_v52 }
  0x8c   : > { %v597_v53 = vsel %vm589_vm2, %v586_v48, 0.0 }
  0x8d   : > { %v4194_v51 = vpop.permute.xlu1 %583  ;;  %v598_v56 = vrot.slane %v597_v53, 4  ;;  %v593_v0 = vrot.slane %v592_v60, 2 }
  0x8e   : > { %v588_v54 = vmul.f32 0.0, %v4194_v51 }
  0x8f   : > { %v599_v61 = vadd.f32 %v598_v56, %v597_v53  ;;  %v594_v8 = vadd.f32 %v593_v0, %v592_v60  ;;  %v398_v53 = vld [vmem:[%s381_s9] sm:$0x3] }
  0x90   : > { %v611_v59 = vsel %vm589_vm2, %v588_v54, 0.0  ;;  %v4231_v55 = vrot.slane %v398_v53, %v4079_v2  ;;  %v4234_v56 = vrot.slane %v398_v53, %v4088_v3 }
  0x91   : > { %v612_v62 = vrot.slane %v611_v59, 4  ;;  %v600_v5 = vrot.slane %v599_v61, 2 }
  0x93   : > { %v613_v6 = vadd.f32 %v612_v62, %v611_v59  ;;  %v601_v9 = vadd.f32 %v600_v5, %v599_v61 }
  0x95   : > { %v614_v11 = vrot.slane %v613_v6, 2 }
  0x97   : > { %v615_v18 = vadd.f32 %v614_v11, %v613_v6 }
  0x99   : > { %v616_v24 = vrot.slane %v615_v18, 1 }
  0x9b   : > { %v617_v29 = vadd.f32 %v616_v24, %v615_v18 }
  0x9f   : > { %v551_v14 = vpop.xlane.xlu0 %550 }
  0xa3   : > { %v4123_v15 = vpop.xlane.xlu0 %554 }
  0xa4   : > { %v556_v17 = vsub.f32 %v551_v14, %v4123_v15  ;;  %v595_v14 = vrot.slane %v594_v8, 1 }
  0xa6   : > { %v4137_v21 = vmul.f32 %v4126_v16, %v556_v17  ;;  %v602_v17 = vrot.slane %v601_v9, 1  ;;  %v596_v20 = vadd.f32 %v595_v14, %v594_v8 }
  0xa7   : > { %v4191_v49 = vpop.permute.xlu0 %576 }
  0xa8   : > { %633 = vrot.lane.b32.xlu1 %v4137_v21, %s4015_s20  ;;  %v587_v50 = vmul.f32 0.0, %v4191_v49  ;;  %v603_v23 = vadd.f32 %v602_v17, %v601_v9  ;;  %v4254_v9 = vld [vmem:[%s4085_s29 + $0x4] sm:$0xf] }
  0xa9   : > { %v920_v14 = vrot.slane %v4254_v9, %v4079_v2  ;;  %v934_v17 = vrot.slane %v4254_v9, %v4107_v12  ;;  %v909_v18 = vsel %vm548_vm0, %v4254_v9, 0.0 }
  0xaa   : > { %v604_v57 = vsel %vm589_vm2, %v587_v50, 0.0  ;;  %v623_v27 = vsel %vm622_vm3, %v603_v23, %v596_v20 }
  0xab   : > { %v605_v58 = vrot.slane %v604_v57, 4 }
  0xad   : > { %v606_v63 = vadd.f32 %v605_v58, %v604_v57 }
  0xaf   : > { %v607_v7 = vrot.slane %v606_v63, 2 }
  0xb1   : > { %v608_v13 = vadd.f32 %v607_v7, %v606_v63 }
  0xb3   : > { %v609_v19 = vrot.slane %v608_v13, 1 }
  0xb5   : > { %v610_v25 = vadd.f32 %v609_v19, %v608_v13 }
  0xb7   : > { %v625_v32 = vsel %vm624_vm4, %v610_v25, %v623_v27 }
  0xb8   : > { %v627_v38 = vsel %vm626_vm5, %v617_v29, %v625_v32 }
  0xb9   : > { %v629_v39 = vmul.f32 %v627_v38, %v4123_v15 }
  0xbb   : > { %v630_v43 = vadd.f32 %v629_v39, %v546_v42 }
  0xed   : > { %v489_v52 = vpop.f32.mrb[0].mxu0 }
  0xee   : > { %v491_v15 = vpop.f32.mrb[1].mxu0  ;;  %v490_v57 = vadd.f32 %v489_v52, %v4231_v55 }
  0xf0   : > { %512 = vst [vmem:[#allocation2] sm:$0xff] %v490_v57 }
  0xf7   : > { %v544_v63 = vld [vmem:[#allocation2] sm:$0xf] }
 0x11a   : > { %v634_v47 = vpop.permute.xlu1 %633 }
 0x11b   : > { %v636_v48 = vadd.f32 %v634_v47, %v630_v43  ;;  %v637_v50 = vadd.f32 %v634_v47, %v629_v39 }
 0x11d   : > { %643 = vrot.lane.b32.xlu1 %v636_v48, %s4016_s27 }
 0x121   : > { %647 = vrot.lane.b32.xlu1 %v637_v50, %s4017_s28 }
 0x125   : > { %638 = vrot.lane.b32.xlu1 %v4137_v21, %s4017_s28  ;;  %v492_v21 = vadd.f32 %v491_v15, %v4234_v56 }
 0x127   : > { %514 = vst.msk [vmem:[#allocation2 + $0x8] sm:$0xff] %vm513_vm8, %v492_v21 }
 0x12e   : > { %v545_v0 = vld [vmem:[#allocation2 + $0x8] sm:$0xf] }
 0x18f   : > { %v644_v54 = vpop.permute.xlu1 %643 }
 0x190   : > { %v651_v58 = vsel %vm650_vm6, %v4126_v16, %v644_v54 }
 0x193   : > { %v648_v59 = vpop.permute.xlu1 %647 }
 0x194   : > { %v653_v60 = vsel %vm652_vm7, %v651_v58, %v648_v59  ;;  %v941_v58 = vrot.slane %v4254_v9, %v4102_v10  ;;  %v896_v59 = vmax.f32 %v4091_v4, 0.0 }
 0x195   : > { %3690 = vmatmul.mubr.msk.f32.vlgmr.msra.gmra.mrb[0].mxu1 %vm513_vm8, %v653_v60 }
 0x196   : > { %3774 = vmatpush1.bf16.msra.mxu1 %v4144_v28  ;;  %1544 = vmatprep.mubr.f32.mxu1 %v5378_v26  ;;  %v912_v60 = vmul.f32 %v4254_v9, %v896_v59 }
 0x197   : > { %v639_v61 = vpop.permute.xlu1 %638  ;;  %3776 = vmatprep.subr.bf16.mxu1 %v4159_v35 }
 0x198   : > { %v641_v62 = vadd.f32 %v639_v61, %v629_v39  ;;  %v927_v39 = vrot.slane %v4254_v9, %v4088_v3  ;;  %v913_v61 = vsel %vm548_vm0, %v912_v60, 0.0 }
 0x19a   : > { %762 = vrot.lane.b32.xlu0 %v641_v62, %s4018_s11  ;;  %3778 = vmatpush1.bf16.msra.mxu1 %v4165_v40  ;;  %v4020_v62 = vmov 1966171168  }
 0x19b   : > { %3780 = vmatprep.subr.bf16.mxu1 %v4167_v41 }
 0x19e   : > { %3782 = vmatpush1.bf16.msra.mxu1 %v4175_v44 }
 0x19f   : > { %3784 = vmatprep.subr.bf16.mxu1 %v4201_v33 }
 0x1a2   : > { %3786 = vmatpush1.bf16.msra.mxu1 %v4205_v37 }
 0x1a3   : > { %3804 = vmatprep.subr.bf16.mxu1 %v4139_v22 }
 0x20c   : > { %v763_v29 = vpop.permute.xlu0 %762 }
 0x268   : > { %v723_v5 = vpop.f32.mrb[0].mxu1 }
 0x269   : > { %v728_v6 = vadd.f32 %v723_v5, %v544_v63  ;;  %v725_v7 = vpop.f32.mrb[1].mxu1  ;;  %v792_v63 = vunpack.c.l.s4 %v4020_v62 }
 0x26a   : > { %v729_v8 = vadd.f32 %v725_v7, %v545_v0 }
 0x26b   : > { %3884 = vtanh.f32 %v728_v6  ;;  %v3691_v19 = vmul.f32 -1.442695, %v728_v6  ;;  %v793_v0 = vunpack.c.0.s8 %v792_v63 }
 0x26c   : > { %3886 = vtanh.f32 %v729_v8  ;;  %v3692_v20 = vmul.f32 -1.442695, %v729_v8 }
 0x26d   : > { %3888 = vpow2.f32 %v3691_v19  ;;  %v4288_v5 = vsub.s32 %v793_v0, %v4073_v1 }
 0x26e   : > { %3890 = vpow2.f32 %v3692_v20 }
 0x275   : > { %v3885_v11 = vpop.eup %3884 }
 0x276   : > { %v3887_v13 = vpop.eup %3886  ;;  %739 = vrot.lane.b32.xlu0 %v3885_v11, %s4015_s20 }
 0x277   : > { %767 = vrot.lane.b32.xlu1 %v3887_v13, %s4019_s12  ;;  %v3889_v23 = vpop.eup %3888 }
 0x278   : > { %v3891_v24 = vpop.eup %3890  ;;  %v733_v25 = vadd.f32 1.0, %v3889_v23 }
 0x279   : > { %v757_v27 = vadd.f32 1.0, %v3891_v24 }
 0x27a   : > { %922 = vbcast.lane.b32.xlu0 %v920_v14, 256  ;;  %3892 = vrcp.f32 %v733_v25 }
 0x27b   : > { %3894 = vrcp.f32 %v757_v27  ;;  %v782_v27 = vsub.f32 1.0, %v4185_v45 }
 0x27e   : > { %936 = vbcast.lane.b32.xlu0 %v934_v17, 256  ;;  %v785_v17 = vsub.f32 1.0, %v4194_v51 }
 0x280   : > { %v789_v24 = vmul.f32 0.0, %v785_v17 }
 0x284   : > { %v3893_v30 = vpop.eup %3892 }
 0x285   : > { %v3895_v32 = vpop.eup %3894  ;;  %v737_v48 = vmul.f32 %v3893_v30, %v4126_v16 }
 0x286   : > { %v765_v52 = vmul.f32 %v3895_v32, %v763_v29 }
 0x29d   : > { %910 = vadd.xlane.f32.xlu0 %v909_v18 }
 0x2e8   : > { %v740_v31 = vpop.permute.xlu0 %739 }
 0x2e9   : > { %v742_v34 = vmul.f32 %v3893_v30, %v740_v31  ;;  %v768_v36 = vpop.permute.xlu1 %767 }
 0x2ea   : > { %v770_v38 = vmul.f32 %v3895_v32, %v768_v36 }
 0x2eb   : > { %744 = vrot.lane.b32.xlu0 %v742_v34, %s4016_s27 }
 0x2ec   : > { %772 = vrot.lane.b32.xlu1 %v770_v38, %s4018_s11  ;;  %v4268_v42 = vpop.permute.xlu0 %922  ;;  %v783_v38 = vsub.f32 1.0, %v4187_v46 }
 0x2ee   : > { %v4328_v60 = vmul.f32 0.0, %v783_v38 }
 0x2f0   : > { %929 = vbcast.lane.b32.xlu1 %v927_v39, 256  ;;  %v4270_v43 = vpop.permute.xlu0 %936 }
 0x32a   : > { %v4272_v47 = vpop.xlane.xlu0 %910 }
 0x35d   : > { %v745_v50 = vpop.permute.xlu0 %744 }
 0x35e   : > { %v4275_v15 = vadd.f32 %v745_v50, %v737_v48  ;;  %v773_v53 = vpop.permute.xlu1 %772 }
 0x35f   : > { %v775_v54 = vadd.f32 %v773_v53, %v765_v52  ;;  %v4323_v53 = vmul.f32 0.0, %v782_v27 }
 0x360   : > { %3896 = vtanh.f32 %v4275_v15 }
 0x361   : > { %3898 = vtanh.f32 %v775_v54  ;;  %v4291_v6 = vrot.slane %v775_v54, %v4288_v5 }
 0x362   : > { %v4300_v13 = vpop.permute.xlu1 %929 }
 0x363   : > { %v851_v7 = vcombine.high %v4291_v6, %v4291_v6 }
 0x365   : > { %v4296_v8 = vrot.slane %v851_v7, %v4288_v5 }
 0x367   : > { %v867_v11 = vcombine.high %v4296_v8, %v4296_v8 }
 0x369   : > { %v883_v14 = vrot.slane %v867_v11, %v4079_v2 }
 0x36a   : > { %v3897_v57 = vpop.eup %3896 }
 0x36b   : > { %v3899_v21 = vpop.eup %3898  ;;  %750 = vrot.lane.b32.xlu0 %v3897_v57, %s4015_s20  ;;  %v891_v20 = vmul.f32 %v883_v14, %v4194_v51 }
 0x36c   : > { %778 = vrot.lane.b32.xlu1 %v3899_v21, %s4016_s27 }
 0x36d   : > { %v4311_v36 = vadd.f32 %v891_v20, %v789_v24 }
 0x370   : > { %943 = vbcast.lane.b32.xlu1 %v941_v58, 256 }
 0x394   : > { %914 = vadd.xlane.f32.xlu1 %v913_v61 }
 0x3dd   : > { %v751_v1 = vpop.permute.xlu0 %750 }
 0x3de   : > { %v753_v18 = vmul.f32 %v3893_v30, %v751_v1  ;;  %v779_v19 = vpop.permute.xlu1 %778 }
 0x3df   : > { %v781_v23 = vmul.f32 %v3895_v32, %v779_v19  ;;  %v784_v32 = vsub.f32 1.0, %v4191_v49 }
 0x3e0   : > { %898 = vrot.lane.b32.xlu0 %v753_v18, %s4016_s27 }
 0x3e1   : > { %v797_v25 = vrot.slane %v781_v23, %v4288_v5  ;;  %v4330_v61 = vmul.f32 0.0, %v784_v32 }
 0x3e2   : > { %v4308_v29 = vpop.permute.xlu1 %943 }
 0x3e3   : > { %v798_v31 = vcombine.high %v797_v25, %v797_v25  ;;  %v805_v34 = vrot.slane %v797_v25, %v4288_v5  ;;  %v5377_v30 = vsub.f32 1.0, %v4308_v29 }
 0x3e5   : > { %v812_v39 = vrot.slane %v798_v31, %v4288_v5  ;;  %v813_v48 = vcombine.high %v805_v34, %v805_v34  ;;  %v818_v50 = vrot.slane %v805_v34, %v4079_v2  ;;  %v4321_v52 = vmul.f32 %v5377_v30, %v4311_v36 }
 0x3e7   : > { %v814_v54 = vcombine.high %v812_v39, %v812_v39  ;;  %v822_v57 = vrot.slane %v812_v39, %v4079_v2  ;;  %v826_v21 = vrot.slane %v813_v48, %v4079_v2  ;;  %v835_v58 = vmul.f32 %v818_v50, %v4185_v45 }
 0x3e9   : > { %v830_v62 = vrot.slane %v814_v54, %v4079_v2  ;;  %v836_v63 = vmul.f32 %v822_v57, %v4187_v46  ;;  %v837_v0 = vmul.f32 %v826_v21, %v4191_v49  ;;  %v4336_v7 = vadd.f32 %v835_v58, %v4323_v53 }
 0x3eb   : > { %v838_v11 = vmul.f32 %v830_v62, %v4194_v51  ;;  %v4340_v14 = vadd.f32 %v836_v63, %v4328_v60  ;;  %v4343_v17 = vadd.f32 %v837_v0, %v4330_v61  ;;  %v945_v1 = vmul.f32 %v4268_v42, %v4336_v7 }
 0x3ed   : > { %v946_v18 = vmul.f32 %v4300_v13, %v4340_v14  ;;  %v4349_v19 = vadd.f32 %v838_v11, %v789_v24  ;;  %v947_v20 = vmul.f32 %v4270_v43, %v4343_v17  ;;  %v950_v23 = vsel %vm949_vm9, %v945_v1, 0.0 }
 0x3ee   : > { %v951_v25 = vrot.slane %v950_v23, 4 }
 0x3ef   : > { %v948_v51 = vmul.f32 %v4308_v29, %v4349_v19  ;;  %v957_v27 = vsel %vm949_vm9, %v946_v18, 0.0  ;;  %v964_v34 = vsel %vm949_vm9, %v947_v20, 0.0 }
 0x3f0   : > { %v958_v31 = vrot.slane %v957_v27, 4  ;;  %v952_v38 = vadd.f32 %v951_v25, %v950_v23  ;;  %v965_v32 = vrot.slane %v964_v34, 4 }
 0x3f1   : > { %v971_v39 = vsel %vm949_vm9, %v948_v51, 0.0 }
 0x3f2   : > { %v959_v24 = vadd.f32 %v958_v31, %v957_v27  ;;  %v972_v48 = vrot.slane %v971_v39, 4  ;;  %v953_v50 = vrot.slane %v952_v38, 2  ;;  %v966_v54 = vadd.f32 %v965_v32, %v964_v34 }
 0x3f4   : > { %v960_v57 = vrot.slane %v959_v24, 2  ;;  %v973_v21 = vadd.f32 %v972_v48, %v971_v39  ;;  %v954_v58 = vadd.f32 %v953_v50, %v952_v38  ;;  %v967_v62 = vrot.slane %v966_v54, 2  ;;  %v391_v39 = vld [vmem:[%s4151_s19 + $0x8] sm:$0xff]  ;;  %v392_v48 = vld [vmem:[%s4151_s19 + $0x10] sm:$0xff] }
 0x3f5   : > { %3686 = vmatmul.mubr.msk.f32.gmra.mrb[2].mxu0 %vm410_vm1, %v391_v39 }
 0x3f6   : > { %v961_v63 = vadd.f32 %v960_v57, %v959_v24  ;;  %v974_v0 = vrot.slane %v973_v21, 2  ;;  %v955_v11 = vrot.slane %v954_v58, 1  ;;  %v968_v1 = vadd.f32 %v967_v62, %v966_v54  ;;  %499 = vmatprep.mubr.f32.mxu0 %v5378_v26  ;;  %v393_v54 = vld [vmem:[%s4151_s19 + $0x18] sm:$0xff] }
 0x3f8   : > { %v962_v18 = vrot.slane %v961_v63, 1  ;;  %v975_v30 = vadd.f32 %v974_v0, %v973_v21  ;;  %v969_v20 = vrot.slane %v968_v1, 1  ;;  %v956_v23 = vadd.f32 %v955_v11, %v954_v58 }
 0x3f9   : > { %3687 = vmatmul.mubr.msk.f32.gmra.mrb[4].mxu0 %vm410_vm1, %v392_v48  ;;  %v875_v21 = vrot.slane %v4296_v8, %v4079_v2 }
 0x3fa   : > { %v963_v25 = vadd.f32 %v962_v18, %v961_v63  ;;  %v976_v51 = vrot.slane %v975_v30, 1  ;;  %v970_v27 = vadd.f32 %v969_v20, %v968_v1  ;;  %505 = vmatprep.mubr.f32.mxu0 %v5378_v26 }
 0x3fb   : > { %v889_v63 = vmul.f32 %v875_v21, %v4187_v46 }
 0x3fc   : > { %v977_v31 = vadd.f32 %v976_v51, %v975_v30  ;;  %v1015_v34 = vsel %vm622_vm3, %v963_v25, %v956_v23 }
 0x3fd   : > { %v1016_v38 = vsel %vm624_vm4, %v970_v27, %v1015_v34  ;;  %3688 = vmatmul.mubr.msk.f32.gmra.mrb[6].mxu0 %vm410_vm1, %v393_v54  ;;  %v4402_v1 = vadd.f32 %v889_v63, %v4328_v60 }
 0x3fe   : > { %v1017_v32 = vsel %vm626_vm5, %v977_v31, %v1016_v38  ;;  %1122 = vmatprep.mubr.f32.mxu0 %v5378_v26 }
 0x3ff   : > { %1018 = vrot.lane.b32.xlu1 %v1017_v32, %s4021_s13  ;;  %v979_v8 = vmul.f32 %v4300_v13, %v4402_v1 }
 0x401   : > { %v990_v46 = vsel %vm982_vm11, %v979_v8, 0.0 }
 0x402   : > { %v991_v60 = vrot.slane %v990_v46, 4 }
 0x404   : > { %v992_v27 = vadd.f32 %v991_v60, %v990_v46 }
 0x406   : > { %v993_v32 = vrot.slane %v992_v27, 2 }
 0x408   : > { %v994_v54 = vadd.f32 %v993_v32, %v992_v27 }
 0x421   : > { %v4365_v24 = vpop.xlane.xlu1 %914 }
 0x422   : > { %v916_v30 = vsub.f32 %v4272_v47, %v4365_v24  ;;  %v858_v47 = vrot.slane %v4291_v6, %v4288_v5 }
 0x424   : > { %v4372_v50 = vmul.f32 %v4126_v16, %v916_v30  ;;  %v866_v57 = vcombine.high %v858_v47, %v858_v47  ;;  %v871_v58 = vrot.slane %v858_v47, %v4079_v2 }
 0x426   : > { %1025 = vrot.lane.b32.xlu1 %v4372_v50, %s4015_s20  ;;  %v879_v62 = vrot.slane %v866_v57, %v4079_v2  ;;  %v888_v0 = vmul.f32 %v871_v58, %v4185_v45  ;;  %v995_v58 = vrot.slane %v994_v54, 1 }
 0x428   : > { %v890_v11 = vmul.f32 %v879_v62, %v4191_v49  ;;  %v4405_v18 = vadd.f32 %v888_v0, %v4323_v53  ;;  %v981_v49 = vmul.f32 %v4308_v29, %v4311_v36  ;;  %v3693_v0 = vld [vmem:[%s4216_s23 + $0x4] sm:$0xf] }
 0x42a   : > { %v4408_v6 = vadd.f32 %v890_v11, %v4330_v61  ;;  %v978_v20 = vmul.f32 %v4268_v42, %v4405_v18  ;;  %v1004_v23 = vsel %vm982_vm11, %v981_v49, 0.0 }
 0x42b   : > { %v1005_v31 = vrot.slane %v1004_v23, 4 }
 0x42c   : > { %v980_v45 = vmul.f32 %v4270_v43, %v4408_v6  ;;  %v983_v53 = vsel %vm982_vm11, %v978_v20, 0.0  ;;  %v996_v20 = vadd.f32 %v995_v58, %v994_v54 }
 0x42d   : > { %v984_v25 = vrot.slane %v983_v53, 4  ;;  %v1006_v39 = vadd.f32 %v1005_v31, %v1004_v23 }
 0x42e   : > { %v997_v61 = vsel %vm982_vm11, %v980_v45, 0.0 }
 0x42f   : > { %v998_v51 = vrot.slane %v997_v61, 4  ;;  %v985_v34 = vadd.f32 %v984_v25, %v983_v53  ;;  %v1007_v36 = vrot.slane %v1006_v39, 2 }
 0x431   : > { %v999_v38 = vadd.f32 %v998_v51, %v997_v61  ;;  %v986_v48 = vrot.slane %v985_v34, 2  ;;  %v1008_v62 = vadd.f32 %v1007_v36, %v1006_v39 }
 0x433   : > { %v1000_v30 = vrot.slane %v999_v38, 2  ;;  %v987_v57 = vadd.f32 %v986_v48, %v985_v34  ;;  %v1009_v45 = vrot.slane %v1008_v62, 1 }
 0x435   : > { %v1001_v21 = vadd.f32 %v1000_v30, %v999_v38  ;;  %v988_v11 = vrot.slane %v987_v57, 1  ;;  %v1010_v25 = vadd.f32 %v1009_v45, %v1008_v62 }
 0x437   : > { %v1002_v8 = vrot.slane %v1001_v21, 1  ;;  %v989_v53 = vadd.f32 %v988_v11, %v987_v57 }
 0x439   : > { %v1003_v23 = vadd.f32 %v1002_v8, %v1001_v21  ;;  %v1034_v51 = vsel %vm622_vm3, %v996_v20, %v989_v53 }
 0x43b   : > { %v1035_v27 = vsel %vm624_vm4, %v1003_v23, %v1034_v51  ;;  %v4457_v23 = vld [vmem:[%s4085_s29 + $0x8] sm:$0xf] }
 0x43c   : > { %v1036_v31 = vsel %vm626_vm5, %v1010_v25, %v1035_v27  ;;  %v1338_v27 = vrot.slane %v4457_v23, %v4079_v2 }
 0x452   : > { %v4387_v16 = vpop.permute.xlu0 %898 }
 0x453   : > { %902 = vst.msk [vmem:[%s4385_s17] sm:$0xf] %vm901_vm10, %v4387_v16 }
 0x471   : > { %v1019_v47 = vpop.permute.xlu1 %1018 }
 0x472   : > { %v1021_v63 = vmul.f32 %v1019_v47, %v4365_v24 }
 0x474   : > { %v1022_v46 = vadd.f32 %v3693_v0, %v1021_v63 }
 0x498   : > { %v1026_v49 = vpop.permute.xlu1 %1025 }
 0x499   : > { %v1028_v60 = vadd.f32 %v1026_v49, %v1022_v46  ;;  %v1029_v61 = vadd.f32 %v1026_v49, %v1021_v63  ;;  %v903_v46 = vld [vmem:[#allocation2] sm:$0xf0] }
 0x49b   : > { %1046 = vrot.lane.b32.xlu1 %v1028_v60, %s4016_s27  ;;  %1050 = vrot.lane.b32.xlu0 %v1029_v61, %s4017_s28  ;;  %v904_v60 = vld [vmem:[#allocation2 + $0x8] sm:$0xf0] }
 0x49f   : > { %1037 = vrot.lane.b32.xlu1 %v1036_v31, %s4022_s25  ;;  %1041 = vrot.lane.b32.xlu0 %v4372_v50, %s4017_s28  ;;  %v1352_v31 = vrot.slane %v4457_v23, %v4107_v12 }
 0x4c8   : > { %v495_v34 = vpop.f32.mrb[2].mxu0 }
 0x4c9   : > { %v496_v38 = vadd.f32 %v495_v34, %v4231_v55  ;;  %v497_v32 = vpop.f32.mrb[3].mxu0  ;;  %v1327_v34 = vsel %vm548_vm0, %v4457_v23, 0.0 }
 0x4ca   : > { %v498_v39 = vadd.f32 %v497_v32, %v4234_v56 }
 0x4cb   : > { %515 = vst [vmem:[#allocation2 + $0x10] sm:$0xff] %v496_v38 }
 0x4cc   : > { %v501_v48 = vpop.f32.mrb[4].mxu0  ;;  %516 = vst.msk [vmem:[#allocation2 + $0x18] sm:$0xff] %vm513_vm8, %v498_v39 }
 0x4cd   : > { %v502_v36 = vadd.f32 %v501_v48, %v4231_v55  ;;  %v503_v57 = vpop.f32.mrb[5].mxu0 }
 0x4ce   : > { %v504_v21 = vadd.f32 %v503_v57, %v4234_v56 }
 0x4cf   : > { %517 = vst [vmem:[#allocation2 + $0x20] sm:$0xff] %v502_v36 }
 0x4d0   : > { %v507_v58 = vpop.f32.mrb[6].mxu0  ;;  %518 = vst.msk [vmem:[#allocation2 + $0x28] sm:$0xff] %vm513_vm8, %v504_v21 }
 0x4d1   : > { %v508_v62 = vadd.f32 %v507_v58, %v4231_v55  ;;  %v509_v63 = vpop.f32.mrb[7].mxu0 }
 0x4d2   : > { %v510_v11 = vadd.f32 %v509_v63, %v4234_v56  ;;  %v1345_v63 = vrot.slane %v4457_v23, %v4088_v3 }
 0x4d3   : > { %519 = vst [vmem:[#allocation2 + $0x30] sm:$0xff] %v508_v62 }
 0x4d4   : > { %520 = vst.msk [vmem:[#allocation2 + $0x38] sm:$0xff] %vm513_vm8, %v510_v11 }
 0x50d   : > { %v1047_v30 = vpop.permute.xlu1 %1046  ;;  %v1051_v54 = vpop.permute.xlu0 %1050 }
 0x50e   : > { %v1053_v47 = vsel %vm650_vm6, %v4387_v16, %v1047_v30 }
 0x50f   : > { %v1054_v50 = vsel %vm652_vm7, %v1053_v47, %v1051_v54 }
 0x510   : > { %3695 = vmatmul.mubr.msk.f32.vlgmr.msra.gmra.mrb[8].mxu0 %vm513_vm8, %v1054_v50 }
 0x511   : > { %v1038_v0 = vpop.permute.xlu1 %1037  ;;  %3790 = vmatpush1.bf16.msra.mxu0 %v4144_v28  ;;  %1953 = vmatprep.mubr.f32.mxu0 %v5378_v26  ;;  %v1042_v8 = vpop.permute.xlu0 %1041 }
 0x512   : > { %v1040_v16 = vmul.f32 %v1038_v0, %v4365_v24  ;;  %3792 = vmatprep.subr.bf16.mxu0 %v4159_v35 }
 0x514   : > { %v1044_v20 = vadd.f32 %v1042_v8, %v1040_v16 }
 0x515   : > { %3794 = vmatpush1.bf16.msra.mxu0 %v4165_v40 }
 0x516   : > { %v1172_v55 = vrot.slane %v1044_v20, 4  ;;  %3796 = vmatprep.subr.bf16.mxu0 %v4167_v41 }
 0x518   : > { %1173 = vrot.lane.b32.xlu0 %v1172_v55, %s4018_s11  ;;  %v1193_v55 = vsub.f32 1.0, %v4268_v42 }
 0x519   : > { %3798 = vmatpush1.bf16.msra.mxu0 %v4175_v44 }
 0x51a   : > { %3800 = vmatprep.subr.bf16.mxu0 %v4201_v33 }
 0x51d   : > { %3802 = vmatpush1.bf16.msra.mxu0 %v4205_v37 }
 0x51e   : > { %3820 = vmatprep.subr.bf16.mxu0 %v4139_v22 }
 0x58a   : > { %v1174_v36 = vpop.permute.xlu0 %1173 }
 0x5e3   : > { %v1124_v56 = vpop.f32.mrb[8].mxu0 }
 0x5e4   : > { %v1131_v24 = vrot.slane %v1124_v56, 4  ;;  %v1126_v45 = vpop.f32.mrb[9].mxu0 }
 0x5e5   : > { %v1132_v49 = vrot.slane %v1126_v45, 4  ;;  %v1195_v45 = vsub.f32 1.0, %v4270_v43 }
 0x5e6   : > { %v1135_v53 = vadd.f32 %v1131_v24, %v903_v46  ;;  %v1194_v46 = vsub.f32 1.0, %v4300_v13 }
 0x5e7   : > { %v1136_v61 = vadd.f32 %v1132_v49, %v904_v60 }
 0x5e8   : > { %3900 = vtanh.f32 %v1135_v53  ;;  %v3696_v38 = vmul.f32 -1.442695, %v1135_v53 }
 0x5e9   : > { %3902 = vtanh.f32 %v1136_v61  ;;  %v3697_v32 = vmul.f32 -1.442695, %v1136_v61  ;;  %v1255_v61 = vmul.f32 %v1193_v55, %v4405_v18 }
 0x5ea   : > { %3904 = vpow2.f32 %v3696_v38  ;;  %v1257_v38 = vmul.f32 %v1195_v45, %v4408_v6 }
 0x5eb   : > { %3906 = vpow2.f32 %v3697_v32  ;;  %v1256_v32 = vmul.f32 %v1194_v46, %v4402_v1 }
 0x5f2   : > { %v3901_v25 = vpop.eup %3900 }
 0x5f3   : > { %v3903_v51 = vpop.eup %3902  ;;  %1149 = vrot.lane.b32.xlu0 %v3901_v25, %s4015_s20 }
 0x5f4   : > { %1178 = vrot.lane.b32.xlu1 %v3903_v51, %s4019_s12  ;;  %v3905_v39 = vpop.eup %3904 }
 0x5f5   : > { %v3907_v48 = vpop.eup %3906  ;;  %v1140_v30 = vadd.f32 1.0, %v3905_v39 }
 0x5f6   : > { %v1167_v54 = vadd.f32 1.0, %v3907_v48 }
 0x5f7   : > { %1340 = vbcast.lane.b32.xlu0 %v1338_v27, 256  ;;  %3908 = vrcp.f32 %v1140_v30 }
 0x5f8   : > { %3910 = vrcp.f32 %v1167_v54 }
 0x5fb   : > { %1354 = vbcast.lane.b32.xlu0 %v1352_v31, 256 }
 0x601   : > { %v4467_v47 = vpop.eup %3908 }
 0x602   : > { %v4469_v50 = vpop.eup %3910 }
 0x603   : > { %v1176_v0 = vmul.f32 %v4469_v50, %v1174_v36  ;;  %v1359_v36 = vrot.slane %v4457_v23, %v4102_v10 }
 0x61a   : > { %1328 = vadd.xlane.f32.xlu0 %v1327_v34 }
 0x665   : > { %v1150_v57 = vpop.permute.xlu0 %1149 }
 0x666   : > { %v1152_v21 = vmul.f32 %v4467_v47, %v1150_v57  ;;  %v1179_v58 = vpop.permute.xlu1 %1178 }
 0x667   : > { %v1181_v62 = vmul.f32 %v4469_v50, %v1179_v58 }
 0x668   : > { %1154 = vrot.lane.b32.xlu0 %v1152_v21, %s4016_s27 }
 0x669   : > { %1183 = vrot.lane.b32.xlu1 %v1181_v62, %s4018_s11  ;;  %v4488_v25 = vpop.permute.xlu0 %1340 }
 0x66d   : > { %1347 = vbcast.lane.b32.xlu1 %v1345_v63, 256  ;;  %v4514_v58 = vpop.permute.xlu0 %1354 }
 0x6db   : > { %v1184_v11 = vpop.permute.xlu1 %1183 }
 0x6dc   : > { %v1186_v16 = vadd.f32 %v1184_v11, %v1176_v0 }
 0x6de   : > { %3912 = vtanh.f32 %v1186_v16  ;;  %v1260_v8 = vcombine.high %v1186_v16, %v1186_v16 }
 0x6df   : > { %v4516_v62 = vpop.permute.xlu1 %1347 }
 0x6e0   : > { %v1267_v20 = vrot.slane %v1260_v8, %v4288_v5 }
 0x6e2   : > { %v1268_v56 = vcombine.high %v1267_v20, %v1267_v20  ;;  %v1275_v24 = vrot.slane %v1267_v20, %v4288_v5 }
 0x6e4   : > { %v1282_v49 = vrot.slane %v1268_v56, %v4288_v5  ;;  %v1283_v53 = vcombine.high %v1275_v24, %v1275_v24  ;;  %v1288_v60 = vrot.slane %v1275_v24, %v4079_v2 }
 0x6e6   : > { %v1284_v51 = vcombine.high %v1282_v49, %v1282_v49  ;;  %v1292_v27 = vrot.slane %v1282_v49, %v4079_v2  ;;  %v1296_v31 = vrot.slane %v1283_v53, %v4079_v2  ;;  %v1305_v34 = vmul.f32 %v1288_v60, %v4268_v42 }
 0x6e8   : > { %v3913_v39 = vpop.eup %3912  ;;  %v1300_v18 = vrot.slane %v1284_v51, %v4079_v2  ;;  %v1306_v48 = vmul.f32 %v1292_v27, %v4300_v13  ;;  %v1307_v30 = vmul.f32 %v1296_v31, %v4270_v43  ;;  %v4502_v54 = vadd.f32 %v1305_v34, %v1255_v61 }
 0x6e9   : > { %1189 = vrot.lane.b32.xlu1 %v3913_v39, %s4016_s27 }
 0x6ea   : > { %v4507_v57 = vadd.f32 %v1307_v30, %v1257_v38  ;;  %v1395_v6 = vmul.f32 %v4488_v25, %v4502_v54  ;;  %v4511_v1 = vadd.f32 %v1306_v48, %v1256_v32  ;;  %v1308_v21 = vmul.f32 %v1300_v18, %v4308_v29 }
 0x6ec   : > { %v1396_v63 = vmul.f32 %v4516_v62, %v4511_v1  ;;  %v1312_v0 = vadd.f32 %v1308_v21, %v4321_v52  ;;  %v1397_v11 = vmul.f32 %v4514_v58, %v4507_v57  ;;  %v1399_v16 = vsel %vm982_vm11, %v1395_v6, 0.0 }
 0x6ed   : > { %1361 = vbcast.lane.b32.xlu1 %v1359_v36, 256  ;;  %v1400_v20 = vrot.slane %v1399_v16, 4 }
 0x6ee   : > { %v1406_v8 = vsel %vm982_vm11, %v1396_v63, 0.0  ;;  %v1413_v56 = vsel %vm982_vm11, %v1397_v11, 0.0  ;;  %v4531_v63 = vmax.f32 %v896_v59, %v4254_v9 }
 0x6ef   : > { %v1407_v24 = vrot.slane %v1406_v8, 4  ;;  %v1414_v49 = vrot.slane %v1413_v56, 4  ;;  %v1401_v53 = vadd.f32 %v1400_v20, %v1399_v16 }
 0x6f0   : > { %v1330_v11 = vmul.f32 %v4457_v23, %v4531_v63 }
 0x6f1   : > { %v1408_v60 = vadd.f32 %v1407_v24, %v1406_v8  ;;  %v1415_v61 = vadd.f32 %v1414_v49, %v1413_v56  ;;  %v1402_v51 = vrot.slane %v1401_v53, 2 }
 0x6f2   : > { %v1331_v16 = vsel %vm548_vm0, %v1330_v11, 0.0 }
 0x6f3   : > { %v1409_v27 = vrot.slane %v1408_v60, 2  ;;  %v1416_v31 = vrot.slane %v1415_v61, 2  ;;  %v1403_v52 = vadd.f32 %v1402_v51, %v1401_v53 }
 0x6f5   : > { %v1410_v34 = vadd.f32 %v1409_v27, %v1408_v60  ;;  %v1417_v38 = vadd.f32 %v1416_v31, %v1415_v61  ;;  %v1404_v32 = vrot.slane %v1403_v52, 1 }
 0x6f7   : > { %v1411_v39 = vrot.slane %v1410_v34, 1  ;;  %v1418_v18 = vrot.slane %v1417_v38, 1  ;;  %v1405_v48 = vadd.f32 %v1404_v32, %v1403_v52  ;;  %v1197_v52 = vmul.f32 %v1193_v55, %v4336_v7 }
 0x6f9   : > { %v1412_v30 = vadd.f32 %v1411_v39, %v1410_v34  ;;  %v1419_v36 = vadd.f32 %v1418_v18, %v1417_v38 }
 0x6fb   : > { %v1450_v6 = vsel %vm622_vm3, %v1412_v30, %v1405_v48  ;;  %v1199_v48 = vmul.f32 %v1195_v45, %v4343_v17 }
 0x6fc   : > { %v1451_v21 = vsel %vm624_vm4, %v1419_v36, %v1450_v6 }
 0x711   : > { %1332 = vadd.xlane.f32.xlu1 %v1331_v16  ;;  %v1329_v16 = vpop.xlane.xlu0 %1328 }
 0x75b   : > { %v1190_v8 = vpop.permute.xlu1 %1189 }
 0x75c   : > { %v1192_v20 = vmul.f32 %v4469_v50, %v1190_v8 }
 0x75e   : > { %v1202_v56 = vcombine.high %v1192_v20, %v1192_v20 }
 0x75f   : > { %v4537_v24 = vpop.permute.xlu1 %1361 }
 0x760   : > { %v1209_v49 = vrot.slane %v1202_v56, %v4288_v5  ;;  %v1398_v53 = vmul.f32 %v4537_v24, %v1312_v0  ;;  %v1611_v4 = vsub.f32 1.0, %v4537_v24 }
 0x762   : > { %v1210_v9 = vcombine.high %v1209_v49, %v1209_v49  ;;  %v1217_v59 = vrot.slane %v1209_v49, %v4288_v5  ;;  %v1420_v60 = vsel %vm982_vm11, %v1398_v53, 0.0  ;;  %v4546_v61 = vmul.f32 %v1611_v4, %v1312_v0 }
 0x763   : > { %v1421_v51 = vrot.slane %v1420_v60, 4  ;;  %v1198_v0 = vmul.f32 %v1194_v46, %v4340_v14  ;;  %v1145_v53 = vrot.slane %v4275_v15, 4 }
 0x764   : > { %v1224_v50 = vrot.slane %v1210_v9, %v4288_v5  ;;  %v1225_v27 = vcombine.high %v1217_v59, %v1217_v59  ;;  %v1230_v31 = vrot.slane %v1217_v59, %v4079_v2 }
 0x765   : > { %v1422_v34 = vadd.f32 %v1421_v51, %v1420_v60  ;;  %v1155_v51 = vpop.permute.xlu0 %1154 }
 0x766   : > { %v1226_v38 = vcombine.high %v1224_v50, %v1224_v50  ;;  %v1234_v32 = vrot.slane %v1224_v50, %v4079_v2  ;;  %v1238_v39 = vrot.slane %v1225_v27, %v4079_v2  ;;  %v1247_v18 = vmul.f32 %v1230_v31, %v4268_v42 }
 0x767   : > { %v1423_v30 = vrot.slane %v1422_v34, 2  ;;  %v5381_v42 = vsub.f32 1.0, %v4308_v29 }
 0x768   : > { %v1242_v36 = vrot.slane %v1226_v38, %v4079_v2  ;;  %v1248_v7 = vmul.f32 %v1234_v32, %v4300_v13  ;;  %v1249_v55 = vmul.f32 %v1238_v39, %v4270_v43  ;;  %v4565_v6 = vadd.f32 %v1247_v18, %v1197_v52 }
 0x769   : > { %v1200_v11 = vmul.f32 %v5381_v42, %v4349_v19  ;;  %v1424_v8 = vadd.f32 %v1423_v30, %v1422_v34  ;;  %v1147_v34 = vmul.f32 %v4467_v47, %v1145_v53 }
 0x76a   : > { %v1250_v14 = vmul.f32 %v1242_v36, %v4308_v29  ;;  %v4571_v46 = vadd.f32 %v1248_v7, %v1198_v0  ;;  %v4573_v17 = vadd.f32 %v1249_v55, %v1199_v48  ;;  %v1363_v45 = vmul.f32 %v4488_v25, %v4565_v6 }
 0x76b   : > { %v1425_v13 = vrot.slane %v1424_v8, 1  ;;  %v4592_v0 = vadd.f32 %v1155_v51, %v1147_v34 }
 0x76c   : > { %v1364_v43 = vmul.f32 %v4516_v62, %v4571_v46  ;;  %v4579_v20 = vadd.f32 %v1250_v14, %v1200_v11  ;;  %v1365_v19 = vmul.f32 %v4514_v58, %v4573_v17  ;;  %v1367_v56 = vsel %vm949_vm9, %v1363_v45, 0.0 }
 0x76d   : > { %v1368_v49 = vrot.slane %v1367_v56, 4  ;;  %v1426_v29 = vadd.f32 %v1425_v13, %v1424_v8  ;;  %3914 = vtanh.f32 %v4592_v0 }
 0x76e   : > { %v1366_v9 = vmul.f32 %v4537_v24, %v4579_v20  ;;  %v1374_v59 = vsel %vm949_vm9, %v1364_v43, 0.0  ;;  %v1381_v60 = vsel %vm949_vm9, %v1365_v19, 0.0 }
 0x76f   : > { %v1369_v50 = vadd.f32 %v1368_v49, %v1367_v56  ;;  %v1375_v27 = vrot.slane %v1374_v59, 4  ;;  %v1382_v31 = vrot.slane %v1381_v60, 4  ;;  %v1452_v52 = vsel %vm626_vm5, %v1426_v29, %v1451_v21 }
 0x770   : > { %v1388_v38 = vsel %vm949_vm9, %v1366_v9, 0.0 }
 0x771   : > { %v1370_v32 = vrot.slane %v1369_v50, 2  ;;  %v1376_v39 = vadd.f32 %v1375_v27, %v1374_v59  ;;  %v1383_v15 = vadd.f32 %v1382_v31, %v1381_v60  ;;  %v1389_v18 = vrot.slane %v1388_v38, 4 }
 0x773   : > { %v1371_v48 = vadd.f32 %v1370_v32, %v1369_v50  ;;  %v1377_v30 = vrot.slane %v1376_v39, 2  ;;  %v1384_v36 = vrot.slane %v1383_v15, 2  ;;  %v1390_v7 = vadd.f32 %v1389_v18, %v1388_v38  ;;  %v4601_v50 = vld [vmem:[%s4116_s10] ss:$0 sm:$0xff] }
 0x775   : > { %v1372_v55 = vrot.slane %v1371_v48, 1  ;;  %v1378_v42 = vadd.f32 %v1377_v30, %v1376_v39  ;;  %v1385_v11 = vadd.f32 %v1384_v36, %v1383_v15  ;;  %v1391_v8 = vrot.slane %v1390_v7, 2  ;;  %v3698_v39 = vld [vmem:[%s4216_s23 + $0x8] sm:$0xf] }
 0x777   : > { %v1379_v21 = vrot.slane %v1378_v42, 1  ;;  %v1386_v14 = vrot.slane %v1385_v11, 1  ;;  %v1392_v45 = vadd.f32 %v1391_v8, %v1390_v7  ;;  %v1373_v13 = vadd.f32 %v1372_v55, %v1371_v48  ;;  %v3915_v59 = vpop.eup %3914 }
 0x779   : > { %v1380_v43 = vadd.f32 %v1379_v21, %v1378_v42  ;;  %v1387_v19 = vadd.f32 %v1386_v14, %v1385_v11  ;;  %v1393_v56 = vrot.slane %v1392_v45, 1 }
 0x77b   : > { %v1394_v49 = vadd.f32 %v1393_v56, %v1392_v45  ;;  %v1431_v29 = vsel %vm622_vm3, %v1380_v43, %v1373_v13  ;;  %v1322_v56 = vld [vmem:[#allocation2 + $0x18] sm:$0xf] }
 0x77c   : > { %v1432_v53 = vsel %vm624_vm4, %v1387_v19, %v1431_v29 }
 0x77d   : > { %v1433_v9 = vsel %vm626_vm5, %v1394_v49, %v1432_v53  ;;  %v4629_v53 = vld [vmem:[%s4085_s29 + $0xc] sm:$0xf] }
 0x77e   : > { %1434 = vrot.lane.b32.xlu1 %v1433_v9, %s4021_s13 }
 0x782   : > { %1160 = vrot.lane.b32.xlu1 %v3915_v59, %s4015_s20 }
 0x79e   : > { %v1333_v60 = vpop.xlane.xlu1 %1332 }
 0x79f   : > { %v1334_v51 = vsub.f32 %v1329_v16, %v1333_v60 }
 0x7a1   : > { %v1439_v27 = vmul.f32 %v4601_v50, %v1334_v51  ;;  %v1764_v51 = vrot.slane %v4629_v53, %v4107_v12 }
 0x7a3   : > { %1441 = vrot.lane.b32.xlu0 %v1439_v27, %s4015_s20 }
 0x7f0   : > { %v1435_v31 = vpop.permute.xlu1 %1434 }
 0x7f1   : > { %v1437_v32 = vmul.f32 %v1435_v31, %v1333_v60 }
 0x7f3   : > { %v1438_v15 = vadd.f32 %v3698_v39, %v1437_v32 }
 0x7f4   : > { %v1161_v34 = vpop.permute.xlu1 %1160 }
 0x7f5   : > { %v4606_v38 = vmul.f32 %v4467_v47, %v1161_v34 }
 0x7f7   : > { %1461 = vrot.lane.b32.xlu0 %v4606_v38, %s4016_s27 }
 0x815   : > { %v1442_v18 = vpop.permute.xlu0 %1441 }
 0x816   : > { %v1444_v48 = vadd.f32 %v1442_v18, %v1438_v15  ;;  %v1445_v16 = vadd.f32 %v1442_v18, %v1437_v32 }
 0x818   : > { %v1470_v30 = vrot.slane %v1445_v16, 4  ;;  %v1465_v36 = vrot.slane %v1444_v48, 4 }
 0x81a   : > { %1471 = vrot.lane.b32.xlu0 %v1470_v30, %s4017_s28  ;;  %1466 = vrot.lane.b32.xlu1 %v1465_v36, %s4016_s27 }
 0x81e   : > { %1457 = vrot.lane.b32.xlu0 %v1439_v27, %s4017_s28  ;;  %1453 = vrot.lane.b32.xlu1 %v1452_v52, %s4022_s25  ;;  %v1321_v52 = vld [vmem:[#allocation2 + $0x10] sm:$0xf]  ;;  %v1739_v27 = vsel %vm548_vm0, %v4629_v53, 0.0 }
 0x869   : > { %v1462_v47 = vpop.permute.xlu0 %1461 }
 0x88c   : > { %v1467_v7 = vpop.permute.xlu1 %1466  ;;  %v1472_v55 = vpop.permute.xlu0 %1471 }
 0x88d   : > { %v1474_v42 = vsel %vm650_vm6, %v1462_v47, %v1467_v7 }
 0x88e   : > { %v1475_v11 = vsel %vm652_vm7, %v1474_v42, %v1472_v55  ;;  %v1757_v42 = vrot.slane %v4629_v53, %v4088_v3 }
 0x88f   : > { %v1477_v8 = vrot.slane %v1475_v11, 4 }
 0x890   : > { %v1454_v21 = vpop.permute.xlu1 %1453  ;;  %v1458_v45 = vpop.permute.xlu0 %1457 }
 0x891   : > { %v1456_v14 = vmul.f32 %v1454_v21, %v1333_v60  ;;  %3700 = vmatmul.mubr.msk.f32.vlgmr.msra.gmra.mrb[2].mxu1 %vm513_vm8, %v1477_v8  ;;  %v1750_v60 = vrot.slane %v4629_v53, %v4079_v2 }
 0x892   : > { %3806 = vmatpush1.bf16.msra.mxu1 %v4144_v28  ;;  %2373 = vmatprep.mubr.f32.mxu1 %v5378_v26 }
 0x893   : > { %v1460_v13 = vadd.f32 %v1458_v45, %v1456_v14  ;;  %3808 = vmatprep.subr.bf16.mxu1 %v4159_v35  ;;  %v1561_v14 = vrot.slane %v4592_v0, 4  ;;  %v1610_v0 = vsub.f32 1.0, %v4514_v58 }
 0x895   : > { %1588 = vrot.lane.b32.xlu0 %v1460_v13, %s4018_s11 }
 0x896   : > { %3810 = vmatpush1.bf16.msra.mxu1 %v4165_v40 }
 0x897   : > { %3812 = vmatprep.subr.bf16.mxu1 %v4167_v41 }
 0x89a   : > { %3814 = vmatpush1.bf16.msra.mxu1 %v4175_v44 }
 0x89b   : > { %3816 = vmatprep.subr.bf16.mxu1 %v4201_v33 }
 0x89e   : > { %3818 = vmatpush1.bf16.msra.mxu1 %v4205_v37 }
 0x89f   : > { %3836 = vmatprep.subr.bf16.mxu1 %v4139_v22 }
 0x907   : > { %v1589_v48 = vpop.permute.xlu0 %1588 }
 0x964   : > { %v1546_v43 = vpop.f32.mrb[2].mxu1 }
 0x965   : > { %v1551_v19 = vadd.f32 %v1546_v43, %v1321_v52  ;;  %v1548_v49 = vpop.f32.mrb[3].mxu1 }
 0x966   : > { %v1552_v29 = vadd.f32 %v1548_v49, %v1322_v56 }
 0x967   : > { %3916 = vtanh.f32 %v1551_v19  ;;  %v3701_v31 = vmul.f32 -1.442695, %v1551_v19 }
 0x968   : > { %3918 = vtanh.f32 %v1552_v29  ;;  %v3702_v34 = vmul.f32 -1.442695, %v1552_v29  ;;  %v1608_v29 = vsub.f32 1.0, %v4488_v25 }
 0x969   : > { %3920 = vpow2.f32 %v3701_v31 }
 0x96a   : > { %3922 = vpow2.f32 %v3702_v34  ;;  %v1669_v34 = vmul.f32 %v1608_v29, %v4502_v54 }
 0x971   : > { %v3917_v9 = vpop.eup %3916 }
 0x972   : > { %v3919_v59 = vpop.eup %3918  ;;  %1565 = vrot.lane.b32.xlu0 %v3917_v9, %s4015_s20 }
 0x973   : > { %1593 = vrot.lane.b32.xlu1 %v3919_v59, %s4019_s12  ;;  %v3921_v32 = vpop.eup %3920 }
 0x974   : > { %v3923_v39 = vpop.eup %3922  ;;  %v1556_v15 = vadd.f32 1.0, %v3921_v32 }
 0x975   : > { %v1583_v18 = vadd.f32 1.0, %v3923_v39 }
 0x976   : > { %1752 = vbcast.lane.b32.xlu0 %v1750_v60, 256  ;;  %3924 = vrcp.f32 %v1556_v15  ;;  %v1609_v60 = vsub.f32 1.0, %v4516_v62 }
 0x977   : > { %3926 = vrcp.f32 %v1583_v18 }
 0x97a   : > { %1766 = vbcast.lane.b32.xlu0 %v1764_v51, 256 }
 0x980   : > { %v4639_v16 = vpop.eup %3924 }
 0x981   : > { %v4641_v36 = vpop.eup %3926  ;;  %v1563_v45 = vmul.f32 %v4639_v16, %v1561_v14 }
 0x982   : > { %v1591_v52 = vmul.f32 %v4641_v36, %v1589_v48  ;;  %v1670_v48 = vmul.f32 %v1609_v60, %v4511_v1 }
 0x999   : > { %1740 = vadd.xlane.f32.xlu0 %v1739_v27 }
 0x9e4   : > { %v1566_v30 = vpop.permute.xlu0 %1565 }
 0x9e5   : > { %v1568_v47 = vmul.f32 %v4639_v16, %v1566_v30  ;;  %v1594_v7 = vpop.permute.xlu1 %1593  ;;  %v1671_v30 = vmul.f32 %v1610_v0, %v4507_v57 }
 0x9e6   : > { %v1596_v55 = vmul.f32 %v4641_v36, %v1594_v7 }
 0x9e7   : > { %1570 = vrot.lane.b32.xlu0 %v1568_v47, %s4016_s27 }
 0x9e8   : > { %1598 = vrot.lane.b32.xlu1 %v1596_v55, %s4018_s11  ;;  %v4649_v11 = vpop.permute.xlu0 %1752 }
 0x9ec   : > { %1759 = vbcast.lane.b32.xlu1 %v1757_v42, 256  ;;  %v4651_v8 = vpop.permute.xlu0 %1766 }
 0xa26   : > { %v4653_v21 = vpop.xlane.xlu0 %1740 }
 0xa59   : > { %v1571_v13 = vpop.permute.xlu0 %1570 }
 0xa5a   : > { %v4658_v43 = vadd.f32 %v1571_v13, %v1563_v45  ;;  %v1599_v19 = vpop.permute.xlu1 %1598 }
 0xa5b   : > { %v1601_v56 = vadd.f32 %v1599_v19, %v1591_v52  ;;  %v1771_v52 = vrot.slane %v4629_v53, %v4102_v10 }
 0xa5c   : > { %3928 = vtanh.f32 %v4658_v43 }
 0xa5d   : > { %3930 = vtanh.f32 %v1601_v56  ;;  %v1680_v49 = vrot.slane %v1601_v56, %v4288_v5 }
 0xa5e   : > { %v4692_v57 = vpop.permute.xlu1 %1759 }
 0xa5f   : > { %v1681_v9 = vcombine.high %v1680_v49, %v1680_v49  ;;  %v1688_v59 = vrot.slane %v1680_v49, %v4288_v5 }
 0xa61   : > { %v1695_v51 = vrot.slane %v1681_v9, %v4288_v5  ;;  %v1696_v27 = vcombine.high %v1688_v59, %v1688_v59  ;;  %v1701_v31 = vrot.slane %v1688_v59, %v4079_v2 }
 0xa63   : > { %v1697_v32 = vcombine.high %v1695_v51, %v1695_v51  ;;  %v1705_v39 = vrot.slane %v1695_v51, %v4079_v2  ;;  %v1709_v15 = vrot.slane %v1696_v27, %v4079_v2  ;;  %v1718_v18 = vmul.f32 %v1701_v31, %v4488_v25 }
 0xa65   : > { %v1713_v47 = vrot.slane %v1697_v32, %v4079_v2  ;;  %v1719_v7 = vmul.f32 %v1705_v39, %v4516_v62  ;;  %v1720_v54 = vmul.f32 %v1709_v15, %v4514_v58  ;;  %v4683_v55 = vadd.f32 %v1718_v18, %v1669_v34 }
 0xa66   : > { %v3929_v42 = vpop.eup %3928 }
 0xa67   : > { %v3931_v14 = vpop.eup %3930  ;;  %v4685_v45 = vadd.f32 %v1720_v54, %v1671_v30  ;;  %v1807_v13 = vmul.f32 %v4649_v11, %v4683_v55  ;;  %v4689_v1 = vadd.f32 %v1719_v7, %v1670_v48  ;;  %1576 = vrot.lane.b32.xlu0 %v3929_v42, %s4015_s20  ;;  %v1721_v19 = vmul.f32 %v1713_v47, %v4537_v24 }
 0xa68   : > { %1604 = vrot.lane.b32.xlu1 %v3931_v14, %s4016_s27 }
 0xa69   : > { %v1808_v56 = vmul.f32 %v4692_v57, %v4689_v1  ;;  %v1809_v49 = vmul.f32 %v4651_v8, %v4685_v45  ;;  %v1811_v9 = vsel %vm982_vm11, %v1807_v13, 0.0  ;;  %v1725_v59 = vadd.f32 %v1721_v19, %v4546_v61 }
 0xa6a   : > { %v1812_v51 = vrot.slane %v1811_v9, 4 }
 0xa6b   : > { %v1818_v27 = vsel %vm982_vm11, %v1808_v56, 0.0  ;;  %v1825_v31 = vsel %vm982_vm11, %v1809_v49, 0.0 }
 0xa6c   : > { %v1819_v34 = vrot.slane %v1818_v27, 4  ;;  %1773 = vbcast.lane.b32.xlu1 %v1771_v52, 256  ;;  %v1813_v32 = vadd.f32 %v1812_v51, %v1811_v9  ;;  %v1826_v39 = vrot.slane %v1825_v31, 4  ;;  %v4710_v9 = vmax.f32 %v4531_v63, %v4457_v23 }
 0xa6e   : > { %v1814_v15 = vrot.slane %v1813_v32, 2  ;;  %v1820_v18 = vadd.f32 %v1819_v34, %v1818_v27  ;;  %v1827_v48 = vadd.f32 %v1826_v39, %v1825_v31  ;;  %v1742_v51 = vmul.f32 %v4629_v53, %v4710_v9 }
 0xa70   : > { %v1815_v30 = vadd.f32 %v1814_v15, %v1813_v32  ;;  %v1821_v47 = vrot.slane %v1820_v18, 2  ;;  %v1828_v7 = vrot.slane %v1827_v48, 2  ;;  %v1743_v27 = vsel %vm548_vm0, %v1742_v51, 0.0 }
 0xa72   : > { %v1816_v54 = vrot.slane %v1815_v30, 1  ;;  %v1822_v42 = vadd.f32 %v1821_v47, %v1820_v18  ;;  %v1829_v14 = vadd.f32 %v1828_v7, %v1827_v48  ;;  %v1612_v7 = vmul.f32 %v1608_v29, %v4565_v6 }
 0xa73   : > { %v1614_v6 = vmul.f32 %v1610_v0, %v4573_v17 }
 0xa74   : > { %v1823_v13 = vrot.slane %v1822_v42, 1  ;;  %v1830_v61 = vrot.slane %v1829_v14, 1  ;;  %v1817_v19 = vadd.f32 %v1816_v54, %v1815_v30 }
 0xa76   : > { %v1824_v26 = vadd.f32 %v1823_v13, %v1822_v42  ;;  %v1831_v56 = vadd.f32 %v1830_v61, %v1829_v14 }
 0xa78   : > { %v1862_v49 = vsel %vm622_vm3, %v1824_v26, %v1817_v19 }
 0xa79   : > { %v1863_v52 = vsel %vm624_vm4, %v1831_v56, %v1862_v49  ;;  %v1613_v56 = vmul.f32 %v1609_v60, %v4571_v46 }
 0xa90   : > { %1744 = vadd.xlane.f32.xlu1 %v1743_v27 }
 0xad9   : > { %v1577_v31 = vpop.permute.xlu0 %1576 }
 0xada   : > { %v4716_v34 = vmul.f32 %v4639_v16, %v1577_v31  ;;  %v1605_v32 = vpop.permute.xlu1 %1604 }
 0xadb   : > { %v1607_v39 = vmul.f32 %v4641_v36, %v1605_v32 }
 0xadc   : > { %1873 = vrot.lane.b32.xlu0 %v4716_v34, %s4016_s27 }
 0xadd   : > { %v1623_v26 = vrot.slane %v1607_v39, %v4288_v5 }
 0xade   : > { %v4722_v23 = vpop.permute.xlu1 %1773 }
 0xadf   : > { %v1624_v63 = vcombine.high %v1623_v26, %v1623_v26  ;;  %v1631_v15 = vrot.slane %v1623_v26, %v4288_v5  ;;  %v1810_v18 = vmul.f32 %v4722_v23, %v1725_v59  ;;  %v2027_v48 = vsub.f32 1.0, %v4722_v23 }
 0xae1   : > { %v1638_v16 = vrot.slane %v1624_v63, %v4288_v5  ;;  %v1639_v30 = vcombine.high %v1631_v15, %v1631_v15  ;;  %v1644_v47 = vrot.slane %v1631_v15, %v4079_v2  ;;  %v1832_v36 = vsel %vm982_vm11, %v1810_v18, 0.0 }
 0xae2   : > { %v1833_v54 = vrot.slane %v1832_v36, 4  ;;  %v4735_v42 = vmul.f32 %v2027_v48, %v1725_v59 }
 0xae3   : > { %v1640_v14 = vcombine.high %v1638_v16, %v1638_v16  ;;  %v1648_v13 = vrot.slane %v1638_v16, %v4079_v2  ;;  %v1652_v61 = vrot.slane %v1639_v30, %v4079_v2  ;;  %v1661_v19 = vmul.f32 %v1644_v47, %v4488_v25 }
 0xae4   : > { %v1834_v29 = vadd.f32 %v1833_v54, %v1832_v36  ;;  %v1615_v25 = vmul.f32 %v1611_v4, %v4579_v20 }
 0xae5   : > { %v1656_v49 = vrot.slane %v1640_v14, %v4079_v2  ;;  %v1662_v59 = vmul.f32 %v1648_v13, %v4516_v62  ;;  %v1663_v51 = vmul.f32 %v1652_v61, %v4514_v58  ;;  %v4749_v27 = vadd.f32 %v1661_v19, %v1612_v7 }
 0xae6   : > { %v1835_v31 = vrot.slane %v1834_v29, 2 }
 0xae7   : > { %v4754_v32 = vadd.f32 %v1662_v59, %v1613_v56  ;;  %v4756_v46 = vadd.f32 %v1663_v51, %v1614_v6  ;;  %v1775_v17 = vmul.f32 %v4649_v11, %v4749_v27  ;;  %v1664_v0 = vmul.f32 %v1656_v49, %v4537_v24 }
 0xae8   : > { %v1836_v60 = vadd.f32 %v1835_v31, %v1834_v29 }
 0xae9   : > { %v1776_v58 = vmul.f32 %v4692_v57, %v4754_v32  ;;  %v4763_v62 = vadd.f32 %v1664_v0, %v1615_v25  ;;  %v1777_v39 = vmul.f32 %v4651_v8, %v4756_v46  ;;  %v1779_v4 = vsel %vm949_vm9, %v1775_v17, 0.0 }
 0xaea   : > { %v1780_v20 = vrot.slane %v1779_v4, 4  ;;  %v1837_v26 = vrot.slane %v1836_v60, 1 }
 0xaeb   : > { %v1778_v63 = vmul.f32 %v4722_v23, %v4763_v62  ;;  %v1786_v15 = vsel %vm949_vm9, %v1776_v58, 0.0  ;;  %v1793_v24 = vsel %vm949_vm9, %v1777_v39, 0.0 }
 0xaec   : > { %v1781_v18 = vadd.f32 %v1780_v20, %v1779_v4  ;;  %v1787_v16 = vrot.slane %v1786_v15, 4  ;;  %v1794_v30 = vrot.slane %v1793_v24, 4  ;;  %v1838_v47 = vadd.f32 %v1837_v26, %v1836_v60 }
 0xaed   : > { %v1800_v36 = vsel %vm949_vm9, %v1778_v63, 0.0 }
 0xaee   : > { %v1801_v7 = vrot.slane %v1800_v36, 4  ;;  %v1782_v54 = vrot.slane %v1781_v18, 2  ;;  %v1788_v14 = vadd.f32 %v1787_v16, %v1786_v15  ;;  %v1795_v13 = vadd.f32 %v1794_v30, %v1793_v24 }
 0xaef   : > { %v1864_v61 = vsel %vm626_vm5, %v1838_v47, %v1863_v52  ;;  %v3703_v47 = vld [vmem:[%s4216_s23 + $0xc] sm:$0xf] }
 0xaf0   : > { %v1783_v19 = vadd.f32 %v1782_v54, %v1781_v18  ;;  %v1789_v56 = vrot.slane %v1788_v14, 2  ;;  %v1796_v6 = vrot.slane %v1795_v13, 2  ;;  %v1802_v29 = vadd.f32 %v1801_v7, %v1800_v36 }
 0xaf2   : > { %v1784_v49 = vrot.slane %v1783_v19, 1  ;;  %v1790_v59 = vadd.f32 %v1789_v56, %v1788_v14  ;;  %v1797_v51 = vadd.f32 %v1796_v6, %v1795_v13  ;;  %v1803_v25 = vrot.slane %v1802_v29, 2 }
 0xaf4   : > { %v1791_v31 = vrot.slane %v1790_v59, 1  ;;  %v1798_v17 = vrot.slane %v1797_v51, 1  ;;  %v1804_v0 = vadd.f32 %v1803_v25, %v1802_v29  ;;  %v1785_v60 = vadd.f32 %v1784_v49, %v1783_v19 }
 0xaf5   : > { %v5382_v49 = vmov 0.0  }
 0xaf6   : > { %v1792_v58 = vadd.f32 %v1791_v31, %v1790_v59  ;;  %v1799_v39 = vadd.f32 %v1798_v17, %v1797_v51  ;;  %v1805_v4 = vrot.slane %v1804_v0, 1 }
 0xaf8   : > { %v1806_v20 = vadd.f32 %v1805_v4, %v1804_v0  ;;  %v1843_v26 = vsel %vm622_vm3, %v1792_v58, %v1785_v60  ;;  %v1733_v60 = vld [vmem:[#allocation2 + $0x10] sm:$0xf0]  ;;  %v1734_v4 = vld [vmem:[#allocation2 + $0x18] sm:$0xf0] }
 0xaf9   : > { %v1844_v52 = vsel %vm624_vm4, %v1799_v39, %v1843_v26  ;;  %v4800_v26 = vld [vmem:[%s4085_s29 + $0x10] sm:$0xf] }
 0xafa   : > { %v1845_v63 = vsel %vm626_vm5, %v1806_v20, %v1844_v52 }
 0xafb   : > { %1846 = vrot.lane.b32.xlu1 %v1845_v63, %s4021_s13 }
 0xb1d   : > { %v1745_v15 = vpop.xlane.xlu1 %1744 }
 0xb1e   : > { %v1746_v24 = vsub.f32 %v4653_v21, %v1745_v15 }
 0xb20   : > { %v1851_v18 = vmul.f32 %v4601_v50, %v1746_v24  ;;  %v2156_v24 = vsel %vm548_vm0, %v4800_v26, 0.0 }
 0xb22   : > { %1853 = vrot.lane.b32.xlu1 %v1851_v18, %s4015_s20 }
 0xb4e   : > { %v1874_v21 = vpop.permute.xlu0 %1873 }
 0xb6d   : > { %v1847_v16 = vpop.permute.xlu1 %1846 }
 0xb6e   : > { %v1849_v30 = vmul.f32 %v1847_v16, %v1745_v15 }
 0xb70   : > { %v1850_v36 = vadd.f32 %v3703_v47, %v1849_v30 }
 0xb94   : > { %v1854_v7 = vpop.permute.xlu1 %1853 }
 0xb95   : > { %v1856_v54 = vadd.f32 %v1854_v7, %v1850_v36  ;;  %v1857_v14 = vadd.f32 %v1854_v7, %v1849_v30 }
 0xb97   : > { %1877 = vrot.lane.b32.xlu1 %v1856_v54, %s4016_s27  ;;  %1881 = vrot.lane.b32.xlu0 %v1857_v14, %s4017_s28 }
 0xb9b   : > { %1865 = vrot.lane.b32.xlu1 %v1864_v61, %s4022_s25  ;;  %1869 = vrot.lane.b32.xlu0 %v1851_v18, %s4017_s28 }
 0xc09   : > { %v1878_v13 = vpop.permute.xlu1 %1877  ;;  %v1882_v19 = vpop.permute.xlu0 %1881 }
 0xc0a   : > { %v1884_v56 = vsel %vm650_vm6, %v1874_v21, %v1878_v13 }
 0xc0b   : > { %v1885_v6 = vsel %vm652_vm7, %v1884_v56, %v1882_v19 }
 0xc0c   : > { %3705 = vmatmul.mubr.msk.f32.vlgmr.msra.gmra.mrb[10].mxu0 %vm513_vm8, %v1885_v6 }
 0xc0d   : > { %v1866_v29 = vpop.permute.xlu1 %1865  ;;  %3822 = vmatpush1.bf16.msra.mxu0 %v4144_v28  ;;  %2778 = vmatprep.mubr.f32.mxu0 %v5382_v49  ;;  %v1870_v61 = vpop.permute.xlu0 %1869 }
 0xc0e   : > { %v1868_v59 = vmul.f32 %v1866_v29, %v1745_v15  ;;  %3824 = vmatprep.subr.bf16.mxu0 %v4159_v35  ;;  %v2167_v15 = vrot.slane %v4800_v26, %v4079_v2  ;;  %v2174_v29 = vrot.slane %v4800_v26, %v4088_v3 }
 0xc10   : > { %v1872_v51 = vadd.f32 %v1870_v61, %v1868_v59 }
 0xc11   : > { %3826 = vmatpush1.bf16.msra.mxu0 %v4165_v40 }
 0xc12   : > { %v2003_v25 = vrot.slane %v1872_v51, 4  ;;  %3828 = vmatprep.subr.bf16.mxu0 %v4167_v41 }
 0xc14   : > { %2004 = vrot.lane.b32.xlu0 %v2003_v25, %s4018_s11 }
 0xc15   : > { %3830 = vmatpush1.bf16.msra.mxu0 %v4175_v44 }
 0xc16   : > { %3832 = vmatprep.subr.bf16.mxu0 %v4201_v33 }
 0xc19   : > { %3834 = vmatpush1.bf16.msra.mxu0 %v4205_v37 }
 0xc1a   : > { %3852 = vmatprep.subr.bf16.mxu0 %v4139_v22  ;;  %v2181_v22 = vrot.slane %v4800_v26, %v4107_v12 }
 0xc86   : > { %v2005_v54 = vpop.permute.xlu0 %2004 }
 0xcdf   : > { %v1955_v31 = vpop.f32.mrb[10].mxu0 }
 0xce0   : > { %v1962_v17 = vrot.slane %v1955_v31, 4  ;;  %v1957_v0 = vpop.f32.mrb[11].mxu0 }
 0xce1   : > { %v1963_v58 = vrot.slane %v1957_v0, 4 }
 0xce2   : > { %v1966_v39 = vadd.f32 %v1962_v17, %v1733_v60  ;;  %v2024_v17 = vsub.f32 1.0, %v4649_v11 }
 0xce3   : > { %v1967_v20 = vadd.f32 %v1963_v58, %v1734_v4  ;;  %v2026_v58 = vsub.f32 1.0, %v4651_v8 }
 0xce4   : > { %3932 = vtanh.f32 %v1966_v39  ;;  %v3706_v18 = vmul.f32 -1.442695, %v1966_v39  ;;  %v2025_v39 = vsub.f32 1.0, %v4692_v57 }
 0xce5   : > { %3934 = vtanh.f32 %v1967_v20  ;;  %v3707_v16 = vmul.f32 -1.442695, %v1967_v20 }
 0xce6   : > { %3936 = vpow2.f32 %v3706_v18 }
 0xce7   : > { %3938 = vpow2.f32 %v3707_v16 }
 0xcee   : > { %v3933_v52 = vpop.eup %3932 }
 0xcef   : > { %v3935_v63 = vpop.eup %3934  ;;  %1980 = vrot.lane.b32.xlu0 %v3933_v52, %s4015_s20 }
 0xcf0   : > { %2009 = vrot.lane.b32.xlu1 %v3935_v63, %s4019_s12  ;;  %v3937_v30 = vpop.eup %3936  ;;  %v2086_v63 = vmul.f32 %v2024_v17, %v4683_v55 }
 0xcf1   : > { %v3939_v47 = vpop.eup %3938  ;;  %v1971_v36 = vadd.f32 1.0, %v3937_v30  ;;  %v2088_v30 = vmul.f32 %v2026_v58, %v4685_v45 }
 0xcf2   : > { %v1998_v7 = vadd.f32 1.0, %v3939_v47  ;;  %v2087_v47 = vmul.f32 %v2025_v39, %v4689_v1 }
 0xcf3   : > { %2169 = vbcast.lane.b32.xlu0 %v2167_v15, 256  ;;  %3940 = vrcp.f32 %v1971_v36 }
 0xcf4   : > { %3942 = vrcp.f32 %v1998_v7 }
 0xcf7   : > { %2183 = vbcast.lane.b32.xlu0 %v2181_v22, 256 }
 0xcfd   : > { %v4810_v14 = vpop.eup %3940 }
 0xcfe   : > { %v4812_v13 = vpop.eup %3942 }
 0xcff   : > { %v2007_v59 = vmul.f32 %v4812_v13, %v2005_v54 }
 0xd16   : > { %2157 = vadd.xlane.f32.xlu0 %v2156_v24 }
 0xd61   : > { %v1981_v21 = vpop.permute.xlu0 %1980 }
 0xd62   : > { %v1983_v19 = vmul.f32 %v4810_v14, %v1981_v21  ;;  %v2010_v56 = vpop.permute.xlu1 %2009 }
 0xd63   : > { %v2012_v6 = vmul.f32 %v4812_v13, %v2010_v56 }
 0xd64   : > { %1985 = vrot.lane.b32.xlu0 %v1983_v19, %s4016_s27  ;;  %v2188_v19 = vrot.slane %v4800_v26, %v4102_v10 }
 0xd65   : > { %2014 = vrot.lane.b32.xlu1 %v2012_v6, %s4018_s11  ;;  %v4831_v15 = vpop.permute.xlu0 %2169 }
 0xd69   : > { %2176 = vbcast.lane.b32.xlu1 %v2174_v29, 256  ;;  %v4857_v29 = vpop.permute.xlu0 %2183 }
 0xdd7   : > { %v2015_v61 = vpop.permute.xlu1 %2014 }
 0xdd8   : > { %v2017_v51 = vadd.f32 %v2015_v61, %v2007_v59 }
 0xdda   : > { %3944 = vtanh.f32 %v2017_v51  ;;  %v2091_v25 = vcombine.high %v2017_v51, %v2017_v51 }
 0xddb   : > { %v4859_v59 = vpop.permute.xlu1 %2176 }
 0xddc   : > { %v2098_v31 = vrot.slane %v2091_v25, %v4288_v5 }
 0xdde   : > { %v2099_v0 = vcombine.high %v2098_v31, %v2098_v31  ;;  %v2106_v60 = vrot.slane %v2098_v31, %v4288_v5 }
 0xde0   : > { %v2113_v4 = vrot.slane %v2099_v0, %v4288_v5  ;;  %v2114_v20 = vcombine.high %v2106_v60, %v2106_v60  ;;  %v2119_v52 = vrot.slane %v2106_v60, %v4079_v2 }
 0xde2   : > { %v2115_v22 = vcombine.high %v2113_v4, %v2113_v4  ;;  %v2123_v24 = vrot.slane %v2113_v4, %v4079_v2  ;;  %v2127_v18 = vrot.slane %v2114_v20, %v4079_v2  ;;  %v2136_v16 = vmul.f32 %v2119_v52, %v4649_v11 }
 0xde4   : > { %v3945_v36 = vpop.eup %3944  ;;  %v2131_v55 = vrot.slane %v2115_v22, %v4079_v2  ;;  %v2138_v7 = vmul.f32 %v2127_v18, %v4651_v8  ;;  %v4844_v54 = vadd.f32 %v2136_v16, %v2086_v63  ;;  %v2137_v21 = vmul.f32 %v2123_v24, %v4692_v57 }
 0xde5   : > { %2020 = vrot.lane.b32.xlu1 %v3945_v36, %s4016_s27 }
 0xde6   : > { %v4850_v56 = vadd.f32 %v2138_v7, %v2088_v30  ;;  %v2224_v45 = vmul.f32 %v4831_v15, %v4844_v54  ;;  %v4854_v1 = vadd.f32 %v2137_v21, %v2087_v47  ;;  %v2139_v6 = vmul.f32 %v2131_v55, %v4722_v23 }
 0xde8   : > { %v2225_v61 = vmul.f32 %v4859_v59, %v4854_v1  ;;  %v2143_v51 = vadd.f32 %v2139_v6, %v4735_v42  ;;  %v2226_v25 = vmul.f32 %v4857_v29, %v4850_v56  ;;  %v2228_v31 = vsel %vm982_vm11, %v2224_v45, 0.0 }
 0xde9   : > { %2190 = vbcast.lane.b32.xlu1 %v2188_v19, 256  ;;  %v2229_v60 = vrot.slane %v2228_v31, 4 }
 0xdea   : > { %v2235_v0 = vsel %vm982_vm11, %v2225_v61, 0.0  ;;  %v2242_v4 = vsel %vm982_vm11, %v2226_v25, 0.0 }
 0xdeb   : > { %v2236_v20 = vrot.slane %v2235_v0, 4  ;;  %v2243_v52 = vrot.slane %v2242_v4, 4  ;;  %v2230_v63 = vadd.f32 %v2229_v60, %v2228_v31  ;;  %v4873_v31 = vmax.f32 %v4710_v9, %v4629_v53 }
 0xded   : > { %v2237_v22 = vadd.f32 %v2236_v20, %v2235_v0  ;;  %v2244_v24 = vadd.f32 %v2243_v52, %v2242_v4  ;;  %v2231_v18 = vrot.slane %v2230_v63, 2  ;;  %v2159_v0 = vmul.f32 %v4800_v26, %v4873_v31 }
 0xdef   : > { %v2238_v16 = vrot.slane %v2237_v22, 2  ;;  %v2245_v30 = vrot.slane %v2244_v24, 2  ;;  %v2232_v42 = vadd.f32 %v2231_v18, %v2230_v63  ;;  %v2160_v60 = vsel %vm548_vm0, %v2159_v0, 0.0 }
 0xdf1   : > { %v2239_v47 = vadd.f32 %v2238_v16, %v2237_v22  ;;  %v2246_v36 = vadd.f32 %v2245_v30, %v2244_v24  ;;  %v2233_v55 = vrot.slane %v2232_v42, 1 }
 0xdf3   : > { %v2240_v7 = vrot.slane %v2239_v47, 1  ;;  %v2247_v21 = vrot.slane %v2246_v36, 1  ;;  %v2234_v19 = vadd.f32 %v2233_v55, %v2232_v42  ;;  %v2028_v55 = vmul.f32 %v2024_v17, %v4749_v27 }
 0xdf5   : > { %v2241_v45 = vadd.f32 %v2240_v7, %v2239_v47  ;;  %v2248_v6 = vadd.f32 %v2247_v21, %v2246_v36 }
 0xdf7   : > { %v2279_v61 = vsel %vm622_vm3, %v2241_v45, %v2234_v19 }
 0xdf8   : > { %v2280_v25 = vsel %vm624_vm4, %v2248_v6, %v2279_v61  ;;  %v2030_v61 = vmul.f32 %v2026_v58, %v4756_v46 }
 0xe0d   : > { %2161 = vadd.xlane.f32.xlu1 %v2160_v60 }
 0xe57   : > { %v2021_v4 = vpop.permute.xlu1 %2020 }
 0xe58   : > { %v2023_v20 = vmul.f32 %v4812_v13, %v2021_v4 }
 0xe5a   : > { %v2033_v52 = vcombine.high %v2023_v20, %v2023_v20  ;;  %v2158_v20 = vpop.xlane.xlu0 %2157 }
 0xe5b   : > { %v4879_v63 = vpop.permute.xlu1 %2190 }
 0xe5c   : > { %v2040_v22 = vrot.slane %v2033_v52, %v4288_v5  ;;  %v2227_v24 = vmul.f32 %v4879_v63, %v2143_v51  ;;  %v5380_v18 = vsub.f32 1.0, %v4879_v63 }
 0xe5e   : > { %v2041_v53 = vcombine.high %v2040_v22, %v2040_v22  ;;  %v2048_v9 = vrot.slane %v2040_v22, %v4288_v5  ;;  %v2249_v16 = vsel %vm982_vm11, %v2227_v24, 0.0  ;;  %v4888_v30 = vmul.f32 %v5380_v18, %v2143_v51 }
 0xe5f   : > { %v2250_v42 = vrot.slane %v2249_v16, 4  ;;  %v2029_v51 = vmul.f32 %v2025_v39, %v4754_v32 }
 0xe60   : > { %v2055_v13 = vrot.slane %v2041_v53, %v4288_v5  ;;  %v2056_v47 = vcombine.high %v2048_v9, %v2048_v9  ;;  %v2061_v36 = vrot.slane %v2048_v9, %v4079_v2  ;;  %v1976_v9 = vrot.slane %v4658_v43, 4 }
 0xe61   : > { %v2251_v7 = vadd.f32 %v2250_v42, %v2249_v16 }
 0xe62   : > { %v2057_v21 = vcombine.high %v2055_v13, %v2055_v13  ;;  %v2065_v19 = vrot.slane %v2055_v13, %v4079_v2  ;;  %v2069_v45 = vrot.slane %v2056_v47, %v4079_v2  ;;  %v2078_v6 = vmul.f32 %v2061_v36, %v4649_v11  ;;  %v1986_v13 = vpop.permute.xlu0 %1985 }
 0xe63   : > { %v2252_v0 = vrot.slane %v2251_v7, 2  ;;  %v2031_v11 = vmul.f32 %v2027_v48, %v4763_v62 }
 0xe64   : > { %v2073_v60 = vrot.slane %v2057_v21, %v4079_v2  ;;  %v2079_v27 = vmul.f32 %v2065_v19, %v4692_v57  ;;  %v2080_v17 = vmul.f32 %v2069_v45, %v4651_v8  ;;  %v4907_v4 = vadd.f32 %v2078_v6, %v2028_v55 }
 0xe65   : > { %v2253_v52 = vadd.f32 %v2252_v0, %v2251_v7  ;;  %v1978_v21 = vmul.f32 %v4810_v14, %v1976_v9 }
 0xe66   : > { %v4912_v32 = vadd.f32 %v2079_v27, %v2029_v51  ;;  %v4914_v39 = vadd.f32 %v2080_v17, %v2030_v61  ;;  %v2192_v46 = vmul.f32 %v4831_v15, %v4907_v4  ;;  %v2081_v58 = vmul.f32 %v2073_v60, %v4722_v23 }
 0xe67   : > { %v2254_v57 = vrot.slane %v2253_v52, 1  ;;  %v4934_v61 = vadd.f32 %v1986_v13, %v1978_v21 }
 0xe68   : > { %v2193_v8 = vmul.f32 %v4859_v59, %v4912_v32  ;;  %v2194_v22 = vmul.f32 %v4857_v29, %v4914_v39  ;;  %v2196_v48 = vsel %vm949_vm9, %v2192_v46, 0.0  ;;  %v4924_v62 = vadd.f32 %v2081_v58, %v2031_v11 }
 0xe69   : > { %v2197_v24 = vrot.slane %v2196_v48, 4  ;;  %v2255_v53 = vadd.f32 %v2254_v57, %v2253_v52  ;;  %3946 = vtanh.f32 %v4934_v61 }
 0xe6a   : > { %v2195_v16 = vmul.f32 %v4879_v63, %v4924_v62  ;;  %v2203_v23 = vsel %vm949_vm9, %v2193_v8, 0.0  ;;  %v2210_v42 = vsel %vm949_vm9, %v2194_v22, 0.0 }
 0xe6b   : > { %v2198_v47 = vadd.f32 %v2197_v24, %v2196_v48  ;;  %v2204_v36 = vrot.slane %v2203_v23, 4  ;;  %v2211_v55 = vrot.slane %v2210_v42, 4  ;;  %v2281_v7 = vsel %vm626_vm5, %v2255_v53, %v2280_v25 }
 0xe6c   : > { %v2217_v19 = vsel %vm949_vm9, %v2195_v16, 0.0 }
 0xe6d   : > { %v2218_v45 = vrot.slane %v2217_v19, 4  ;;  %v2199_v6 = vrot.slane %v2198_v47, 2  ;;  %v2205_v43 = vadd.f32 %v2204_v36, %v2203_v23  ;;  %v2212_v51 = vadd.f32 %v2211_v55, %v2210_v42 }
 0xe6f   : > { %v2200_v0 = vadd.f32 %v2199_v6, %v2198_v47  ;;  %v2206_v60 = vrot.slane %v2205_v43, 2  ;;  %v2213_v27 = vrot.slane %v2212_v51, 2  ;;  %v2219_v17 = vadd.f32 %v2218_v45, %v2217_v19 }
 0xe71   : > { %v2201_v11 = vrot.slane %v2200_v0, 1  ;;  %v2207_v52 = vadd.f32 %v2206_v60, %v2205_v43  ;;  %v2214_v46 = vadd.f32 %v2213_v27, %v2212_v51  ;;  %v2220_v58 = vrot.slane %v2219_v17, 2  ;;  %v3708_v43 = vld [vmem:[%s4216_s23 + $0x10] sm:$0xf] }
 0xe73   : > { %v2208_v25 = vrot.slane %v2207_v52, 1  ;;  %v2215_v57 = vrot.slane %v2214_v46, 1  ;;  %v2221_v8 = vadd.f32 %v2220_v58, %v2219_v17  ;;  %v2202_v22 = vadd.f32 %v2201_v11, %v2200_v0  ;;  %v3947_v13 = vpop.eup %3946 }
 0xe75   : > { %v2209_v48 = vadd.f32 %v2208_v25, %v2207_v52  ;;  %v2216_v24 = vadd.f32 %v2215_v57, %v2214_v46  ;;  %v2222_v53 = vrot.slane %v2221_v8, 1 }
 0xe77   : > { %v2223_v9 = vadd.f32 %v2222_v53, %v2221_v8  ;;  %v2260_v16 = vsel %vm622_vm3, %v2209_v48, %v2202_v22  ;;  %v2151_v53 = vld [vmem:[#allocation2 + $0x28] sm:$0xf] }
 0xe78   : > { %v2261_v23 = vsel %vm624_vm4, %v2216_v24, %v2260_v16 }
 0xe79   : > { %v2262_v42 = vsel %vm626_vm5, %v2223_v9, %v2261_v23  ;;  %v4967_v23 = vld [vmem:[%s4085_s29 + $0x14] sm:$0xf] }
 0xe7a   : > { %2263 = vrot.lane.b32.xlu1 %v2262_v42, %s4021_s13 }
 0xe7e   : > { %1991 = vrot.lane.b32.xlu1 %v3947_v13, %s4015_s20 }
 0xe9a   : > { %v2162_v47 = vpop.xlane.xlu1 %2161 }
 0xe9b   : > { %v2163_v36 = vsub.f32 %v2158_v20, %v2162_v47 }
 0xe9d   : > { %v2268_v55 = vmul.f32 %v4601_v50, %v2163_v36  ;;  %v2592_v36 = vrot.slane %v4967_v23, %v4107_v12 }
 0xe9f   : > { %2270 = vrot.lane.b32.xlu0 %v2268_v55, %s4015_s20 }
 0xeec   : > { %v2264_v21 = vpop.permute.xlu1 %2263 }
 0xeed   : > { %v2266_v6 = vmul.f32 %v2264_v21, %v2162_v47 }
 0xeef   : > { %v2267_v51 = vadd.f32 %v3708_v43, %v2266_v6 }
 0xef0   : > { %v1992_v19 = vpop.permute.xlu1 %1991 }
 0xef1   : > { %v4945_v45 = vmul.f32 %v4810_v14, %v1992_v19 }
 0xef3   : > { %2290 = vrot.lane.b32.xlu0 %v4945_v45, %s4016_s27 }
 0xf11   : > { %v2271_v0 = vpop.permute.xlu0 %2270 }
 0xf12   : > { %v2273_v60 = vadd.f32 %v2271_v0, %v2267_v51  ;;  %v2274_v27 = vadd.f32 %v2271_v0, %v2266_v6 }
 0xf14   : > { %v2294_v17 = vrot.slane %v2273_v60, 4  ;;  %v2299_v20 = vrot.slane %v2274_v27, 4 }
 0xf16   : > { %2300 = vrot.lane.b32.xlu0 %v2299_v20, %s4017_s28  ;;  %2295 = vrot.lane.b32.xlu1 %v2294_v17, %s4016_s27 }
 0xf1a   : > { %2286 = vrot.lane.b32.xlu0 %v2268_v55, %s4017_s28  ;;  %2282 = vrot.lane.b32.xlu1 %v2281_v7, %s4022_s25  ;;  %v2150_v7 = vld [vmem:[#allocation2 + $0x20] sm:$0xf]  ;;  %v2567_v55 = vsel %vm548_vm0, %v4967_v23, 0.0 }
 0xf65   : > { %v2291_v50 = vpop.permute.xlu0 %2290 }
 0xf88   : > { %v2296_v14 = vpop.permute.xlu1 %2295  ;;  %v2301_v11 = vpop.permute.xlu0 %2300 }
 0xf89   : > { %v2303_v52 = vsel %vm650_vm6, %v2291_v50, %v2296_v14 }
 0xf8a   : > { %v2304_v46 = vsel %vm652_vm7, %v2303_v52, %v2301_v11  ;;  %v2585_v52 = vrot.slane %v4967_v23, %v4088_v3 }
 0xf8b   : > { %v2306_v58 = vrot.slane %v2304_v46, 4 }
 0xf8c   : > { %v2283_v25 = vpop.permute.xlu1 %2282  ;;  %v2287_v8 = vpop.permute.xlu0 %2286 }
 0xf8d   : > { %v2285_v57 = vmul.f32 %v2283_v25, %v2162_v47  ;;  %3710 = vmatmul.mubr.msk.f32.vlgmr.msra.gmra.mrb[4].mxu1 %vm513_vm8, %v2306_v58  ;;  %v2578_v47 = vrot.slane %v4967_v23, %v4079_v2 }
 0xf8e   : > { %3838 = vmatpush1.bf16.msra.mxu1 %v4144_v28  ;;  %3199 = vmatprep.mubr.f32.mxu1 %v5382_v49 }
 0xf8f   : > { %v2289_v22 = vadd.f32 %v2287_v8, %v2285_v57  ;;  %3840 = vmatprep.subr.bf16.mxu1 %v4159_v35  ;;  %v2390_v57 = vrot.slane %v4934_v61, 4  ;;  %v2439_v61 = vsub.f32 1.0, %v4857_v29 }
 0xf91   : > { %2417 = vrot.lane.b32.xlu0 %v2289_v22, %s4018_s11 }
 0xf92   : > { %3842 = vmatpush1.bf16.msra.mxu1 %v4165_v40 }
 0xf93   : > { %3844 = vmatprep.subr.bf16.mxu1 %v4167_v41 }
 0xf96   : > { %3846 = vmatpush1.bf16.msra.mxu1 %v4175_v44 }
 0xf97   : > { %3848 = vmatprep.subr.bf16.mxu1 %v4201_v33 }
 0xf9a   : > { %3850 = vmatpush1.bf16.msra.mxu1 %v4205_v37 }
0x1003   : > { %v2418_v60 = vpop.permute.xlu0 %2417 }
0x1060   : > { %v2375_v48 = vpop.f32.mrb[4].mxu1 }
0x1061   : > { %v2380_v24 = vadd.f32 %v2375_v48, %v2150_v7  ;;  %v2377_v9 = vpop.f32.mrb[5].mxu1 }
0x1062   : > { %v2381_v16 = vadd.f32 %v2377_v9, %v2151_v53 }
0x1063   : > { %3948 = vtanh.f32 %v2380_v24  ;;  %v3711_v21 = vmul.f32 -1.442695, %v2380_v24 }
0x1064   : > { %3950 = vtanh.f32 %v2381_v16  ;;  %v3712_v19 = vmul.f32 -1.442695, %v2381_v16  ;;  %v2437_v16 = vsub.f32 1.0, %v4831_v15 }
0x1065   : > { %3952 = vpow2.f32 %v3711_v21 }
0x1066   : > { %3954 = vpow2.f32 %v3712_v19  ;;  %v2498_v19 = vmul.f32 %v2437_v16, %v4844_v54 }
0x106d   : > { %v3949_v42 = vpop.eup %3948 }
0x106e   : > { %v3951_v13 = vpop.eup %3950  ;;  %2394 = vrot.lane.b32.xlu0 %v3949_v42, %s4015_s20 }
0x106f   : > { %2422 = vrot.lane.b32.xlu1 %v3951_v13, %s4019_s12  ;;  %v3953_v6 = vpop.eup %3952 }
0x1070   : > { %v3955_v43 = vpop.eup %3954  ;;  %v2385_v51 = vadd.f32 1.0, %v3953_v6 }
0x1071   : > { %v2412_v0 = vadd.f32 1.0, %v3955_v43 }
0x1072   : > { %2580 = vbcast.lane.b32.xlu0 %v2578_v47, 256  ;;  %3956 = vrcp.f32 %v2385_v51  ;;  %v2438_v47 = vsub.f32 1.0, %v4859_v59 }
0x1073   : > { %3958 = vrcp.f32 %v2412_v0 }
0x1076   : > { %2594 = vbcast.lane.b32.xlu0 %v2592_v36, 256 }
0x107c   : > { %v4977_v27 = vpop.eup %3956 }
0x107d   : > { %v4979_v20 = vpop.eup %3958  ;;  %v2392_v8 = vmul.f32 %v4977_v27, %v2390_v57 }
0x107e   : > { %v2420_v7 = vmul.f32 %v4979_v20, %v2418_v60  ;;  %v2499_v60 = vmul.f32 %v2438_v47, %v4854_v1 }
0x1095   : > { %2568 = vadd.xlane.f32.xlu0 %v2567_v55 }
0x10e0   : > { %v2395_v17 = vpop.permute.xlu0 %2394 }
0x10e1   : > { %v2397_v50 = vmul.f32 %v4977_v27, %v2395_v17  ;;  %v2423_v14 = vpop.permute.xlu1 %2422  ;;  %v2500_v17 = vmul.f32 %v2439_v61, %v4850_v56 }
0x10e2   : > { %v2425_v11 = vmul.f32 %v4979_v20, %v2423_v14 }
0x10e3   : > { %2399 = vrot.lane.b32.xlu0 %v2397_v50, %s4016_s27 }
0x10e4   : > { %2427 = vrot.lane.b32.xlu1 %v2425_v11, %s4018_s11  ;;  %v4987_v46 = vpop.permute.xlu0 %2580 }
0x10e8   : > { %2587 = vbcast.lane.b32.xlu1 %v2585_v52, 256  ;;  %v4989_v58 = vpop.permute.xlu0 %2594 }
0x1122   : > { %v4991_v25 = vpop.xlane.xlu0 %2568 }
0x1155   : > { %v2400_v22 = vpop.permute.xlu0 %2399 }
0x1156   : > { %v4996_v48 = vadd.f32 %v2400_v22, %v2392_v8  ;;  %v2428_v24 = vpop.permute.xlu1 %2427 }
0x1157   : > { %v2430_v53 = vadd.f32 %v2428_v24, %v2420_v7  ;;  %v2599_v7 = vrot.slane %v4967_v23, %v4102_v10 }
0x1158   : > { %3960 = vtanh.f32 %v4996_v48 }
0x1159   : > { %3962 = vtanh.f32 %v2430_v53  ;;  %v2509_v9 = vrot.slane %v2430_v53, %v4288_v5 }
0x115a   : > { %v5030_v56 = vpop.permute.xlu1 %2587 }
0x115b   : > { %v2510_v42 = vcombine.high %v2509_v9, %v2509_v9  ;;  %v2517_v13 = vrot.slane %v2509_v9, %v4288_v5 }
0x115d   : > { %v2524_v36 = vrot.slane %v2510_v42, %v4288_v5  ;;  %v2525_v55 = vcombine.high %v2517_v13, %v2517_v13  ;;  %v2530_v21 = vrot.slane %v2517_v13, %v4079_v2 }
0x115f   : > { %v2526_v6 = vcombine.high %v2524_v36, %v2524_v36  ;;  %v2534_v43 = vrot.slane %v2524_v36, %v4079_v2  ;;  %v2538_v51 = vrot.slane %v2525_v55, %v4079_v2  ;;  %v2547_v0 = vmul.f32 %v2530_v21, %v4831_v15 }
0x1161   : > { %v2542_v50 = vrot.slane %v2526_v6, %v4079_v2  ;;  %v2548_v14 = vmul.f32 %v2534_v43, %v4859_v59  ;;  %v2549_v54 = vmul.f32 %v2538_v51, %v4857_v29  ;;  %v5021_v11 = vadd.f32 %v2547_v0, %v2498_v19 }
0x1162   : > { %v3961_v52 = vpop.eup %3960 }
0x1163   : > { %v3963_v57 = vpop.eup %3962  ;;  %v5023_v8 = vadd.f32 %v2549_v54, %v2500_v17  ;;  %v2635_v22 = vmul.f32 %v4987_v46, %v5021_v11  ;;  %v5027_v1 = vadd.f32 %v2548_v14, %v2499_v60  ;;  %2405 = vrot.lane.b32.xlu0 %v3961_v52, %s4015_s20  ;;  %v2550_v24 = vmul.f32 %v2542_v50, %v4879_v63 }
0x1164   : > { %2433 = vrot.lane.b32.xlu1 %v3963_v57, %s4016_s27 }
0x1165   : > { %v2637_v53 = vmul.f32 %v4989_v58, %v5023_v8  ;;  %v2639_v9 = vsel %vm982_vm11, %v2635_v22, 0.0  ;;  %v2636_v42 = vmul.f32 %v5030_v56, %v5027_v1  ;;  %v2554_v36 = vadd.f32 %v2550_v24, %v4888_v30 }
0x1166   : > { %v2640_v13 = vrot.slane %v2639_v9, 4 }
0x1167   : > { %v2646_v55 = vsel %vm982_vm11, %v2636_v42, 0.0  ;;  %v2653_v21 = vsel %vm982_vm11, %v2637_v53, 0.0 }
0x1168   : > { %v2641_v19 = vadd.f32 %v2640_v13, %v2639_v9  ;;  %v2647_v6 = vrot.slane %v2646_v55, 4  ;;  %2601 = vbcast.lane.b32.xlu1 %v2599_v7, 256  ;;  %v2654_v43 = vrot.slane %v2653_v21, 4  ;;  %v5048_v7 = vmax.f32 %v4873_v31, %v4800_v26 }
0x116a   : > { %v2648_v51 = vadd.f32 %v2647_v6, %v2646_v55  ;;  %v2642_v0 = vrot.slane %v2641_v19, 2  ;;  %v2655_v60 = vadd.f32 %v2654_v43, %v2653_v21  ;;  %v2570_v13 = vmul.f32 %v4967_v23, %v5048_v7 }
0x116c   : > { %v2649_v17 = vrot.slane %v2648_v51, 2  ;;  %v2643_v50 = vadd.f32 %v2642_v0, %v2641_v19  ;;  %v2656_v14 = vrot.slane %v2655_v60, 2  ;;  %v2571_v55 = vsel %vm548_vm0, %v2570_v13, 0.0 }
0x116e   : > { %v2650_v54 = vadd.f32 %v2649_v17, %v2648_v51  ;;  %v2644_v52 = vrot.slane %v2643_v50, 1  ;;  %v2657_v57 = vadd.f32 %v2656_v14, %v2655_v60  ;;  %v2441_v14 = vmul.f32 %v2437_v16, %v4907_v4 }
0x116f   : > { %v2443_v4 = vmul.f32 %v2439_v61, %v4914_v39  ;;  %v5383_v39 = vsub.f32 1.0, %v4879_v63 }
0x1170   : > { %v2651_v22 = vrot.slane %v2650_v54, 1  ;;  %v2658_v18 = vrot.slane %v2657_v57, 1  ;;  %v2645_v30 = vadd.f32 %v2644_v52, %v2643_v50 }
0x1171   : > { %v2444_v61 = vmul.f32 %v5383_v39, %v4924_v62 }
0x1172   : > { %v2652_v24 = vadd.f32 %v2651_v22, %v2650_v54  ;;  %v2659_v42 = vadd.f32 %v2658_v18, %v2657_v57 }
0x1174   : > { %v2690_v53 = vsel %vm622_vm3, %v2652_v24, %v2645_v30 }
0x1175   : > { %v2691_v9 = vsel %vm624_vm4, %v2659_v42, %v2690_v53  ;;  %v2442_v42 = vmul.f32 %v2438_v47, %v4912_v32 }
0x118c   : > { %2572 = vadd.xlane.f32.xlu1 %v2571_v55 }
0x11d5   : > { %v2406_v21 = vpop.permute.xlu0 %2405 }
0x11d6   : > { %v2408_v19 = vmul.f32 %v4977_v27, %v2406_v21  ;;  %v2434_v6 = vpop.permute.xlu1 %2433 }
0x11d7   : > { %v2436_v18 = vmul.f32 %v4979_v20, %v2434_v6 }
0x11d8   : > { %2557 = vrot.lane.b32.xlu0 %v2408_v19, %s4016_s27 }
0x11d9   : > { %v2452_v43 = vrot.slane %v2436_v18, %v4288_v5 }
0x11da   : > { %v5057_v51 = vpop.permute.xlu1 %2601 }
0x11db   : > { %v2453_v26 = vcombine.high %v2452_v43, %v2452_v43  ;;  %v2460_v31 = vrot.slane %v2452_v43, %v4288_v5  ;;  %v2638_v0 = vmul.f32 %v5057_v51, %v2554_v36  ;;  %v2852_v60 = vsub.f32 1.0, %v5057_v51 }
0x11dd   : > { %v2467_v17 = vrot.slane %v2453_v26, %v4288_v5  ;;  %v2468_v50 = vcombine.high %v2460_v31, %v2460_v31  ;;  %v2473_v27 = vrot.slane %v2460_v31, %v4079_v2  ;;  %v2660_v20 = vsel %vm982_vm11, %v2638_v0, 0.0 }
0x11de   : > { %v2661_v54 = vrot.slane %v2660_v20, 4  ;;  %v5070_v52 = vmul.f32 %v2852_v60, %v2554_v36 }
0x11df   : > { %v2469_v57 = vcombine.high %v2467_v17, %v2467_v17  ;;  %v2477_v22 = vrot.slane %v2467_v17, %v4079_v2  ;;  %v2481_v30 = vrot.slane %v2468_v50, %v4079_v2  ;;  %v2490_v24 = vmul.f32 %v2473_v27, %v4831_v15 }
0x11e0   : > { %v2662_v16 = vadd.f32 %v2661_v54, %v2660_v20 }
0x11e1   : > { %v2485_v53 = vrot.slane %v2469_v57, %v4079_v2  ;;  %v2491_v36 = vmul.f32 %v2477_v22, %v4859_v59  ;;  %v2492_v13 = vmul.f32 %v2481_v30, %v4857_v29  ;;  %v5084_v55 = vadd.f32 %v2490_v24, %v2441_v14 }
0x11e2   : > { %v2663_v21 = vrot.slane %v2662_v16, 2 }
0x11e3   : > { %v5086_v19 = vadd.f32 %v2491_v36, %v2442_v42  ;;  %v5088_v15 = vadd.f32 %v2492_v13, %v2443_v4  ;;  %v2603_v32 = vmul.f32 %v4987_v46, %v5084_v55  ;;  %v2493_v47 = vmul.f32 %v2485_v53, %v4879_v63 }
0x11e4   : > { %v2664_v6 = vadd.f32 %v2663_v21, %v2662_v16 }
0x11e5   : > { %v2604_v29 = vmul.f32 %v5030_v56, %v5086_v19  ;;  %v2605_v59 = vmul.f32 %v4989_v58, %v5088_v15  ;;  %v2607_v18 = vsel %vm949_vm9, %v2603_v32, 0.0  ;;  %v5101_v26 = vadd.f32 %v2493_v47, %v2444_v61 }
0x11e6   : > { %v2608_v43 = vrot.slane %v2607_v18, 4  ;;  %v2665_v31 = vrot.slane %v2664_v6, 1 }
0x11e7   : > { %v2614_v0 = vsel %vm949_vm9, %v2604_v29, 0.0  ;;  %v2621_v17 = vsel %vm949_vm9, %v2605_v59, 0.0  ;;  %v2606_v63 = vmul.f32 %v5057_v51, %v5101_v26 }
0x11e8   : > { %v2609_v62 = vadd.f32 %v2608_v43, %v2607_v18  ;;  %v2615_v50 = vrot.slane %v2614_v0, 4  ;;  %v2622_v27 = vrot.slane %v2621_v17, 4  ;;  %v2666_v20 = vadd.f32 %v2665_v31, %v2664_v6 }
0x11e9   : > { %v2628_v14 = vsel %vm949_vm9, %v2606_v63, 0.0 }
0x11ea   : > { %v2610_v54 = vrot.slane %v2609_v62, 2  ;;  %v2616_v57 = vadd.f32 %v2615_v50, %v2614_v0  ;;  %v2623_v22 = vadd.f32 %v2622_v27, %v2621_v17  ;;  %v2629_v30 = vrot.slane %v2628_v14, 4  ;;  %v5115_v50 = vld [vmem:[%s4116_s10] ss:$0 sm:$0xff] }
0x11eb   : > { %v2692_v24 = vsel %vm626_vm5, %v2666_v20, %v2691_v9 }
0x11ec   : > { %v2611_v42 = vadd.f32 %v2610_v54, %v2609_v62  ;;  %v2617_v4 = vrot.slane %v2616_v57, 2  ;;  %v2624_v16 = vrot.slane %v2623_v22, 2  ;;  %v2630_v53 = vadd.f32 %v2629_v30, %v2628_v14  ;;  %v3713_v54 = vld [vmem:[%s4216_s23 + $0x14] sm:$0xf] }
0x11ee   : > { %v2612_v36 = vrot.slane %v2611_v42, 1  ;;  %v2618_v13 = vadd.f32 %v2617_v4, %v2616_v57  ;;  %v2625_v21 = vadd.f32 %v2624_v16, %v2623_v22  ;;  %v2631_v32 = vrot.slane %v2630_v53, 2 }
0x11f0   : > { %v2619_v39 = vrot.slane %v2618_v13, 1  ;;  %v2626_v61 = vrot.slane %v2625_v21, 1  ;;  %v2632_v47 = vadd.f32 %v2631_v32, %v2630_v53  ;;  %v2613_v6 = vadd.f32 %v2612_v36, %v2611_v42 }
0x11f2   : > { %v2620_v29 = vadd.f32 %v2619_v39, %v2618_v13  ;;  %v2627_v59 = vadd.f32 %v2626_v61, %v2625_v21  ;;  %v2633_v18 = vrot.slane %v2632_v47, 1 }
0x11f4   : > { %v2671_v9 = vsel %vm622_vm3, %v2620_v29, %v2613_v6  ;;  %v2634_v43 = vadd.f32 %v2633_v18, %v2632_v47  ;;  %v2562_v6 = vld [vmem:[#allocation2 + $0x28] sm:$0xf0]  ;;  %v5139_v29 = vld [vmem:[%s4085_s29 + $0x18] sm:$0xf] }
0x11f5   : > { %v2672_v31 = vsel %vm624_vm4, %v2627_v59, %v2671_v9 }
0x11f6   : > { %v2673_v0 = vsel %vm626_vm5, %v2634_v43, %v2672_v31 }
0x11f7   : > { %2674 = vrot.lane.b32.xlu1 %v2673_v0, %s4021_s13 }
0x1219   : > { %v2573_v17 = vpop.xlane.xlu1 %2572 }
0x121a   : > { %v2574_v62 = vsub.f32 %v4991_v25, %v2573_v17 }
0x121c   : > { %v2679_v63 = vmul.f32 %v5115_v50, %v2574_v62 }
0x121e   : > { %2681 = vrot.lane.b32.xlu1 %v2679_v63, %s4015_s20 }
0x124a   : > { %v2558_v27 = vpop.permute.xlu0 %2557 }
0x124b   : > { %2560 = vst.msk [vmem:[%s4385_s17 + $0x4] sm:$0xf] %vm901_vm10, %v2558_v27 }
0x1269   : > { %v2675_v20 = vpop.permute.xlu1 %2674 }
0x126a   : > { %v2677_v14 = vmul.f32 %v2675_v20, %v2573_v17 }
0x126c   : > { %v2678_v57 = vadd.f32 %v3713_v54, %v2677_v14 }
0x1290   : > { %v2682_v22 = vpop.permute.xlu1 %2681 }
0x1291   : > { %v2684_v30 = vadd.f32 %v2682_v22, %v2678_v57  ;;  %v2685_v42 = vadd.f32 %v2682_v22, %v2677_v14  ;;  %v3000_v22 = vrot.slane %v5139_v29, %v4088_v3 }
0x1293   : > { %2702 = vrot.lane.b32.xlu1 %v2684_v30, %s4016_s27  ;;  %2706 = vrot.lane.b32.xlu0 %v2685_v42, %s4017_s28 }
0x1297   : > { %2693 = vrot.lane.b32.xlu1 %v2692_v24, %s4022_s25  ;;  %2697 = vrot.lane.b32.xlu0 %v2679_v63, %s4017_s28 }
0x1305   : > { %v2703_v25 = vpop.permute.xlu1 %2702  ;;  %v2707_v4 = vpop.permute.xlu0 %2706 }
0x1306   : > { %v2709_v16 = vsel %vm650_vm6, %v2558_v27, %v2703_v25 }
0x1307   : > { %v2710_v53 = vsel %vm652_vm7, %v2709_v16, %v2707_v4 }
0x1308   : > { %3715 = vmatmul.mubr.msk.f32.vlgmr.msra.gmra.mrb[12].mxu0 %vm513_vm8, %v2710_v53  ;;  %v2849_v53 = vsub.f32 1.0, %v4987_v46 }
0x1309   : > { %v2694_v36 = vpop.permute.xlu1 %2693  ;;  %3854 = vmatpush1.bf16.msra.mxu0 %v4144_v28  ;;  %3502 = vmatprep.mubr.f32.mxu0 %v5382_v49  ;;  %v2698_v21 = vpop.permute.xlu0 %2697 }
0x130a   : > { %v2696_v13 = vmul.f32 %v2694_v36, %v2573_v17  ;;  %3856 = vmatprep.subr.bf16.mxu0 %v4159_v35  ;;  %v2561_v35 = vld [vmem:[#allocation2 + $0x20] sm:$0xf0] }
0x130c   : > { %v2700_v24 = vadd.f32 %v2698_v21, %v2696_v13  ;;  %v2851_v21 = vsub.f32 1.0, %v4989_v58 }
0x130d   : > { %3858 = vmatpush1.bf16.msra.mxu0 %v4165_v40 }
0x130e   : > { %v2828_v32 = vrot.slane %v2700_v24, 4  ;;  %3860 = vmatprep.subr.bf16.mxu0 %v4167_v41  ;;  %v2850_v24 = vsub.f32 1.0, %v5030_v56 }
0x1310   : > { %2829 = vrot.lane.b32.xlu0 %v2828_v32, %s4018_s11 }
0x1311   : > { %3862 = vmatpush1.bf16.msra.mxu0 %v4175_v44  ;;  %v2993_v44 = vrot.slane %v5139_v29, %v4079_v2 }
0x1312   : > { %3864 = vmatprep.subr.bf16.mxu0 %v4201_v33  ;;  %v3007_v33 = vrot.slane %v5139_v29, %v4107_v12 }
0x1315   : > { %3866 = vmatpush1.bf16.msra.mxu0 %v4205_v37  ;;  %v2982_v37 = vsel %vm548_vm0, %v5139_v29, 0.0 }
0x1382   : > { %v2830_v62 = vpop.permute.xlu0 %2829 }
0x13db   : > { %v2780_v28 = vpop.f32.mrb[12].mxu0 }
0x13dc   : > { %v2787_v49 = vrot.slane %v2780_v28, 4  ;;  %v2782_v39 = vpop.f32.mrb[13].mxu0 }
0x13dd   : > { %v2788_v61 = vrot.slane %v2782_v39, 4  ;;  %v2911_v39 = vmul.f32 %v2849_v53, %v5021_v11 }
0x13de   : > { %v2791_v47 = vadd.f32 %v2787_v49, %v2561_v35 }
0x13df   : > { %v2792_v40 = vadd.f32 %v2788_v61, %v2562_v6 }
0x13e0   : > { %3964 = vtanh.f32 %v2791_v47  ;;  %v3716_v18 = vmul.f32 -1.442695, %v2791_v47 }
0x13e1   : > { %3966 = vtanh.f32 %v2792_v40  ;;  %v3717_v9 = vmul.f32 -1.442695, %v2792_v40 }
0x13e2   : > { %3968 = vpow2.f32 %v3716_v18 }
0x13e3   : > { %3970 = vpow2.f32 %v3717_v9 }
0x13ea   : > { %v3965_v41 = vpop.eup %3964 }
0x13eb   : > { %v3967_v59 = vpop.eup %3966  ;;  %2805 = vrot.lane.b32.xlu0 %v3965_v41, %s4015_s20  ;;  %v2913_v41 = vmul.f32 %v2851_v21, %v5023_v8 }
0x13ec   : > { %2834 = vrot.lane.b32.xlu1 %v3967_v59, %s4019_s12  ;;  %v3969_v43 = vpop.eup %3968  ;;  %v2912_v59 = vmul.f32 %v2850_v24, %v5027_v1 }
0x13ed   : > { %v3971_v31 = vpop.eup %3970  ;;  %v2796_v0 = vadd.f32 1.0, %v3969_v43  ;;  %v3014_v43 = vrot.slane %v5139_v29, %v4102_v10 }
0x13ee   : > { %v2823_v17 = vadd.f32 1.0, %v3971_v31 }
0x13ef   : > { %2995 = vbcast.lane.b32.xlu0 %v2993_v44, 256  ;;  %3972 = vrcp.f32 %v2796_v0 }
0x13f0   : > { %3974 = vrcp.f32 %v2823_v17 }
0x13f3   : > { %3009 = vbcast.lane.b32.xlu0 %v3007_v33, 256 }
0x13f9   : > { %v5149_v63 = vpop.eup %3972 }
0x13fa   : > { %v5151_v20 = vpop.eup %3974 }
0x13fb   : > { %v2832_v30 = vmul.f32 %v5151_v20, %v2830_v62 }
0x1412   : > { %2983 = vadd.xlane.f32.xlu0 %v2982_v37 }
0x145d   : > { %v2806_v27 = vpop.permute.xlu0 %2805 }
0x145e   : > { %v2808_v14 = vmul.f32 %v5149_v63, %v2806_v27  ;;  %v2835_v54 = vpop.permute.xlu1 %2834 }
0x145f   : > { %v2837_v57 = vmul.f32 %v5151_v20, %v2835_v54 }
0x1460   : > { %2810 = vrot.lane.b32.xlu0 %v2808_v14, %s4016_s27 }
0x1461   : > { %2839 = vrot.lane.b32.xlu1 %v2837_v57, %s4018_s11  ;;  %v5170_v35 = vpop.permute.xlu0 %2995 }
0x1465   : > { %3002 = vbcast.lane.b32.xlu1 %v3000_v22, 256  ;;  %v5191_v17 = vpop.permute.xlu0 %3009 }
0x14d3   : > { %v2840_v42 = vpop.permute.xlu1 %2839 }
0x14d4   : > { %v2842_v25 = vadd.f32 %v2840_v42, %v2832_v30 }
0x14d6   : > { %3976 = vtanh.f32 %v2842_v25  ;;  %v2916_v4 = vcombine.high %v2842_v25, %v2842_v25 }
0x14d7   : > { %v5185_v9 = vpop.permute.xlu1 %3002 }
0x14d8   : > { %v2923_v16 = vrot.slane %v2916_v4, %v4288_v5 }
0x14da   : > { %v2924_v36 = vcombine.high %v2923_v16, %v2923_v16  ;;  %v2931_v13 = vrot.slane %v2923_v16, %v4288_v5 }
0x14dc   : > { %v2938_v32 = vrot.slane %v2924_v36, %v4288_v5  ;;  %v2939_v28 = vcombine.high %v2931_v13, %v2931_v13  ;;  %v2944_v49 = vrot.slane %v2931_v13, %v4079_v2 }
0x14de   : > { %v2940_v61 = vcombine.high %v2938_v32, %v2938_v32  ;;  %v2948_v47 = vrot.slane %v2938_v32, %v4079_v2  ;;  %v2952_v6 = vrot.slane %v2939_v28, %v4079_v2  ;;  %v2961_v40 = vmul.f32 %v2944_v49, %v4987_v46 }
0x14e0   : > { %v3977_v44 = vpop.eup %3976  ;;  %v2963_v11 = vmul.f32 %v2952_v6, %v4989_v58  ;;  %v2965_v33 = vadd.f32 %v2961_v40, %v2911_v39  ;;  %v2962_v37 = vmul.f32 %v2948_v47, %v5030_v56  ;;  %v2956_v18 = vrot.slane %v2940_v61, %v4079_v2 }
0x14e1   : > { %2845 = vrot.lane.b32.xlu1 %v3977_v44, %s4016_s27 }
0x14e2   : > { %v2967_v8 = vadd.f32 %v2963_v11, %v2913_v41  ;;  %v3050_v31 = vmul.f32 %v5170_v35, %v2965_v33  ;;  %v2966_v0 = vadd.f32 %v2962_v37, %v2912_v59  ;;  %v2964_v1 = vmul.f32 %v2956_v18, %v5057_v51 }
0x14e3   : > { %v5203_v33 = vmax.f32 %v5048_v7, %v4967_v23 }
0x14e4   : > { %v3052_v62 = vmul.f32 %v5191_v17, %v2967_v8  ;;  %v3054_v27 = vsel %vm982_vm11, %v3050_v31, 0.0  ;;  %v3051_v14 = vmul.f32 %v5185_v9, %v2966_v0  ;;  %v2968_v54 = vadd.f32 %v2964_v1, %v5070_v52 }
0x14e5   : > { %v3055_v57 = vrot.slane %v3054_v27, 4  ;;  %3016 = vbcast.lane.b32.xlu1 %v3014_v43, 256  ;;  %v2985_v37 = vmul.f32 %v5139_v29, %v5203_v33 }
0x14e6   : > { %v3061_v22 = vsel %vm982_vm11, %v3051_v14, 0.0  ;;  %v3068_v30 = vsel %vm982_vm11, %v3052_v62, 0.0 }
0x14e7   : > { %v3062_v42 = vrot.slane %v3061_v22, 4  ;;  %v3056_v25 = vadd.f32 %v3055_v57, %v3054_v27  ;;  %v3069_v4 = vrot.slane %v3068_v30, 4  ;;  %v2986_v18 = vsel %vm548_vm0, %v2985_v37, 0.0 }
0x14e9   : > { %v3063_v16 = vadd.f32 %v3062_v42, %v3061_v22  ;;  %v3057_v36 = vrot.slane %v3056_v25, 2  ;;  %v3070_v13 = vadd.f32 %v3069_v4, %v3068_v30 }
0x14eb   : > { %v3064_v32 = vrot.slane %v3063_v16, 2  ;;  %v3058_v28 = vadd.f32 %v3057_v36, %v3056_v25  ;;  %v3071_v49 = vrot.slane %v3070_v13, 2  ;;  %v2854_v36 = vmul.f32 %v2850_v24, %v5086_v19 }
0x14ed   : > { %v3065_v39 = vadd.f32 %v3064_v32, %v3063_v16  ;;  %v3059_v61 = vrot.slane %v3058_v28, 1  ;;  %v3072_v47 = vadd.f32 %v3071_v49, %v3070_v13  ;;  %v2855_v13 = vmul.f32 %v2851_v21, %v5088_v15 }
0x14ef   : > { %v3066_v6 = vrot.slane %v3065_v39, 1  ;;  %v3073_v52 = vrot.slane %v3072_v47, 1  ;;  %v3060_v40 = vadd.f32 %v3059_v61, %v3058_v28 }
0x14f1   : > { %v3067_v41 = vadd.f32 %v3066_v6, %v3065_v39  ;;  %v3074_v59 = vadd.f32 %v3073_v52, %v3072_v47  ;;  %v2984_v39 = vpop.xlane.xlu0 %2983 }
0x14f3   : > { %v3105_v44 = vsel %vm622_vm3, %v3067_v41, %v3060_v40  ;;  %v2801_v40 = vrot.slane %v4996_v48, 4 }
0x14f4   : > { %v3106_v11 = vsel %vm624_vm4, %v3074_v59, %v3105_v44 }
0x14f5   : > { %v2811_v44 = vpop.permute.xlu0 %2810 }
0x1509   : > { %2987 = vadd.xlane.f32.xlu1 %v2986_v18 }
0x1553   : > { %v2846_v43 = vpop.permute.xlu1 %2845 }
0x1554   : > { %v2848_v8 = vmul.f32 %v5151_v20, %v2846_v43  ;;  %v2853_v20 = vmul.f32 %v2849_v53, %v5084_v55 }
0x1556   : > { %v2858_v31 = vcombine.high %v2848_v8, %v2848_v8 }
0x1557   : > { %v5209_v0 = vpop.permute.xlu1 %3016 }
0x1558   : > { %v2865_v1 = vrot.slane %v2858_v31, %v4288_v5  ;;  %v3053_v62 = vmul.f32 %v5209_v0, %v2968_v54  ;;  %v2803_v31 = vmul.f32 %v5149_v63, %v2801_v40  ;;  %v3718_v40 = vld [vmem:[%s4216_s23 + $0x18] sm:$0xf] }
0x155a   : > { %v2866_v27 = vcombine.high %v2865_v1, %v2865_v1  ;;  %v2873_v23 = vrot.slane %v2865_v1, %v4288_v5  ;;  %v3075_v7 = vsel %vm982_vm11, %v3053_v62, 0.0 }
0x155b   : > { %v3076_v14 = vrot.slane %v3075_v7, 4 }
0x155c   : > { %v2880_v57 = vrot.slane %v2866_v27, %v4288_v5  ;;  %v2881_v22 = vcombine.high %v2873_v23, %v2873_v23  ;;  %v2886_v30 = vrot.slane %v2873_v23, %v4079_v2 }
0x155d   : > { %v3077_v42 = vadd.f32 %v3076_v14, %v3075_v7  ;;  %v5259_v7 = vadd.f32 %v2811_v44, %v2803_v31 }
0x155e   : > { %v2882_v25 = vcombine.high %v2880_v57, %v2880_v57  ;;  %v2890_v4 = vrot.slane %v2880_v57, %v4079_v2  ;;  %v2894_v54 = vrot.slane %v2881_v22, %v4079_v2  ;;  %v2903_v16 = vmul.f32 %v2886_v30, %v4987_v46 }
0x155f   : > { %v3078_v32 = vrot.slane %v3077_v42, 2  ;;  %v2856_v46 = vmul.f32 %v2852_v60, %v5101_v26  ;;  %3978 = vtanh.f32 %v5259_v7 }
0x1560   : > { %v2898_v28 = vrot.slane %v2882_v25, %v4079_v2  ;;  %v2904_v55 = vmul.f32 %v2890_v4, %v5030_v56  ;;  %v2905_v53 = vmul.f32 %v2894_v54, %v4989_v58  ;;  %v5232_v49 = vadd.f32 %v2903_v16, %v2853_v20 }
0x1561   : > { %v3079_v61 = vadd.f32 %v3078_v32, %v3077_v42 }
0x1562   : > { %v5237_v19 = vadd.f32 %v2904_v55, %v2854_v36  ;;  %v5239_v24 = vadd.f32 %v2905_v53, %v2855_v13  ;;  %v3018_v15 = vmul.f32 %v5170_v35, %v5232_v49  ;;  %v2906_v21 = vmul.f32 %v2898_v28, %v5057_v51 }
0x1563   : > { %v3080_v56 = vrot.slane %v3079_v61, 1 }
0x1564   : > { %v3019_v58 = vmul.f32 %v5185_v9, %v5237_v19  ;;  %v3020_v47 = vmul.f32 %v5191_v17, %v5239_v24  ;;  %v3022_v6 = vsel %vm949_vm9, %v3018_v15, 0.0  ;;  %v5249_v60 = vadd.f32 %v2906_v21, %v2856_v46 }
0x1565   : > { %v3023_v26 = vrot.slane %v3022_v6, 4  ;;  %v3081_v52 = vadd.f32 %v3080_v56, %v3079_v61 }
0x1566   : > { %v3029_v41 = vsel %vm949_vm9, %v3019_v58, 0.0  ;;  %v3021_v51 = vmul.f32 %v5209_v0, %v5249_v60  ;;  %v3036_v59 = vsel %vm949_vm9, %v3020_v47, 0.0 }
0x1567   : > { %v3024_v37 = vadd.f32 %v3023_v26, %v3022_v6  ;;  %v3030_v18 = vrot.slane %v3029_v41, 4  ;;  %v3037_v43 = vrot.slane %v3036_v59, 4  ;;  %v3107_v8 = vsel %vm626_vm5, %v3081_v52, %v3106_v11 }
0x1568   : > { %v3043_v1 = vsel %vm949_vm9, %v3021_v51, 0.0 }
0x1569   : > { %v3044_v62 = vrot.slane %v3043_v1, 4  ;;  %v3025_v27 = vrot.slane %v3024_v37, 2  ;;  %v3031_v48 = vadd.f32 %v3030_v18, %v3029_v41  ;;  %v3038_v23 = vadd.f32 %v3037_v43, %v3036_v59  ;;  %v3979_v15 = vpop.eup %3978 }
0x156b   : > { %v3045_v14 = vadd.f32 %v3044_v62, %v3043_v1  ;;  %v3026_v57 = vadd.f32 %v3025_v27, %v3024_v37  ;;  %v3032_v22 = vrot.slane %v3031_v48, 2  ;;  %v3039_v30 = vrot.slane %v3038_v23, 2 }
0x156d   : > { %v3046_v20 = vrot.slane %v3045_v14, 2  ;;  %v3027_v42 = vrot.slane %v3026_v57, 1  ;;  %v3033_v25 = vadd.f32 %v3032_v22, %v3031_v48  ;;  %v3040_v4 = vadd.f32 %v3039_v30, %v3038_v23  ;;  %v2977_v30 = vld [vmem:[#allocation2 + $0x38] sm:$0xf] }
0x156f   : > { %v3034_v11 = vrot.slane %v3033_v25, 1  ;;  %v3041_v54 = vrot.slane %v3040_v4, 1  ;;  %v3047_v16 = vadd.f32 %v3046_v20, %v3045_v14  ;;  %v3028_v36 = vadd.f32 %v3027_v42, %v3026_v57  ;;  %v2976_v57 = vld [vmem:[#allocation2 + $0x30] sm:$0xf] }
0x1571   : > { %v3035_v13 = vadd.f32 %v3034_v11, %v3033_v25  ;;  %v3042_v32 = vadd.f32 %v3041_v54, %v3040_v4  ;;  %v3048_v28 = vrot.slane %v3047_v16, 1  ;;  %v3724_v25 = vld [vmem:[%s4085_s29 + $0x1c] sm:$0xf] }
0x1572   : > { %v3346_v54 = vrot.slane %v3724_v25, %v4079_v2 }
0x1573   : > { %v3049_v55 = vadd.f32 %v3048_v28, %v3047_v16  ;;  %v3086_v53 = vsel %vm622_vm3, %v3035_v13, %v3028_v36  ;;  %v3360_v16 = vrot.slane %v3724_v25, %v4107_v12  ;;  %v3335_v36 = vsel %vm548_vm0, %v3724_v25, 0.0 }
0x1574   : > { %v3087_v46 = vsel %vm624_vm4, %v3042_v32, %v3086_v53 }
0x1575   : > { %v3088_v61 = vsel %vm626_vm5, %v3049_v55, %v3087_v46 }
0x1576   : > { %3089 = vrot.lane.b32.xlu1 %v3088_v61, %s4021_s13 }
0x157a   : > { %2816 = vrot.lane.b32.xlu1 %v3979_v15, %s4015_s20 }
0x1596   : > { %v2988_v21 = vpop.xlane.xlu1 %2987 }
0x1597   : > { %v2989_v56 = vsub.f32 %v2984_v39, %v2988_v21 }
0x1599   : > { %v3094_v58 = vmul.f32 %v5115_v50, %v2989_v56 }
0x159b   : > { %3096 = vrot.lane.b32.xlu0 %v3094_v58, %s4015_s20 }
0x15e8   : > { %v3090_v47 = vpop.permute.xlu1 %3089 }
0x15e9   : > { %v3092_v52 = vmul.f32 %v3090_v47, %v2988_v21 }
0x15eb   : > { %v3093_v41 = vadd.f32 %v3718_v40, %v3092_v52 }
0x15ec   : > { %v2817_v6 = vpop.permute.xlu1 %2816 }
0x15ed   : > { %v5270_v26 = vmul.f32 %v5149_v63, %v2817_v6  ;;  %v3353_v6 = vrot.slane %v3724_v25, %v4088_v3  ;;  %v3367_v3 = vrot.slane %v3724_v25, %v4102_v10 }
0x15ef   : > { %3116 = vrot.lane.b32.xlu0 %v5270_v26, %s4016_s27 }
0x160d   : > { %v3097_v51 = vpop.permute.xlu0 %3096 }
0x160e   : > { %v3099_v59 = vadd.f32 %v3097_v51, %v3093_v41  ;;  %v3100_v44 = vadd.f32 %v3097_v51, %v3092_v52  ;;  %v3216_v51 = vrot.slane %v5259_v7, 4  ;;  %v3324_v7 = vmax.f32 %v5203_v33, %v5139_v29 }
0x160f   : > { %v3263_v29 = vsub.f32 1.0, %v5170_v35 }
0x1610   : > { %v3120_v37 = vrot.slane %v3099_v59, 4  ;;  %v3125_v39 = vrot.slane %v3100_v44, 4 }
0x1612   : > { %3126 = vrot.lane.b32.xlu0 %v3125_v39, %s4017_s28  ;;  %3121 = vrot.lane.b32.xlu1 %v3120_v37, %s4016_s27 }
0x1616   : > { %3112 = vrot.lane.b32.xlu0 %v3094_v58, %s4017_s28  ;;  %3108 = vrot.lane.b32.xlu1 %v3107_v8, %s4022_s25 }
0x1661   : > { %v3117_v63 = vpop.permute.xlu0 %3116 }
0x1684   : > { %v3122_v18 = vpop.permute.xlu1 %3121  ;;  %v3127_v43 = vpop.permute.xlu0 %3126 }
0x1685   : > { %v3129_v31 = vsel %vm650_vm6, %v3117_v63, %v3122_v18 }
0x1686   : > { %v3130_v1 = vsel %vm652_vm7, %v3129_v31, %v3127_v43 }
0x1687   : > { %v3132_v62 = vrot.slane %v3130_v1, 4  ;;  %v3338_v1 = vmul.f32 %v3724_v25, %v3324_v7  ;;  %v3264_v25 = vsub.f32 1.0, %v5185_v9 }
0x1688   : > { %v3109_v27 = vpop.permute.xlu1 %3108  ;;  %v3113_v23 = vpop.permute.xlu0 %3112 }
0x1689   : > { %v3111_v48 = vmul.f32 %v3109_v27, %v2988_v21  ;;  %3720 = vmatmul.mubr.msk.f32.vlgmr.msra.gmra.mrb[6].mxu1 %vm513_vm8, %v3132_v62  ;;  %v3339_v62 = vsel %vm548_vm0, %v3338_v1, 0.0 }
0x168b   : > { %v3115_v14 = vadd.f32 %v3113_v23, %v3111_v48 }
0x168d   : > { %3243 = vrot.lane.b32.xlu0 %v3115_v14, %s4018_s11 }
0x16ff   : > { %v3244_v61 = vpop.permute.xlu0 %3243 }
0x175c   : > { %v3201_v22 = vpop.f32.mrb[6].mxu1 }
0x175d   : > { %v3206_v8 = vadd.f32 %v3201_v22, %v2976_v57  ;;  %v3203_v20 = vpop.f32.mrb[7].mxu1 }
0x175e   : > { %v3207_v42 = vadd.f32 %v3203_v20, %v2977_v30 }
0x175f   : > { %3980 = vtanh.f32 %v3206_v8  ;;  %v3721_v13 = vmul.f32 -1.442695, %v3206_v8 }
0x1760   : > { %3982 = vtanh.f32 %v3207_v42  ;;  %v3722_v32 = vmul.f32 -1.442695, %v3207_v42  ;;  %v3265_v42 = vsub.f32 1.0, %v5191_v17 }
0x1761   : > { %3984 = vpow2.f32 %v3721_v13  ;;  %v3266_v13 = vsub.f32 1.0, %v5209_v0 }
0x1762   : > { %3986 = vpow2.f32 %v3722_v32  ;;  %v3269_v32 = vmul.f32 %v3265_v42, %v5239_v24 }
0x1769   : > { %v3981_v4 = vpop.eup %3980 }
0x176a   : > { %v3983_v11 = vpop.eup %3982  ;;  %3220 = vrot.lane.b32.xlu0 %v3981_v4, %s4015_s20  ;;  %v3267_v4 = vmul.f32 %v3263_v29, %v5232_v49 }
0x176b   : > { %3248 = vrot.lane.b32.xlu1 %v3983_v11, %s4019_s12  ;;  %v3985_v28 = vpop.eup %3984 }
0x176c   : > { %v3987_v55 = vpop.eup %3986  ;;  %v3211_v53 = vadd.f32 1.0, %v3985_v28 }
0x176d   : > { %v3238_v46 = vadd.f32 1.0, %v3987_v55 }
0x176e   : > { %3348 = vbcast.lane.b32.xlu0 %v3346_v54, 256  ;;  %3988 = vrcp.f32 %v3211_v53 }
0x176f   : > { %3990 = vrcp.f32 %v3238_v46  ;;  %v3270_v46 = vmul.f32 %v3266_v13, %v5249_v60 }
0x1772   : > { %3362 = vbcast.lane.b32.xlu0 %v3360_v16, 256 }
0x1778   : > { %v3989_v15 = vpop.eup %3988 }
0x1779   : > { %v3991_v56 = vpop.eup %3990  ;;  %v3218_v59 = vmul.f32 %v3989_v15, %v3216_v51 }
0x177a   : > { %v3246_v37 = vmul.f32 %v3991_v56, %v3244_v61 }
0x1791   : > { %3336 = vadd.xlane.f32.xlu0 %v3335_v36 }
0x17dc   : > { %v3221_v21 = vpop.permute.xlu0 %3220 }
0x17dd   : > { %v3223_v58 = vmul.f32 %v3989_v15, %v3221_v21  ;;  %v3249_v12 = vpop.permute.xlu1 %3248 }
0x17de   : > { %v3251_v47 = vmul.f32 %v3991_v56, %v3249_v12 }
0x17df   : > { %3225 = vrot.lane.b32.xlu0 %v3223_v58, %s4016_s27 }
0x17e0   : > { %3253 = vrot.lane.b32.xlu1 %v3251_v47, %s4018_s11  ;;  %v3349_v52 = vpop.permute.xlu0 %3348 }
0x17e4   : > { %3355 = vbcast.lane.b32.xlu1 %v3353_v6, 256  ;;  %v3363_v40 = vpop.permute.xlu0 %3362 }
0x181e   : > { %v5292_v41 = vpop.xlane.xlu0 %3336 }
0x1851   : > { %v3226_v44 = vpop.permute.xlu0 %3225 }
0x1852   : > { %v5295_v39 = vadd.f32 %v3226_v44, %v3218_v59  ;;  %v3254_v63 = vpop.permute.xlu1 %3253 }
0x1853   : > { %v3256_v18 = vadd.f32 %v3254_v63, %v3246_v37 }
0x1854   : > { %3992 = vtanh.f32 %v5295_v39 }
0x1855   : > { %3994 = vtanh.f32 %v3256_v18 }
0x1856   : > { %v3356_v27 = vpop.permute.xlu1 %3355 }
0x185e   : > { %v3993_v43 = vpop.eup %3992 }
0x185f   : > { %v3995_v31 = vpop.eup %3994  ;;  %3231 = vrot.lane.b32.xlu0 %v3993_v43, %s4015_s20 }
0x1860   : > { %3259 = vrot.lane.b32.xlu1 %v3995_v31, %s4016_s27 }
0x1864   : > { %3369 = vbcast.lane.b32.xlu1 %v3367_v3, 256 }
0x1888   : > { %3340 = vadd.xlane.f32.xlu1 %v3339_v62 }
0x18d1   : > { %v3232_v48 = vpop.permute.xlu0 %3231 }
0x18d2   : > { %v5304_v23 = vmul.f32 %v3989_v15, %v3232_v48  ;;  %v3260_v14 = vpop.permute.xlu1 %3259 }
0x18d3   : > { %v3262_v57 = vmul.f32 %v3991_v56, %v3260_v14 }
0x18d4   : > { %3422 = vrot.lane.b32.xlu0 %v5304_v23, %s4016_s27 }
0x18d5   : > { %v3278_v22 = vrot.slane %v3262_v57, %v4288_v5 }
0x18d6   : > { %v3370_v47 = vpop.permute.xlu1 %3369 }
0x18d7   : > { %v3279_v10 = vcombine.high %v3278_v22, %v3278_v22  ;;  %v3286_v8 = vrot.slane %v3278_v22, %v4288_v5 }
0x18d9   : > { %v3293_v33 = vrot.slane %v3279_v10, %v4288_v5  ;;  %v3294_v30 = vcombine.high %v3286_v8, %v3286_v8  ;;  %v3299_v20 = vrot.slane %v3286_v8, %v4079_v2  ;;  %v3268_v5 = vmul.f32 %v3264_v25, %v5237_v19 }
0x18db   : > { %v3303_v11 = vrot.slane %v3293_v33, %v4079_v2  ;;  %v3307_v54 = vrot.slane %v3294_v30, %v4079_v2  ;;  %v3316_v16 = vmul.f32 %v3299_v20, %v5170_v35  ;;  %v3295_v36 = vcombine.high %v3293_v33, %v3293_v33 }
0x18dd   : > { %v3317_v28 = vmul.f32 %v3303_v11, %v5185_v9  ;;  %v3318_v55 = vmul.f32 %v3307_v54, %v5191_v17  ;;  %v3320_v53 = vadd.f32 %v3316_v16, %v3267_v4  ;;  %v3311_v49 = vrot.slane %v3295_v36, %v4079_v2  ;;  %v3723_v54 = vld [vmem:[%s4216_s23 + $0x1c] sm:$0xf] }
0x18df   : > { %v3321_v61 = vadd.f32 %v3317_v28, %v3268_v5  ;;  %v3322_v15 = vadd.f32 %v3318_v55, %v3269_v32  ;;  %v3371_v21 = vmul.f32 %v3349_v52, %v3320_v53  ;;  %v3319_v35 = vmul.f32 %v3311_v49, %v5209_v0 }
0x18e1   : > { %v3372_v56 = vmul.f32 %v3356_v27, %v3321_v61  ;;  %v3373_v58 = vmul.f32 %v3363_v40, %v3322_v15  ;;  %v3375_v19 = vsel %vm949_vm9, %v3371_v21, 0.0  ;;  %v3323_v12 = vadd.f32 %v3319_v35, %v3270_v46  ;;  %v3330_v61 = vld [vmem:[#allocation2 + $0x30] sm:$0xf0] }
0x18e2   : > { %v3376_v24 = vrot.slane %v3375_v19, 4  ;;  %v2971_v35 = vcombine.high %v5270_v26, %v5270_v26  ;;  %v3520_v26 = vrot.slane %v5295_v39, 4 }
0x18e3   : > { %v3382_v9 = vsel %vm949_vm9, %v3372_v56, 0.0  ;;  %v3374_v17 = vmul.f32 %v3370_v47, %v3323_v12  ;;  %v3389_v6 = vsel %vm949_vm9, %v3373_v58, 0.0 }
0x18e4   : > { %v3377_v2 = vadd.f32 %v3376_v24, %v3375_v19  ;;  %v3383_v51 = vrot.slane %v3382_v9, 4  ;;  %v3390_v60 = vrot.slane %v3389_v6, 4 }
0x18e5   : > { %v3396_v59 = vsel %vm949_vm9, %v3374_v17, 0.0  ;;  %v1315_v17 = vcombine.high %v4606_v38, %v4606_v38  ;;  %v2146_v38 = vcombine.high %v4945_v45, %v4945_v45 }
0x18e6   : > { %v3397_v52 = vrot.slane %v3396_v59, 4  ;;  %v3378_v44 = vrot.slane %v3377_v2, 2  ;;  %v3384_v0 = vadd.f32 %v3383_v51, %v3382_v9  ;;  %v3391_v37 = vadd.f32 %v3390_v60, %v3389_v6 }
0x18e8   : > { %v3398_v40 = vadd.f32 %v3397_v52, %v3396_v59  ;;  %v3379_v63 = vadd.f32 %v3378_v44, %v3377_v2  ;;  %v3385_v18 = vrot.slane %v3384_v0, 2  ;;  %v3392_v43 = vrot.slane %v3391_v37, 2 }
0x18ea   : > { %v3399_v31 = vrot.slane %v3398_v40, 2  ;;  %v3380_v3 = vrot.slane %v3379_v63, 1  ;;  %v3386_v7 = vadd.f32 %v3385_v18, %v3384_v0  ;;  %v3393_v1 = vadd.f32 %v3392_v43, %v3391_v37 }
0x18ec   : > { %v3400_v62 = vadd.f32 %v3399_v31, %v3398_v40  ;;  %v3387_v27 = vrot.slane %v3386_v7, 1  ;;  %v3394_v48 = vrot.slane %v3393_v1, 1  ;;  %v3381_v57 = vadd.f32 %v3380_v3, %v3379_v63 }
0x18ee   : > { %v3401_v14 = vrot.slane %v3400_v62, 1  ;;  %v3388_v22 = vadd.f32 %v3387_v27, %v3386_v7  ;;  %v3395_v10 = vadd.f32 %v3394_v48, %v3393_v1 }
0x18f0   : > { %v3402_v8 = vadd.f32 %v3401_v14, %v3400_v62  ;;  %v3407_v29 = vsel %vm622_vm3, %v3388_v22, %v3381_v57 }
0x18f1   : > { %v3408_v33 = vsel %vm624_vm4, %v3395_v10, %v3407_v29 }
0x18f2   : > { %v3409_v30 = vsel %vm626_vm5, %v3402_v8, %v3408_v33 }
0x18f3   : > { %3410 = vrot.lane.b32.xlu1 %v3409_v30, %s4021_s13 }
0x1915   : > { %v3341_v20 = vpop.xlane.xlu1 %3340 }
0x1916   : > { %v3342_v42 = vsub.f32 %v5292_v41, %v3341_v20 }
0x1918   : > { %v3415_v25 = vmul.f32 %v5115_v50, %v3342_v42 }
0x191a   : > { %3417 = vrot.lane.b32.xlu1 %v3415_v25, %s4015_s20 }
0x1946   : > { %v3423_v32 = vpop.permute.xlu0 %3422 }
0x1965   : > { %v3411_v4 = vpop.permute.xlu1 %3410 }
0x1966   : > { %v3413_v11 = vmul.f32 %v3411_v4, %v3341_v20 }
0x1968   : > { %v3414_v16 = vadd.f32 %v3723_v54, %v3413_v11 }
0x198c   : > { %v3418_v36 = vpop.permute.xlu1 %3417 }
0x198d   : > { %v3420_v13 = vadd.f32 %v3418_v36, %v3414_v16  ;;  %v3421_v5 = vadd.f32 %v3418_v36, %v3413_v11 }
0x198f   : > { %3426 = vrot.lane.b32.xlu1 %v3420_v13, %s4016_s27  ;;  %3430 = vrot.lane.b32.xlu0 %v3421_v5, %s4017_s28 }
0x1a01   : > { %v3427_v28 = vpop.permute.xlu1 %3426  ;;  %v3431_v55 = vpop.permute.xlu0 %3430 }
0x1a02   : > { %v3433_v41 = vsel %vm650_vm6, %v3423_v32, %v3427_v28 }
0x1a03   : > { %v3434_v50 = vsel %vm652_vm7, %v3433_v41, %v3431_v55 }
0x1a04   : > { %3725 = vmatmul.mubr.msk.f32.vlgmr.msra.gmra.mrb[14].mxu0 %vm513_vm8, %v3434_v50 }
0x1ad7   : > { %v3504_v53 = vpop.f32.mrb[14].mxu0 }
0x1ad8   : > { %v3509_v49 = vrot.slane %v3504_v53, 4  ;;  %v3506_v46 = vpop.f32.mrb[15].mxu0 }
0x1ada   : > { %v3511_v15 = vadd.f32 %v3509_v49, %v3330_v61 }
0x1adc   : > { %3996 = vtanh.f32 %v3511_v15  ;;  %v3726_v56 = vmul.f32 -1.442695, %v3511_v15 }
0x1ade   : > { %3998 = vpow2.f32 %v3726_v56 }
0x1ae6   : > { %v3997_v21 = vpop.eup %3996 }
0x1ae7   : > { %3524 = vrot.lane.b32.xlu1 %v3997_v21, %s4015_s20 }
0x1ae8   : > { %v3999_v58 = vpop.eup %3998 }
0x1ae9   : > { %v3515_v19 = vadd.f32 1.0, %v3999_v58 }
0x1aeb   : > { %2972 = vrot.lane.b32.xlu1 %v2971_v35, %s4015_s20  ;;  %4000 = vrcp.f32 %v3515_v19 }
0x1af5   : > { %v4001_v12 = vpop.eup %4000 }
0x1af6   : > { %v3522_v6 = vmul.f32 %v4001_v12, %v3520_v26 }
0x1b59   : > { %v3525_v24 = vpop.permute.xlu1 %3524 }
0x1b5a   : > { %v3527_v47 = vmul.f32 %v4001_v12, %v3525_v24 }
0x1b5c   : > { %3529 = vrot.lane.b32.xlu0 %v3527_v47, %s4016_s27 }
0x1b5d   : > { %v2973_v9 = vpop.permute.xlu1 %2972 }
0x1b5e   : > { %2975 = vst.msk [vmem:[%s4385_s17 + $0x4] sm:$0xf] %vm1319_vm12, %v2973_v9 }
0x1b60   : > { %1316 = vrot.lane.b32.xlu0 %v1315_v17, %s4015_s20 }
0x1b64   : > { %1728 = vrot.lane.b32.xlu0 %v4716_v34, %s4019_s12 }
0x1bce   : > { %v3530_v2 = vpop.permute.xlu0 %3529 }
0x1bcf   : > { %v3532_v51 = vadd.f32 %v3530_v2, %v3522_v6 }
0x1bd1   : > { %4002 = vtanh.f32 %v3532_v51 }
0x1bd2   : > { %v1317_v60 = vpop.permute.xlu0 %1316 }
0x1bd3   : > { %1320 = vst.msk [vmem:[%s4385_s17] sm:$0xf] %vm1319_vm12, %v1317_v60 }
0x1bd6   : > { %v1729_v59 = vpop.permute.xlu0 %1728 }
0x1bd7   : > { %1732 = vst.msk [vmem:[%s4385_s17] sm:$0xf] %vm1731_vm13, %v1729_v59 }
0x1bd8   : > { %2149 = vst.msk [vmem:[%s4385_s17] sm:$0xf] %vm2148_vm14, %v2146_v38 }
0x1bdb   : > { %v4003_v52 = vpop.eup %4002 }
0x1bdc   : > { %3535 = vrot.lane.b32.xlu1 %v4003_v52, %s4015_s20 }
0x1be0   : > { %3326 = vrot.lane.b32.xlu1 %v5304_v23, %s4019_s12 }
0x1c4e   : > { %v3536_v34 = vpop.permute.xlu1 %3535 }
0x1c4f   : > { %v3538_v39 = vmul.f32 %v4001_v12, %v3536_v34 }
0x1c51   : > { %v3540_v44 = vcombine.high %v3538_v39, %v3538_v39 }
0x1c52   : > { %v3327_v0 = vpop.permute.xlu1 %3326 }
0x1c53   : > { %3329 = vst.msk [vmem:[%s4385_s17 + $0x4] sm:$0xf] %vm1731_vm13, %v3327_v0 }
0x1c54   : > { %3542 = vst.msk [vmem:[%s4385_s17 + $0x4] sm:$0xf] %vm2148_vm14, %v3540_v44 }
0x1c55 PF: > { %s17_s24 = sadd.s32 1, %s4012_s24  }
0x1c56   : > { %p14_p4 = scmp.ge.s32.totalorder %s17_s24, 4  }
0x1c58   :  { %16 = sbr.rel (!%p14_p4) target bundleno = 1 (0x1), region = 110 }

</bundles_post_ra>
